<compile_context>
chip_gen: v7x
topology: tpu7x:2x2x1
jax: 0.10.0
libtpu: 0.0.40
codegen_flags: <defaults>
</compile_context>

<pallas_src>
import functools

import jax
import jax.numpy as jnp
from jax import lax
from jax.experimental import pallas as pl
from jax.experimental.pallas import tpu as pltpu


# ---------------------------------------------------------------------------
# Fused GhostModule kernel (one grid step = one (batch, row-tile) output block).
# ---------------------------------------------------------------------------
def _ghost_kernel(x_ref, w1_ref, s1_ref, b1_ref, w2f_ref, s2f_ref, b2f_ref,
                  bmf_ref, o_ref, yf_ref, *, TH, H, W, K, MID):
    pad = K // 2
    thp = TH + 2 * pad
    g = 2 * MID                      # out_c
    wg = W * g
    cin = x_ref.shape[-1]

    r = pl.program_id(1)
    r0 = pl.multiple_of(r * TH, TH)

    # ---- gather input rows [r0-pad, r0+TH+pad) from the per-batch resident image
    #      (starts clamped in-bounds; out-of-image rows are masked out of x1 below).
    main = x_ref[0, pl.ds(r0, TH), :, :]                                   # (TH, W, Cin)
    if pad > 0:
        top = x_ref[0, pl.ds(jnp.maximum(r0 - pad, 0), pad), :, :]
        bot = x_ref[0, pl.ds(jnp.minimum(r0 + TH, H - pad), pad), :, :]
        x_ext = jnp.concatenate([top, main, bot], axis=0)                  # (THP, W, Cin)
    else:
        x_ext = main

    # ---- primary 1x1 conv + folded BN + ReLU -> x1 (channels on lanes)
    if cin <= 8:
        acc1 = jnp.zeros((thp, W, MID), jnp.float32)
        for c in range(cin):
            acc1 = acc1 + x_ext[:, :, c:c + 1].astype(jnp.float32) * w1_ref[c:c + 1, :]
    else:
        acc1 = jnp.dot(
            x_ext.reshape(thp * W, cin).astype(jnp.float32), w1_ref[...],
            preferred_element_type=jnp.float32).reshape(thp, W, MID)
    x1 = jnp.maximum(acc1 * s1_ref[...] + b1_ref[...], 0.0)                # (THP, W, MID)

    # rows outside the image must be exactly zero in x1-space (conv zero padding)
    if pad > 0:
        grow = r0 - pad + lax.broadcasted_iota(jnp.int32, (thp, 1, 1), 0)
        x1 = jnp.where((grow >= 0) & (grow < H), x1, 0.0)

    # ---- relayout once into flat "dual" rows: lane = w*out_c + j, x1 in both halves.
    #      The zero column halo is part of this ONE dense, aligned scratch store.
    xd = jnp.concatenate([x1, x1], axis=-1)                                # (THP, W, g)
    cols = []
    if pad > 0:
        zcol = jnp.zeros((thp, pad * g), jnp.float32)
        cols.append(zcol)
    for w in range(W):
        cols.append(xd[:, w, :])                                           # (THP, g)
    if pad > 0:
        cols.append(zcol)
    yf_ref[...] = jnp.concatenate(cols, axis=-1).astype(yf_ref.dtype)      # (THP, WGP)

    # ---- cheap operation: depthwise KxK conv as K*K full-width FMAs.  The pre-tiled
    #      weight vectors are non-zero only in the x2 half of each w-block, so the
    #      duplicated x1 copy / pad lanes contribute nothing.
    acc2 = jnp.zeros((TH, wg), jnp.float32)
    for dy in range(K):
        for dx in range(K):
            tap = yf_ref[dy:dy + TH, dx * g:dx * g + wg]
            i = dy * K + dx
            acc2 = acc2 + tap.astype(jnp.float32) * w2f_ref[i:i + 1, :]
    cheap = jnp.maximum(acc2 * s2f_ref[...] + b2f_ref[...], 0.0)           # x2 half, 0 elsewhere

    # ---- fused concat: primary half comes straight back from the flat scratch
    prim = yf_ref[pad:pad + TH, pad * g:pad * g + wg].astype(jnp.float32) * bmf_ref[...]
    o_ref[0] = (cheap + prim).astype(o_ref.dtype)                          # (TH, W*out_c)


# ---------------------------------------------------------------------------
# Row-tile / VMEM planning (generation-aware).
# ---------------------------------------------------------------------------
def _plan(n, h, w, cin, mid, k, act_bytes):
    pad = k // 2
    g = 2 * mid
    wg = w * g
    wgp = (w + 2 * pad) * g

    try:
        cap = int(pltpu.get_tpu_info().vmem_capacity_bytes)  # 64 MiB v7x, 128 MiB v5e/v6e
    except Exception:
        cap = 64 * 1024 * 1024
    budget = int(min(cap * 0.70, 96 * 1024 * 1024))

    rl = lambda v: -(-v // 128) * 128    # lane padding
    rs = lambda v: -(-v // 8) * 8        # sublane padding

    resident_in = 2 * h * rs(w) * rl(cin) * act_bytes        # double-buffered input block
    params_b = 2 * (rl(mid) * (cin + 4) + rl(wg) * (k * k + 3)) * 4

    def footprint(th):
        thp = th + 2 * pad
        out_b = 2 * rs(th) * rl(wg) * 4
        scr_b = rs(thp) * rl(wgp) * act_bytes
        live_b = 8 * rs(thp) * rl(max(wg, w * cin)) * 4       # live-value / spill allowance
        return resident_in + params_b + out_b + scr_b + live_b + (2 << 20)

    # TH must divide H and keep the output block (8,128)-legal: TH == H or TH % 8 == 0.
    cand = [d for d in range(1, h + 1) if h % d == 0 and (d == h or d % 8 == 0)]
    fitting = [th for th in sorted(cand, reverse=True) if footprint(th) <= budget]
    if not fitting:
        # TODO(synk): manual row-tiled input DMA (memory_space=pl.ANY + make_async_copy)
        # for images whose full-height resident block exceeds the v7x VMEM budget.
        return min(cand), budget
    th = fitting[0]
    steps = n * (h // th)
    if steps < 2 or steps % 2 == 1:
        # prefer an even number of grid steps (keeps both v7x TensorCores busy),
        # but never shrink the tile by more than 2x for it.
        for alt in fitting[1:]:
            s = n * (h // alt)
            if s % 2 == 0 and alt * 2 >= th:
                return alt, budget
    return th, budget


# ---------------------------------------------------------------------------
# Wrapper: NHWC in / NHWC out fused GhostModule forward (single pallas_call).
# ---------------------------------------------------------------------------
def ghost_fused(x_nhwc, params):
    n, h, w, cin = x_nhwc.shape
    w1 = params["w1"]
    mid = w1.shape[1]
    k = params["w2"].shape[0]
    pad = k // 2
    g = 2 * mid
    wg = w * g
    wgp = (w + 2 * pad) * g
    act_dtype = x_nhwc.dtype
    act_bytes = jnp.dtype(act_dtype).itemsize

    th, vmem_limit = _plan(n, h, w, cin, mid, k, act_bytes)
    r_tiles = h // th
    thp = th + 2 * pad

    # folded BN for the primary conv (applied while channels sit on lanes)
    s1 = params["scale1"].reshape(1, mid).astype(jnp.float32)
    b1 = params["bias1"].reshape(1, mid).astype(jnp.float32)

    # pre-tiled lane vectors for the flat (w*out_c) layout: depthwise weights, folded
    # BN and the concat mask live only in the x2 half of each w-block.
    zero_half = jnp.zeros((w, mid), jnp.float32)
    w2 = params["w2"].astype(jnp.float32).reshape(k * k, 1, mid)
    w2f = jnp.concatenate(
        [jnp.zeros((k * k, w, mid), jnp.float32),
         jnp.broadcast_to(w2, (k * k, w, mid))], axis=-1).reshape(k * k, wg)
    s2f = jnp.concatenate(
        [zero_half, jnp.broadcast_to(params["scale2"].astype(jnp.float32), (w, mid))],
        axis=-1).reshape(1, wg)
    b2f = jnp.concatenate(
        [zero_half, jnp.broadcast_to(params["bias2"].astype(jnp.float32), (w, mid))],
        axis=-1).reshape(1, wg)
    bmf = jnp.concatenate(
        [jnp.ones((w, mid), jnp.float32), zero_half], axis=-1).reshape(1, wg)

    kernel = functools.partial(_ghost_kernel, TH=th, H=h, W=w, K=k, MID=mid)

    out_flat = pl.pallas_call(
        kernel,
        out_shape=jax.ShapeDtypeStruct((n, h, wg), act_dtype),
        grid=(n, r_tiles),
        in_specs=[
            # full-height image per batch; the block index ignores r so the block stays
            # VMEM-resident across all row tiles of that batch.
            pl.BlockSpec((1, h, w, cin), lambda b, r: (b, 0, 0, 0)),
            pl.BlockSpec((cin, mid), lambda b, r: (0, 0)),
            pl.BlockSpec((1, mid), lambda b, r: (0, 0)),
            pl.BlockSpec((1, mid), lambda b, r: (0, 0)),
            pl.BlockSpec((k * k, wg), lambda b, r: (0, 0)),
            pl.BlockSpec((1, wg), lambda b, r: (0, 0)),
            pl.BlockSpec((1, wg), lambda b, r: (0, 0)),
            pl.BlockSpec((1, wg), lambda b, r: (0, 0)),
        ],
        out_specs=pl.BlockSpec((1, th, wg), lambda b, r: (b, r, 0)),
        scratch_shapes=[pltpu.VMEM((thp, wgp), act_dtype)],
        compiler_params=pltpu.CompilerParams(
            dimension_semantics=("parallel", "parallel"),
            vmem_limit_bytes=int(vmem_limit),
        ),
    )(x_nhwc, params["w1"].astype(jnp.float32), s1, b1, w2f, s2f, b2f, bmf)

    return out_flat.reshape(n, h, w, g)   # free reshape back to NHWC


# ---------------------------------------------------------------------------
# Parameter construction (deterministic, BN folded to scale/bias).
# ---------------------------------------------------------------------------
def _fold_bn(gamma, beta, mean, var, eps=1e-5):
    scale = gamma / jnp.sqrt(var + eps)
    bias = beta - mean * scale
    return scale, bias


def init_ghost_params(key, in_ch, out_ch, kernel=3):
    assert out_ch % 2 == 0, "GhostModule spec uses mid_ch = out_ch // 2 and concat"
    mid_ch = out_ch // 2
    ks = jax.random.split(key, 10)
    # primary_conv: Conv2d(in_ch, mid_ch, 1, stride, pad=0, bias=False) + BN + ReLU
    w1 = 0.1 * jax.random.normal(ks[0], (in_ch, mid_ch), jnp.float32)
    g1 = 1.0 + 0.1 * jax.random.normal(ks[1], (mid_ch,), jnp.float32)
    b1 = 0.1 * jax.random.normal(ks[2], (mid_ch,), jnp.float32)
    m1 = 0.1 * jax.random.normal(ks[3], (mid_ch,), jnp.float32)
    v1 = jnp.abs(jax.random.normal(ks[4], (mid_ch,), jnp.float32)) + 0.5
    scale1, bias1 = _fold_bn(g1, b1, m1, v1)
    # cheap_operation: depthwise Conv2d(mid_ch, mid_ch, k, 1, k//2, groups=mid_ch) + BN + ReLU
    w2 = 0.1 * jax.random.normal(ks[5], (kernel, kernel, mid_ch), jnp.float32)
    g2 = 1.0 + 0.1 * jax.random.normal(ks[6], (mid_ch,), jnp.float32)
    b2 = 0.1 * jax.random.normal(ks[7], (mid_ch,), jnp.float32)
    m2 = 0.1 * jax.random.normal(ks[8], (mid_ch,), jnp.float32)
    v2 = jnp.abs(jax.random.normal(ks[9], (mid_ch,), jnp.float32)) + 0.5
    scale2, bias2 = _fold_bn(g2, b2, m2, v2)
    return dict(w1=w1, scale1=scale1, bias1=bias1,
                w2=w2, scale2=scale2, bias2=bias2)


# ---------------------------------------------------------------------------
# GhostModule forward (NCHW in / NCHW out, matching PyTorch).
# ---------------------------------------------------------------------------
def ghost_module_forward(x_nchw, params, stride=1):
    # Boundary layout ops kept in XLA only for PyTorch NCHW parity.
    x = jnp.transpose(x_nchw, (0, 2, 3, 1))
    if stride > 1:
        # 1x1 conv with pad=0 and stride s == spatial subsampling before the conv.
        # TODO(synk): fold the stride into the kernel's input DMA (strided pl.ds /
        # index_map) to avoid this extra HBM pass.
        x = x[:, ::stride, ::stride, :]
    out_nhwc = ghost_fused(x, params)
    return jnp.transpose(out_nhwc, (0, 3, 1, 2))


# ---------------------------------------------------------------------------
# Pure-JAX reference (same folded-BN math) for a correctness check.
# ---------------------------------------------------------------------------
def _reference_forward(x_nchw, params, stride=1):
    x = jnp.transpose(x_nchw, (0, 2, 3, 1))
    if stride > 1:
        x = x[:, ::stride, ::stride, :]
    x1 = jnp.maximum(
        jnp.einsum("nhwc,cm->nhwm", x, params["w1"]) * params["scale1"]
        + params["bias1"], 0.0)
    k = params["w2"].shape[0]
    pad = k // 2
    h, w = x1.shape[1], x1.shape[2]
    xp = jnp.pad(x1, ((0, 0), (pad, pad), (pad, pad), (0, 0)))
    acc = jnp.zeros_like(x1)
    for dy in range(k):
        for dx in range(k):
            acc = acc + xp[:, dy:dy + h, dx:dx + w, :] * params["w2"][dy, dx]
    x2 = jnp.maximum(acc * params["scale2"] + params["bias2"], 0.0)
    out = jnp.concatenate([x1, x2], axis=-1)
    return jnp.transpose(out, (0, 3, 1, 2))


if __name__ == "__main__":
    key = jax.random.PRNGKey(0)
    k_x, k_p = jax.random.split(key)

    N, IN_CH, OUT_CH, H, W = 2, 4, 8, 16, 16
    x = jax.random.normal(k_x, (N, IN_CH, H, W), jnp.float32)
    params = init_ghost_params(k_p, IN_CH, OUT_CH, kernel=3)

    out = ghost_module_forward(x, params, stride=1)
    out = jax.block_until_ready(out)

    assert out.shape == (N, OUT_CH, H, W), out.shape
    assert out.dtype == jnp.float32

    ref = _reference_forward(x, params, stride=1)
    assert jnp.allclose(out, ref, rtol=1e-4, atol=1e-4), float(jnp.max(jnp.abs(out - ref)))

    print("KERNEL_OK")
</pallas_src>

<mosaic_0001>
module attributes {stable_mosaic.version = 11 : i64} {
  func.func @_ghost_kernel(%arg0: i32, %arg1: i32, %arg2: memref<1x16x16x4xf32, #tpu.memory_space<vmem>>, %arg3: memref<4x4xf32, #tpu.memory_space<vmem>>, %arg4: memref<1x4xf32, #tpu.memory_space<vmem>>, %arg5: memref<1x4xf32, #tpu.memory_space<vmem>>, %arg6: memref<9x128xf32, #tpu.memory_space<vmem>>, %arg7: memref<1x128xf32, #tpu.memory_space<vmem>>, %arg8: memref<1x128xf32, #tpu.memory_space<vmem>>, %arg9: memref<1x128xf32, #tpu.memory_space<vmem>>, %arg10: memref<1x16x128xf32, #tpu.memory_space<vmem>>, %arg11: memref<18x144xf32, #tpu.memory_space<vmem>>) attributes {dimension_semantics = [#tpu.dimension_semantics<parallel>, #tpu.dimension_semantics<parallel>], iteration_bounds = array<i64: 2, 1>, scalar_prefetch = 0 : i64, scratch_operands = 1 : i64, tpu.core_type = #tpu.core_type<tc>, window_params = [{transform_indices = @transform_0, window_bounds = array<i64: 1, 16, 16, 4>}, {pipeline_mode = #tpu.pipeline_mode<synchronous>, transform_indices = @transform_1, window_bounds = array<i64: 4, 4>}, {pipeline_mode = #tpu.pipeline_mode<synchronous>, transform_indices = @transform_2, window_bounds = array<i64: 1, 4>}, {pipeline_mode = #tpu.pipeline_mode<synchronous>, transform_indices = @transform_3, window_bounds = array<i64: 1, 4>}, {pipeline_mode = #tpu.pipeline_mode<synchronous>, transform_indices = @transform_4, window_bounds = array<i64: 9, 128>}, {pipeline_mode = #tpu.pipeline_mode<synchronous>, transform_indices = @transform_5, window_bounds = array<i64: 1, 128>}, {pipeline_mode = #tpu.pipeline_mode<synchronous>, transform_indices = @transform_6, window_bounds = array<i64: 1, 128>}, {pipeline_mode = #tpu.pipeline_mode<synchronous>, transform_indices = @transform_7, window_bounds = array<i64: 1, 128>}, {transform_indices = @transform_8, window_bounds = array<i64: 1, 16, 128>}]} {
    %c16_i32 = arith.constant 16 : i32
    %0 = arith.muli %arg1, %c16_i32 : i32
    %1 = tpu.assume_multiple %0, 16 : i32
    %c0 = arith.constant 0 : index
    %2 = arith.index_cast %1 : i32 to index
    %c0_0 = arith.constant 0 : index
    %c0_1 = arith.constant 0 : index
    %3 = vector.load %arg2[%c0, %2, %c0_0, %c0_1] : memref<1x16x16x4xf32, #tpu.memory_space<vmem>>, vector<1x16x16x4xf32>
    %4 = vector.shape_cast %3 : vector<1x16x16x4xf32> to vector<16x16x4xf32>
    %c1_i32 = arith.constant 1 : i32
    %5 = arith.subi %1, %c1_i32 : i32
    %c0_i32 = arith.constant 0 : i32
    %6 = arith.maxsi %5, %c0_i32 : i32
    %c0_2 = arith.constant 0 : index
    %7 = arith.index_cast %6 : i32 to index
    %c0_3 = arith.constant 0 : index
    %c0_4 = arith.constant 0 : index
    %8 = vector.load %arg2[%c0_2, %7, %c0_3, %c0_4] : memref<1x16x16x4xf32, #tpu.memory_space<vmem>>, vector<1x1x16x4xf32>
    %9 = vector.shape_cast %8 : vector<1x1x16x4xf32> to vector<1x16x4xf32>
    %c16_i32_5 = arith.constant 16 : i32
    %10 = arith.addi %1, %c16_i32_5 : i32
    %c15_i32 = arith.constant 15 : i32
    %11 = arith.minsi %10, %c15_i32 : i32
    %c0_6 = arith.constant 0 : index
    %12 = arith.index_cast %11 : i32 to index
    %c0_7 = arith.constant 0 : index
    %c0_8 = arith.constant 0 : index
    %13 = vector.load %arg2[%c0_6, %12, %c0_7, %c0_8] : memref<1x16x16x4xf32, #tpu.memory_space<vmem>>, vector<1x1x16x4xf32>
    %14 = vector.shape_cast %13 : vector<1x1x16x4xf32> to vector<1x16x4xf32>
    %15 = tpu.concatenate %9, %4, %14 in 0 : vector<1x16x4xf32>, vector<16x16x4xf32>, vector<1x16x4xf32> -> vector<18x16x4xf32>
    %cst = arith.constant 0.000000e+00 : f32
    %16 = vector.broadcast %cst : f32 to vector<18x16x4xf32>
    %17 = vector.extract_strided_slice %15 {offsets = [0, 0, 0], sizes = [18, 16, 1], strides = [1, 1, 1]} : vector<18x16x4xf32> to vector<18x16x1xf32>
    %c0_9 = arith.constant 0 : index
    %c0_10 = arith.constant 0 : index
    %18 = vector.load %arg3[%c0_9, %c0_10] : memref<4x4xf32, #tpu.memory_space<vmem>>, vector<1x4xf32>
    %19 = vector.shape_cast %18 : vector<1x4xf32> to vector<1x1x4xf32>
    %20 = vector.broadcast %17 : vector<18x16x1xf32> to vector<18x16x4xf32>
    %21 = vector.broadcast %19 : vector<1x1x4xf32> to vector<18x16x4xf32>
    %22 = arith.mulf %20, %21 : vector<18x16x4xf32>
    %23 = arith.addf %16, %22 : vector<18x16x4xf32>
    %24 = vector.extract_strided_slice %15 {offsets = [0, 0, 1], sizes = [18, 16, 1], strides = [1, 1, 1]} : vector<18x16x4xf32> to vector<18x16x1xf32>
    %c1 = arith.constant 1 : index
    %c0_11 = arith.constant 0 : index
    %25 = vector.load %arg3[%c1, %c0_11] : memref<4x4xf32, #tpu.memory_space<vmem>>, vector<1x4xf32>
    %26 = vector.shape_cast %25 : vector<1x4xf32> to vector<1x1x4xf32>
    %27 = vector.broadcast %24 : vector<18x16x1xf32> to vector<18x16x4xf32>
    %28 = vector.broadcast %26 : vector<1x1x4xf32> to vector<18x16x4xf32>
    %29 = arith.mulf %27, %28 : vector<18x16x4xf32>
    %30 = arith.addf %23, %29 : vector<18x16x4xf32>
    %31 = vector.extract_strided_slice %15 {offsets = [0, 0, 2], sizes = [18, 16, 1], strides = [1, 1, 1]} : vector<18x16x4xf32> to vector<18x16x1xf32>
    %c2 = arith.constant 2 : index
    %c0_12 = arith.constant 0 : index
    %32 = vector.load %arg3[%c2, %c0_12] : memref<4x4xf32, #tpu.memory_space<vmem>>, vector<1x4xf32>
    %33 = vector.shape_cast %32 : vector<1x4xf32> to vector<1x1x4xf32>
    %34 = vector.broadcast %31 : vector<18x16x1xf32> to vector<18x16x4xf32>
    %35 = vector.broadcast %33 : vector<1x1x4xf32> to vector<18x16x4xf32>
    %36 = arith.mulf %34, %35 : vector<18x16x4xf32>
    %37 = arith.addf %30, %36 : vector<18x16x4xf32>
    %38 = vector.extract_strided_slice %15 {offsets = [0, 0, 3], sizes = [18, 16, 1], strides = [1, 1, 1]} : vector<18x16x4xf32> to vector<18x16x1xf32>
    %c3 = arith.constant 3 : index
    %c0_13 = arith.constant 0 : index
    %39 = vector.load %arg3[%c3, %c0_13] : memref<4x4xf32, #tpu.memory_space<vmem>>, vector<1x4xf32>
    %40 = vector.shape_cast %39 : vector<1x4xf32> to vector<1x1x4xf32>
    %41 = vector.broadcast %38 : vector<18x16x1xf32> to vector<18x16x4xf32>
    %42 = vector.broadcast %40 : vector<1x1x4xf32> to vector<18x16x4xf32>
    %43 = arith.mulf %41, %42 : vector<18x16x4xf32>
    %44 = arith.addf %37, %43 : vector<18x16x4xf32>
    %c0_14 = arith.constant 0 : index
    %c0_15 = arith.constant 0 : index
    %45 = vector.load %arg4[%c0_14, %c0_15] : memref<1x4xf32, #tpu.memory_space<vmem>>, vector<1x4xf32>
    %46 = vector.shape_cast %45 : vector<1x4xf32> to vector<1x1x4xf32>
    %47 = vector.broadcast %46 : vector<1x1x4xf32> to vector<18x16x4xf32>
    %48 = arith.mulf %44, %47 : vector<18x16x4xf32>
    %c0_16 = arith.constant 0 : index
    %c0_17 = arith.constant 0 : index
    %49 = vector.load %arg5[%c0_16, %c0_17] : memref<1x4xf32, #tpu.memory_space<vmem>>, vector<1x4xf32>
    %50 = vector.shape_cast %49 : vector<1x4xf32> to vector<1x1x4xf32>
    %51 = vector.broadcast %50 : vector<1x1x4xf32> to vector<18x16x4xf32>
    %52 = arith.addf %48, %51 : vector<18x16x4xf32>
    %cst_18 = arith.constant 0.000000e+00 : f32
    %53 = vector.broadcast %cst_18 : f32 to vector<18x16x4xf32>
    %54 = arith.maximumf %52, %53 : vector<18x16x4xf32>
    %c1_i32_19 = arith.constant 1 : i32
    %55 = arith.subi %1, %c1_i32_19 : i32
    %56 = tpu.iota {dimensions = array<i32: 0>} : vector<18x1x1xi32>
    %57 = vector.broadcast %55 : i32 to vector<18x1x1xi32>
    %58 = arith.addi %57, %56 : vector<18x1x1xi32>
    %c0_i32_20 = arith.constant 0 : i32
    %59 = vector.broadcast %c0_i32_20 : i32 to vector<18x1x1xi32>
    %60 = arith.cmpi sge, %58, %59 : vector<18x1x1xi32>
    %c16_i32_21 = arith.constant 16 : i32
    %61 = vector.broadcast %c16_i32_21 : i32 to vector<18x1x1xi32>
    %62 = arith.cmpi slt, %58, %61 : vector<18x1x1xi32>
    %63 = arith.andi %60, %62 : vector<18x1x1xi1>
    %cst_22 = arith.constant 0.000000e+00 : f32
    %64 = vector.shape_cast %63 : vector<18x1x1xi1> to vector<18x1x1xi1>
    %65 = vector.broadcast %64 : vector<18x1x1xi1> to vector<18x16x4xi1>
    %66 = vector.broadcast %cst_22 : f32 to vector<18x16x4xf32>
    %67 = arith.select %65, %54, %66 : vector<18x16x4xi1>, vector<18x16x4xf32>
    %68 = tpu.concatenate %67, %67 in 2 : vector<18x16x4xf32>, vector<18x16x4xf32> -> vector<18x16x8xf32>
    %cst_23 = arith.constant 0.000000e+00 : f32
    %69 = vector.broadcast %cst_23 : f32 to vector<18x8xf32>
    %70 = vector.extract_strided_slice %68 {offsets = [0, 0, 0], sizes = [18, 1, 8], strides = [1, 1, 1]} : vector<18x16x8xf32> to vector<18x1x8xf32>
    %71 = vector.shape_cast %70 : vector<18x1x8xf32> to vector<18x8xf32>
    %72 = vector.extract_strided_slice %68 {offsets = [0, 1, 0], sizes = [18, 1, 8], strides = [1, 1, 1]} : vector<18x16x8xf32> to vector<18x1x8xf32>
    %73 = vector.shape_cast %72 : vector<18x1x8xf32> to vector<18x8xf32>
    %74 = vector.extract_strided_slice %68 {offsets = [0, 2, 0], sizes = [18, 1, 8], strides = [1, 1, 1]} : vector<18x16x8xf32> to vector<18x1x8xf32>
    %75 = vector.shape_cast %74 : vector<18x1x8xf32> to vector<18x8xf32>
    %76 = vector.extract_strided_slice %68 {offsets = [0, 3, 0], sizes = [18, 1, 8], strides = [1, 1, 1]} : vector<18x16x8xf32> to vector<18x1x8xf32>
    %77 = vector.shape_cast %76 : vector<18x1x8xf32> to vector<18x8xf32>
    %78 = vector.extract_strided_slice %68 {offsets = [0, 4, 0], sizes = [18, 1, 8], strides = [1, 1, 1]} : vector<18x16x8xf32> to vector<18x1x8xf32>
    %79 = vector.shape_cast %78 : vector<18x1x8xf32> to vector<18x8xf32>
    %80 = vector.extract_strided_slice %68 {offsets = [0, 5, 0], sizes = [18, 1, 8], strides = [1, 1, 1]} : vector<18x16x8xf32> to vector<18x1x8xf32>
    %81 = vector.shape_cast %80 : vector<18x1x8xf32> to vector<18x8xf32>
    %82 = vector.extract_strided_slice %68 {offsets = [0, 6, 0], sizes = [18, 1, 8], strides = [1, 1, 1]} : vector<18x16x8xf32> to vector<18x1x8xf32>
    %83 = vector.shape_cast %82 : vector<18x1x8xf32> to vector<18x8xf32>
    %84 = vector.extract_strided_slice %68 {offsets = [0, 7, 0], sizes = [18, 1, 8], strides = [1, 1, 1]} : vector<18x16x8xf32> to vector<18x1x8xf32>
    %85 = vector.shape_cast %84 : vector<18x1x8xf32> to vector<18x8xf32>
    %86 = vector.extract_strided_slice %68 {offsets = [0, 8, 0], sizes = [18, 1, 8], strides = [1, 1, 1]} : vector<18x16x8xf32> to vector<18x1x8xf32>
    %87 = vector.shape_cast %86 : vector<18x1x8xf32> to vector<18x8xf32>
    %88 = vector.extract_strided_slice %68 {offsets = [0, 9, 0], sizes = [18, 1, 8], strides = [1, 1, 1]} : vector<18x16x8xf32> to vector<18x1x8xf32>
    %89 = vector.shape_cast %88 : vector<18x1x8xf32> to vector<18x8xf32>
    %90 = vector.extract_strided_slice %68 {offsets = [0, 10, 0], sizes = [18, 1, 8], strides = [1, 1, 1]} : vector<18x16x8xf32> to vector<18x1x8xf32>
    %91 = vector.shape_cast %90 : vector<18x1x8xf32> to vector<18x8xf32>
    %92 = vector.extract_strided_slice %68 {offsets = [0, 11, 0], sizes = [18, 1, 8], strides = [1, 1, 1]} : vector<18x16x8xf32> to vector<18x1x8xf32>
    %93 = vector.shape_cast %92 : vector<18x1x8xf32> to vector<18x8xf32>
    %94 = vector.extract_strided_slice %68 {offsets = [0, 12, 0], sizes = [18, 1, 8], strides = [1, 1, 1]} : vector<18x16x8xf32> to vector<18x1x8xf32>
    %95 = vector.shape_cast %94 : vector<18x1x8xf32> to vector<18x8xf32>
    %96 = vector.extract_strided_slice %68 {offsets = [0, 13, 0], sizes = [18, 1, 8], strides = [1, 1, 1]} : vector<18x16x8xf32> to vector<18x1x8xf32>
    %97 = vector.shape_cast %96 : vector<18x1x8xf32> to vector<18x8xf32>
    %98 = vector.extract_strided_slice %68 {offsets = [0, 14, 0], sizes = [18, 1, 8], strides = [1, 1, 1]} : vector<18x16x8xf32> to vector<18x1x8xf32>
    %99 = vector.shape_cast %98 : vector<18x1x8xf32> to vector<18x8xf32>
    %100 = vector.extract_strided_slice %68 {offsets = [0, 15, 0], sizes = [18, 1, 8], strides = [1, 1, 1]} : vector<18x16x8xf32> to vector<18x1x8xf32>
    %101 = vector.shape_cast %100 : vector<18x1x8xf32> to vector<18x8xf32>
    %102 = tpu.concatenate %69, %71, %73, %75, %77, %79, %81, %83, %85, %87, %89, %91, %93, %95, %97, %99 in 1 : vector<18x8xf32>, vector<18x8xf32>, vector<18x8xf32>, vector<18x8xf32>, vector<18x8xf32>, vector<18x8xf32>, vector<18x8xf32>, vector<18x8xf32>, vector<18x8xf32>, vector<18x8xf32>, vector<18x8xf32>, vector<18x8xf32>, vector<18x8xf32>, vector<18x8xf32>, vector<18x8xf32>, vector<18x8xf32> -> vector<18x128xf32>
    %103 = tpu.concatenate %101, %69 in 1 : vector<18x8xf32>, vector<18x8xf32> -> vector<18x16xf32>
    %104 = tpu.concatenate %102, %103 in 1 : vector<18x128xf32>, vector<18x16xf32> -> vector<18x144xf32>
    %c0_24 = arith.constant 0 : index
    %c0_25 = arith.constant 0 : index
    %105 = vector.load %arg11[%c0_24, %c0_25] : memref<18x144xf32, #tpu.memory_space<vmem>>, vector<18x144xf32>
    tpu.vector_store %arg11[%c0_24, %c0_25], %104 {strides = array<i32>} : memref<18x144xf32, #tpu.memory_space<vmem>>, vector<18x144xf32>,
    %cst_26 = arith.constant 0.000000e+00 : f32
    %106 = vector.broadcast %cst_26 : f32 to vector<16x128xf32>
    %c0_27 = arith.constant 0 : index
    %c0_28 = arith.constant 0 : index
    %107 = vector.load %arg11[%c0_27, %c0_28] : memref<18x144xf32, #tpu.memory_space<vmem>>, vector<16x128xf32>
    %c0_29 = arith.constant 0 : index
    %c0_30 = arith.constant 0 : index
    %108 = vector.load %arg6[%c0_29, %c0_30] : memref<9x128xf32, #tpu.memory_space<vmem>>, vector<1x128xf32>
    %109 = vector.broadcast %108 : vector<1x128xf32> to vector<16x128xf32>
    %110 = arith.mulf %107, %109 : vector<16x128xf32>
    %111 = arith.addf %106, %110 : vector<16x128xf32>
    %c0_31 = arith.constant 0 : index
    %c8 = arith.constant 8 : index
    %112 = vector.load %arg11[%c0_31, %c8] : memref<18x144xf32, #tpu.memory_space<vmem>>, vector<16x128xf32>
    %c1_32 = arith.constant 1 : index
    %c0_33 = arith.constant 0 : index
    %113 = vector.load %arg6[%c1_32, %c0_33] : memref<9x128xf32, #tpu.memory_space<vmem>>, vector<1x128xf32>
    %114 = vector.broadcast %113 : vector<1x128xf32> to vector<16x128xf32>
    %115 = arith.mulf %112, %114 : vector<16x128xf32>
    %116 = arith.addf %111, %115 : vector<16x128xf32>
    %c0_34 = arith.constant 0 : index
    %c16 = arith.constant 16 : index
    %117 = vector.load %arg11[%c0_34, %c16] : memref<18x144xf32, #tpu.memory_space<vmem>>, vector<16x128xf32>
    %c2_35 = arith.constant 2 : index
    %c0_36 = arith.constant 0 : index
    %118 = vector.load %arg6[%c2_35, %c0_36] : memref<9x128xf32, #tpu.memory_space<vmem>>, vector<1x128xf32>
    %119 = vector.broadcast %118 : vector<1x128xf32> to vector<16x128xf32>
    %120 = arith.mulf %117, %119 : vector<16x128xf32>
    %121 = arith.addf %116, %120 : vector<16x128xf32>
    %c1_37 = arith.constant 1 : index
    %c0_38 = arith.constant 0 : index
    %122 = vector.load %arg11[%c1_37, %c0_38] : memref<18x144xf32, #tpu.memory_space<vmem>>, vector<16x128xf32>
    %c3_39 = arith.constant 3 : index
    %c0_40 = arith.constant 0 : index
    %123 = vector.load %arg6[%c3_39, %c0_40] : memref<9x128xf32, #tpu.memory_space<vmem>>, vector<1x128xf32>
    %124 = vector.broadcast %123 : vector<1x128xf32> to vector<16x128xf32>
    %125 = arith.mulf %122, %124 : vector<16x128xf32>
    %126 = arith.addf %121, %125 : vector<16x128xf32>
    %c1_41 = arith.constant 1 : index
    %c8_42 = arith.constant 8 : index
    %127 = vector.load %arg11[%c1_41, %c8_42] : memref<18x144xf32, #tpu.memory_space<vmem>>, vector<16x128xf32>
    %c4 = arith.constant 4 : index
    %c0_43 = arith.constant 0 : index
    %128 = vector.load %arg6[%c4, %c0_43] : memref<9x128xf32, #tpu.memory_space<vmem>>, vector<1x128xf32>
    %129 = vector.broadcast %128 : vector<1x128xf32> to vector<16x128xf32>
    %130 = arith.mulf %127, %129 : vector<16x128xf32>
    %131 = arith.addf %126, %130 : vector<16x128xf32>
    %c1_44 = arith.constant 1 : index
    %c16_45 = arith.constant 16 : index
    %132 = vector.load %arg11[%c1_44, %c16_45] : memref<18x144xf32, #tpu.memory_space<vmem>>, vector<16x128xf32>
    %c5 = arith.constant 5 : index
    %c0_46 = arith.constant 0 : index
    %133 = vector.load %arg6[%c5, %c0_46] : memref<9x128xf32, #tpu.memory_space<vmem>>, vector<1x128xf32>
    %134 = vector.broadcast %133 : vector<1x128xf32> to vector<16x128xf32>
    %135 = arith.mulf %132, %134 : vector<16x128xf32>
    %136 = arith.addf %131, %135 : vector<16x128xf32>
    %c2_47 = arith.constant 2 : index
    %c0_48 = arith.constant 0 : index
    %137 = vector.load %arg11[%c2_47, %c0_48] : memref<18x144xf32, #tpu.memory_space<vmem>>, vector<16x128xf32>
    %c6 = arith.constant 6 : index
    %c0_49 = arith.constant 0 : index
    %138 = vector.load %arg6[%c6, %c0_49] : memref<9x128xf32, #tpu.memory_space<vmem>>, vector<1x128xf32>
    %139 = vector.broadcast %138 : vector<1x128xf32> to vector<16x128xf32>
    %140 = arith.mulf %137, %139 : vector<16x128xf32>
    %141 = arith.addf %136, %140 : vector<16x128xf32>
    %c2_50 = arith.constant 2 : index
    %c8_51 = arith.constant 8 : index
    %142 = vector.load %arg11[%c2_50, %c8_51] : memref<18x144xf32, #tpu.memory_space<vmem>>, vector<16x128xf32>
    %c7 = arith.constant 7 : index
    %c0_52 = arith.constant 0 : index
    %143 = vector.load %arg6[%c7, %c0_52] : memref<9x128xf32, #tpu.memory_space<vmem>>, vector<1x128xf32>
    %144 = vector.broadcast %143 : vector<1x128xf32> to vector<16x128xf32>
    %145 = arith.mulf %142, %144 : vector<16x128xf32>
    %146 = arith.addf %141, %145 : vector<16x128xf32>
    %c2_53 = arith.constant 2 : index
    %c16_54 = arith.constant 16 : index
    %147 = vector.load %arg11[%c2_53, %c16_54] : memref<18x144xf32, #tpu.memory_space<vmem>>, vector<16x128xf32>
    %c8_55 = arith.constant 8 : index
    %c0_56 = arith.constant 0 : index
    %148 = vector.load %arg6[%c8_55, %c0_56] : memref<9x128xf32, #tpu.memory_space<vmem>>, vector<1x128xf32>
    %149 = vector.broadcast %148 : vector<1x128xf32> to vector<16x128xf32>
    %150 = arith.mulf %147, %149 : vector<16x128xf32>
    %151 = arith.addf %146, %150 : vector<16x128xf32>
    %c0_57 = arith.constant 0 : index
    %c0_58 = arith.constant 0 : index
    %152 = vector.load %arg7[%c0_57, %c0_58] : memref<1x128xf32, #tpu.memory_space<vmem>>, vector<1x128xf32>
    %153 = vector.broadcast %152 : vector<1x128xf32> to vector<16x128xf32>
    %154 = arith.mulf %151, %153 : vector<16x128xf32>
    %c0_59 = arith.constant 0 : index
    %c0_60 = arith.constant 0 : index
    %155 = vector.load %arg8[%c0_59, %c0_60] : memref<1x128xf32, #tpu.memory_space<vmem>>, vector<1x128xf32>
    %156 = vector.broadcast %155 : vector<1x128xf32> to vector<16x128xf32>
    %157 = arith.addf %154, %156 : vector<16x128xf32>
    %cst_61 = arith.constant 0.000000e+00 : f32
    %158 = vector.broadcast %cst_61 : f32 to vector<16x128xf32>
    %159 = arith.maximumf %157, %158 : vector<16x128xf32>
    %c1_62 = arith.constant 1 : index
    %c8_63 = arith.constant 8 : index
    %160 = vector.load %arg11[%c1_62, %c8_63] : memref<18x144xf32, #tpu.memory_space<vmem>>, vector<16x128xf32>
    %c0_64 = arith.constant 0 : index
    %c0_65 = arith.constant 0 : index
    %161 = vector.load %arg9[%c0_64, %c0_65] : memref<1x128xf32, #tpu.memory_space<vmem>>, vector<1x128xf32>
    %162 = vector.broadcast %161 : vector<1x128xf32> to vector<16x128xf32>
    %163 = arith.mulf %160, %162 : vector<16x128xf32>
    %164 = arith.addf %159, %163 : vector<16x128xf32>
    %c0_66 = arith.constant 0 : index
    %c0_67 = arith.constant 0 : index
    %c0_68 = arith.constant 0 : index
    %165 = vector.load %arg10[%c0_66, %c0_67, %c0_68] : memref<1x16x128xf32, #tpu.memory_space<vmem>>, vector<1x16x128xf32>
    %166 = vector.shape_cast %165 : vector<1x16x128xf32> to vector<16x128xf32>
    %167 = vector.shape_cast %164 : vector<16x128xf32> to vector<1x16x128xf32>
    tpu.vector_store %arg10[%c0_66, %c0_67, %c0_68], %167 {strides = array<i32>} : memref<1x16x128xf32, #tpu.memory_space<vmem>>, vector<1x16x128xf32>,
    return
  }
  func.func @transform_0(%arg0: i32, %arg1: i32) -> (i32, i32, i32, i32) {
    %c0_i32 = arith.constant 0 : i32
    %c0_i32_0 = arith.constant 0 : i32
    %c0_i32_1 = arith.constant 0 : i32
    %c0_i32_2 = arith.constant 0 : i32
    return %arg0, %c0_i32, %c0_i32_0, %c0_i32_1 : i32, i32, i32, i32
  }
  func.func @transform_1(%arg0: i32, %arg1: i32) -> (i32, i32) {
    %c0_i32 = arith.constant 0 : i32
    %c0_i32_0 = arith.constant 0 : i32
    %c0_i32_1 = arith.constant 0 : i32
    return %c0_i32, %c0_i32_0 : i32, i32
  }
  func.func @transform_2(%arg0: i32, %arg1: i32) -> (i32, i32) {
    %c0_i32 = arith.constant 0 : i32
    %c0_i32_0 = arith.constant 0 : i32
    %c0_i32_1 = arith.constant 0 : i32
    return %c0_i32, %c0_i32_0 : i32, i32
  }
  func.func @transform_3(%arg0: i32, %arg1: i32) -> (i32, i32) {
    %c0_i32 = arith.constant 0 : i32
    %c0_i32_0 = arith.constant 0 : i32
    %c0_i32_1 = arith.constant 0 : i32
    return %c0_i32, %c0_i32_0 : i32, i32
  }
  func.func @transform_4(%arg0: i32, %arg1: i32) -> (i32, i32) {
    %c0_i32 = arith.constant 0 : i32
    %c0_i32_0 = arith.constant 0 : i32
    %c0_i32_1 = arith.constant 0 : i32
    return %c0_i32, %c0_i32_0 : i32, i32
  }
  func.func @transform_5(%arg0: i32, %arg1: i32) -> (i32, i32) {
    %c0_i32 = arith.constant 0 : i32
    %c0_i32_0 = arith.constant 0 : i32
    %c0_i32_1 = arith.constant 0 : i32
    return %c0_i32, %c0_i32_0 : i32, i32
  }
  func.func @transform_6(%arg0: i32, %arg1: i32) -> (i32, i32) {
    %c0_i32 = arith.constant 0 : i32
    %c0_i32_0 = arith.constant 0 : i32
    %c0_i32_1 = arith.constant 0 : i32
    return %c0_i32, %c0_i32_0 : i32, i32
  }
  func.func @transform_7(%arg0: i32, %arg1: i32) -> (i32, i32) {
    %c0_i32 = arith.constant 0 : i32
    %c0_i32_0 = arith.constant 0 : i32
    %c0_i32_1 = arith.constant 0 : i32
    return %c0_i32, %c0_i32_0 : i32, i32
  }
  func.func @transform_8(%arg0: i32, %arg1: i32) -> (i32, i32, i32) {
    %c0_i32 = arith.constant 0 : i32
    %c0_i32_0 = arith.constant 0 : i32
    return %arg0, %arg1, %c0_i32 : i32, i32, i32
  }
}

</mosaic_0001>

<bundles_post_ra>
// kernel: tpu_custom_call.1
= control target key start
LH: loop header
LB: loop body
LE: loop exit
PB: predicated region body
PF: predicated region fallthrough
CT: control target
= control target key end

     0   :  { %13 = vsyncpa [#allocation4], 0  ;;  %s5443_s0 = inlined_call_operand.vmem [shape: f32[2,16,16,4], index: 0, kind: input, shape index: {}]   ;;  %s5444_s1 = inlined_call_operand.vmem [shape: f32[4,4], index: 1, kind: input, shape index: {}]   ;;  %s5445_s2 = inlined_call_operand.vmem [shape: f32[1,4], index: 2, kind: input, shape index: {}]   ;;  %s5446_s3 = inlined_call_operand.vmem [shape: f32[1,4], index: 3, kind: input, shape index: {}]   ;;  %s5447_s4 = inlined_call_operand.vmem [shape: f32[9,128], index: 4, kind: input, shape index: {}]   ;;  %s5448_s5 = inlined_call_operand.vmem [shape: f32[1,128], index: 5, kind: input, shape index: {}]   ;;  %s5449_s6 = inlined_call_operand.vmem [shape: f32[1,128], index: 6, kind: input, shape index: {}]   ;;  %s5450_s7 = inlined_call_operand.vmem [shape: f32[1,128], index: 7, kind: input, shape index: {}]   ;;  %s5451_s8 = inlined_call_operand.hbm [shape: f32[2,16,128], index: 8, kind: output, shape index: {}]  }
   0x1   :  { %15 = vsyncpa [#allocation4 + $0x1], 0  ;;  %s3223_s27 = smov 0   ;;  %s3225_s28 = smov 0  }
   0x2   :  { %s3227_s29 = smov 0   ;;  %s3229_s30 = smov 0  }
   0x3   :  { %s3231_s9 = smov 0   ;;  %s3233_s10 = smov 0  }
   0x4 LB: > { %s2945_s11 = sadd.s32 4294967295, %s3153_s10   ;;  %s2946_s12 = sadd.s32 4294967294, %s3153_s10   ;;  %s3153_s10 = sphi %s3233_s10, %s21_s10   ;;  %s3149_s9 = sphi %s3231_s9, %s5655_s9   ;;  %s3145_s30 = sphi %s3229_s30, %s5654_s30   ;;  %s3141_s29 = sphi %s3227_s29, %s5653_s29   ;;  %s3137_s28 = sphi %s3225_s28, %s5652_s28   ;;  %s3133_s27 = sphi %s3223_s27, %s5651_s27  }
   0x5   : > { %s33_s13 = sadd.s32 1, %s3149_s9  ;;  %s215_s14 = sadd.s32 1, %s3141_s29 }
   0x6   : > { %p35_p0 = scmp.ge.s32.totalorder %s33_s13, 2  ;;  %p225_p1 = scmp.ne.s32.totalorder %s3141_s29, %s3137_s28 }
   0x7   : > { %p226_p2 = scmp.eq.s32.totalorder %s2945_s11, 1  ;;  %p231_p3 = scmp.ne.s32.totalorder %s3137_s28, %s3133_s27 }
   0x8   : > { %s5657_s13 = smov (%p35_p0, %s33_s13), 0  ;;  %p232_p5 = scmp.eq.s32.totalorder %s2946_s12, 1 }
   0x9   : > { %p3263_p4 = por %p226_p2, %p225_p1  ;;  %s210_s16 = ssub.s32 %s3149_s9, %s5657_s13 }
   0xa   : > { %p2949_p6 = scmp.ge.s32.totalorder %s3153_s10, 1  ;;  %p213_p7 = scmp.eq.s32.totalorder %s210_s16, 0 }
   0xb   : > { %p3270_p8 = por %p232_p5, %p231_p3  ;;  %p279_p9 = scmp.lt.s32.totalorder %s3153_s10, 3 }
   0xc   : > { %s3276_s18 = scalar_select %p213_p7, %s3141_s29, %s215_s14  }
   0xd   : > { %p280_p10 = pnand %p2949_p6, %p279_p9 }
   0xf   : > { %283 = sbr.rel (%p280_p10) target bundleno = 948 (0x3b4), region = 52 }
  0x16   : > { %p313_p11 = scmp.lt.s32.totalorder %s3145_s30, 1  ;;  %v3155_v0 = vmov 0   ;;  %v3156_v33 = vmov 1   ;;  %v3157_v36 = vmov 2   ;;  %s3159_s24 = smov 4   ;;  %vm1698_vm0 = vcmask 31744  }
  0x17   : > { %3058 = vset.pattern.permute.xlu1 %v3155_v0  ;;  %3057 = vset.pattern.permute.xlu0 %v3155_v0  ;;  %vm1754_vm1 = vcmask 1041409   ;;  %vm2374_vm2 = vcmask 64512   ;;  %vm1757_vm3 = vcmask 1042434   ;;  %vm1760_vm4 = vcmask 1043459   ;;  %s3161_s25 = smov 8   ;;  %s3162_s26 = smov 16  }
  0x18   : > { %s314_s19 = scalar_select %p313_p11, %s3145_s30, 1  ;;  %vm1763_vm5 = vcmask 1044484   ;;  %vm1766_vm6 = vcmask 1045509   ;;  %vm1769_vm7 = vcmask 1046534   ;;  %vm1772_vm8 = vcmask 1047559  }
  0x19   : > { %s3163_s11 = smov 24   ;;  %s3164_s12 = smov 32   ;;  %vm2460_vm9 = vcmask 1040384   ;;  %vm2378_vm10 = vcmask 130048   ;;  %vm2476_vm11 = vcmask 123904   ;;  %vm2382_vm12 = vcmask 195584  }
  0x1a   : > { %s2978_s20 = sshll.u32 %s314_s19, 8  ;;  %s3165_s14 = smov 40   ;;  %vm2386_vm13 = vcmask 261120   ;;  %vm2390_vm14 = vcmask 326656   ;;  %vm2394_vm15 = vcmask 392192  }
  0x1b   : > { %s3283_s23 = scalar_lea.vmem %s5443_s0, %s2978_s20  ;;  %s3166_s16 = smov 48  }
  0x1c   : > { %v3286_v1 = vld [vmem:[%s3283_s23 + $0x10] sm:$0xff]  ;;  %v3289_v2 = vld [vmem:[%s3283_s23] sm:$0xff]  ;;  %v3294_v3 = vld [vmem:[%s3283_s23 + $0x18] sm:$0xff]  ;;  %s3167_s19 = smov 56   ;;  %s3168_s20 = smov 64  }
  0x1d   : > { %391 = vperm.xlu1 %3058, %v3286_v1   ;;  %381 = vperm.xlu0 %3057, %v3289_v2   ;;  %v3297_v4 = vld [vmem:[%s3283_s23 + $0x8] sm:$0xff]  ;;  %v3305_v6 = vld [vmem:[%s3283_s23 + $0x20] sm:$0xff]  ;;  %v3310_v7 = vld [vmem:[%s3283_s23 + $0x38] sm:$0xff]  ;;  %s3169_s21 = smov 72   ;;  %s3170_s22 = smov 80  }
  0x1e   : > { %v3302_v5 = vld [vmem:[%s3283_s23 + $0x28] sm:$0xff]  ;;  %v3313_v8 = vld [vmem:[%s3283_s23 + $0x30] sm:$0xff]  ;;  %v3321_v10 = vld [vmem:[%s3283_s23 + $0x40] sm:$0xff] }
  0x1f   : > { %v3318_v9 = vld [vmem:[%s3283_s23 + $0x48] sm:$0xff]  ;;  %v3326_v11 = vld [vmem:[%s3283_s23 + $0x58] sm:$0xff]  ;;  %v3329_v12 = vld [vmem:[%s3283_s23 + $0x50] sm:$0xff] }
  0x20   : > { %v3334_v13 = vld [vmem:[%s3283_s23 + $0x68] sm:$0xff]  ;;  %v3337_v14 = vld [vmem:[%s3283_s23 + $0x60] sm:$0xff]  ;;  %v3342_v15 = vld [vmem:[%s3283_s23 + $0x78] sm:$0xff] }
  0x21   : > { %396 = vperm.xlu1 %3058, %v3294_v3   ;;  %386 = vperm.xlu0 %3057, %v3297_v4   ;;  %v3345_v16 = vld [vmem:[%s3283_s23 + $0x70] sm:$0xff]  ;;  %v3350_v17 = vld [vmem:[%s3283_s23 + $0x88] sm:$0xff]  ;;  %v3353_v18 = vld [vmem:[%s3283_s23 + $0x80] sm:$0xff] }
  0x22   : > { %v3358_v19 = vld [vmem:[%s3283_s23 + $0x98] sm:$0xff]  ;;  %v3361_v20 = vld [vmem:[%s3283_s23 + $0x90] sm:$0xff]  ;;  %v3366_v21 = vld [vmem:[%s3283_s23 + $0xa8] sm:$0xff] }
  0x23   : > { %v3369_v22 = vld [vmem:[%s3283_s23 + $0xa0] sm:$0xff]  ;;  %v3374_v23 = vld [vmem:[%s3283_s23 + $0xb8] sm:$0xff]  ;;  %v3377_v24 = vld [vmem:[%s3283_s23 + $0xb0] sm:$0xff] }
  0x24   : > { %v3382_v25 = vld [vmem:[%s3283_s23 + $0xc8] sm:$0xff]  ;;  %v3385_v26 = vld [vmem:[%s3283_s23 + $0xc0] sm:$0xff]  ;;  %v3390_v27 = vld [vmem:[%s3283_s23 + $0xd8] sm:$0xff] }
  0x25   : > { %406 = vperm.xlu1 %3058, %v3302_v5   ;;  %401 = vperm.xlu0 %3057, %v3305_v6   ;;  %v3393_v28 = vld [vmem:[%s3283_s23 + $0xd0] sm:$0xff]  ;;  %v3398_v29 = vld [vmem:[%s3283_s23 + $0xe8] sm:$0xff]  ;;  %v3401_v30 = vld [vmem:[%s3283_s23 + $0xe0] sm:$0xff] }
  0x26   : > { %v3406_v31 = vld [vmem:[%s3283_s23 + $0xf8] sm:$0xff]  ;;  %v3409_v32 = vld [vmem:[%s3283_s23 + $0xf0] sm:$0xff]  ;;  %s3171_s23 = smov 88  }
  0x29   : > { %416 = vperm.xlu1 %3058, %v3310_v7   ;;  %411 = vperm.xlu0 %3057, %v3313_v8  }
  0x2d   : > { %426 = vperm.xlu1 %3058, %v3318_v9   ;;  %421 = vperm.xlu0 %3057, %v3321_v10  }
  0x31   : > { %436 = vperm.xlu1 %3058, %v3326_v11   ;;  %431 = vperm.xlu0 %3057, %v3329_v12  }
  0x35   : > { %446 = vperm.xlu1 %3058, %v3334_v13   ;;  %441 = vperm.xlu0 %3057, %v3337_v14  }
  0x39   : > { %456 = vperm.xlu1 %3058, %v3342_v15   ;;  %451 = vperm.xlu0 %3057, %v3345_v16  }
  0x3d   : > { %466 = vperm.xlu1 %3058, %v3350_v17   ;;  %461 = vperm.xlu0 %3057, %v3353_v18  }
  0x41   : > { %476 = vperm.xlu1 %3058, %v3358_v19   ;;  %471 = vperm.xlu0 %3057, %v3361_v20  }
  0x45   : > { %486 = vperm.xlu1 %3058, %v3366_v21   ;;  %481 = vperm.xlu0 %3057, %v3369_v22  }
  0x49   : > { %496 = vperm.xlu1 %3058, %v3374_v23   ;;  %491 = vperm.xlu0 %3057, %v3377_v24  }
  0x4d   : > { %506 = vperm.xlu1 %3058, %v3382_v25   ;;  %501 = vperm.xlu0 %3057, %v3385_v26  }
  0x51   : > { %516 = vperm.xlu1 %3058, %v3390_v27   ;;  %511 = vperm.xlu0 %3057, %v3393_v28  }
  0x55   : > { %526 = vperm.xlu1 %3058, %v3398_v29   ;;  %521 = vperm.xlu0 %3057, %v3401_v30  }
  0x59   : > { %536 = vperm.xlu1 %3058, %v3406_v31   ;;  %531 = vperm.xlu0 %3057, %v3409_v32  }
  0x5d   : > { %3060 = vset.pattern.permute.xlu1 %v3156_v33  ;;  %3059 = vset.pattern.permute.xlu0 %v3156_v33 }
  0x5e   : > { %639 = vperm.xlu1 %3060, %v3297_v4   ;;  %635 = vperm.xlu0 %3059, %v3289_v2  }
  0x62   : > { %643 = vperm.xlu1 %3060, %v3286_v1   ;;  %647 = vperm.xlu0 %3059, %v3294_v3  }
  0x66   : > { %651 = vperm.xlu1 %3060, %v3305_v6   ;;  %655 = vperm.xlu0 %3059, %v3302_v5  }
  0x6a   : > { %659 = vperm.xlu1 %3060, %v3313_v8   ;;  %663 = vperm.xlu0 %3059, %v3310_v7  }
  0x6e   : > { %667 = vperm.xlu1 %3060, %v3321_v10   ;;  %671 = vperm.xlu0 %3059, %v3318_v9  }
  0x72   : > { %675 = vperm.xlu1 %3060, %v3329_v12   ;;  %679 = vperm.xlu0 %3059, %v3326_v11  }
  0x76   : > { %683 = vperm.xlu1 %3060, %v3337_v14   ;;  %687 = vperm.xlu0 %3059, %v3334_v13  }
  0x7a   : > { %691 = vperm.xlu1 %3060, %v3345_v16   ;;  %695 = vperm.xlu0 %3059, %v3342_v15  }
  0x7e   : > { %699 = vperm.xlu1 %3060, %v3353_v18   ;;  %703 = vperm.xlu0 %3059, %v3350_v17  }
  0x82   : > { %707 = vperm.xlu1 %3060, %v3361_v20   ;;  %711 = vperm.xlu0 %3059, %v3358_v19  }
  0x86   : > { %715 = vperm.xlu1 %3060, %v3369_v22   ;;  %719 = vperm.xlu0 %3059, %v3366_v21  }
  0x8a   : > { %723 = vperm.xlu1 %3060, %v3377_v24   ;;  %727 = vperm.xlu0 %3059, %v3374_v23  }
  0x8e   : > { %731 = vperm.xlu1 %3060, %v3385_v26   ;;  %735 = vperm.xlu0 %3059, %v3382_v25  }
  0x92   : > { %739 = vperm.xlu1 %3060, %v3393_v28   ;;  %743 = vperm.xlu0 %3059, %v3390_v27  }
  0x96   : > { %747 = vperm.xlu1 %3060, %v3401_v30   ;;  %751 = vperm.xlu0 %3059, %v3398_v29  }
  0x9a   : > { %755 = vperm.xlu1 %3060, %v3409_v32   ;;  %759 = vperm.xlu0 %3059, %v3406_v31  }
  0x9c   : > { %v3445_v34 = vpop.permute.xlu1 %391  ;;  %v3447_v35 = vpop.permute.xlu0 %381 }
  0x9e   : > { %3061 = vset.pattern.permute.xlu1 %v3157_v36  ;;  %3062 = vset.pattern.permute.xlu0 %v3157_v36 }
  0x9f   : > { %856 = vperm.xlu1 %3061, %v3289_v2   ;;  %860 = vperm.xlu0 %3062, %v3297_v4  }
  0xa0   : > { %v3451_v37 = vpop.permute.xlu1 %396  ;;  %v3453_v38 = vpop.permute.xlu0 %386 }
  0xa3   : > { %864 = vperm.xlu1 %3061, %v3286_v1   ;;  %872 = vperm.xlu0 %3062, %v3305_v6  }
  0xa4   : > { %v3457_v39 = vpop.permute.xlu1 %406  ;;  %v3459_v40 = vpop.permute.xlu0 %401 }
  0xa7   : > { %868 = vperm.xlu1 %3061, %v3294_v3   ;;  %880 = vperm.xlu0 %3062, %v3313_v8  }
  0xa8   : > { %v3463_v41 = vpop.permute.xlu1 %416  ;;  %v3465_v42 = vpop.permute.xlu0 %411 }
  0xa9   : > { %5489 = vst [vmem:[#allocation6_spill] sm:$0xff] %v3465_v42 }
  0xab   : > { %876 = vperm.xlu1 %3061, %v3302_v5   ;;  %888 = vperm.xlu0 %3062, %v3321_v10  }
  0xac   : > { %v3469_v43 = vpop.permute.xlu1 %426  ;;  %v3471_v44 = vpop.permute.xlu0 %421 }
  0xad   : > { %5490 = vst [vmem:[#allocation7_spill] sm:$0xff] %v3471_v44 }
  0xaf   : > { %884 = vperm.xlu1 %3061, %v3310_v7   ;;  %896 = vperm.xlu0 %3062, %v3329_v12  }
  0xb0   : > { %v3475_v45 = vpop.permute.xlu1 %436  ;;  %v3477_v46 = vpop.permute.xlu0 %431 }
  0xb1   : > { %5491 = vst [vmem:[#allocation8_spill] sm:$0xff] %v3477_v46 }
  0xb3   : > { %892 = vperm.xlu1 %3061, %v3318_v9   ;;  %904 = vperm.xlu0 %3062, %v3337_v14  }
  0xb4   : > { %v3481_v47 = vpop.permute.xlu1 %446  ;;  %v3483_v48 = vpop.permute.xlu0 %441 }
  0xb5   : > { %5492 = vst [vmem:[#allocation9_spill] sm:$0xff] %v3483_v48 }
  0xb7   : > { %900 = vperm.xlu1 %3061, %v3326_v11   ;;  %912 = vperm.xlu0 %3062, %v3345_v16  }
  0xb8   : > { %v3487_v49 = vpop.permute.xlu1 %456  ;;  %v3489_v50 = vpop.permute.xlu0 %451 }
  0xb9   : > { %5493 = vst [vmem:[#allocation10_spill] sm:$0xff] %v3489_v50 }
  0xbb   : > { %908 = vperm.xlu1 %3061, %v3334_v13   ;;  %920 = vperm.xlu0 %3062, %v3353_v18  }
  0xbc   : > { %v3493_v51 = vpop.permute.xlu1 %466  ;;  %v3495_v52 = vpop.permute.xlu0 %461 }
  0xbd   : > { %5494 = vst [vmem:[#allocation11_spill] sm:$0xff] %v3493_v51 }
  0xbf   : > { %916 = vperm.xlu1 %3061, %v3342_v15   ;;  %928 = vperm.xlu0 %3062, %v3361_v20  }
  0xc0   : > { %v3499_v53 = vpop.permute.xlu1 %476  ;;  %v3501_v54 = vpop.permute.xlu0 %471 }
  0xc1   : > { %5495 = vst [vmem:[#allocation12_spill] sm:$0xff] %v3501_v54 }
  0xc3   : > { %924 = vperm.xlu1 %3061, %v3350_v17   ;;  %936 = vperm.xlu0 %3062, %v3369_v22  }
  0xc4   : > { %v3505_v55 = vpop.permute.xlu1 %486  ;;  %v3507_v56 = vpop.permute.xlu0 %481 }
  0xc5   : > { %5496 = vst [vmem:[#allocation13_spill] sm:$0xff] %v3507_v56  ;;  %v3555_v56 = vld [vmem:[%s5444_s1 + $0x1] ss:$0 sm:$0xff] }
  0xc7   : > { %932 = vperm.xlu1 %3061, %v3358_v19   ;;  %944 = vperm.xlu0 %3062, %v3377_v24  }
  0xc8   : > { %v3511_v57 = vpop.permute.xlu1 %496  ;;  %v3513_v58 = vpop.permute.xlu0 %491 }
  0xc9   : > { %5497 = vst [vmem:[#allocation14_spill] sm:$0xff] %v3513_v58 }
  0xcb   : > { %940 = vperm.xlu1 %3061, %v3366_v21   ;;  %952 = vperm.xlu0 %3062, %v3385_v26  }
  0xcc   : > { %v3517_v59 = vpop.permute.xlu1 %506  ;;  %v3519_v60 = vpop.permute.xlu0 %501 }
  0xcd   : > { %5498 = vst [vmem:[#allocation15_spill] sm:$0xff] %v3519_v60  ;;  %v3158_v60 = vmov 3  }
  0xcf   : > { %948 = vperm.xlu1 %3061, %v3374_v23   ;;  %960 = vperm.xlu0 %3062, %v3393_v28  }
  0xd0   : > { %v3523_v61 = vpop.permute.xlu1 %516  ;;  %v3525_v62 = vpop.permute.xlu0 %511 }
  0xd1   : > { %5499 = vst [vmem:[#allocation16_spill] sm:$0xff] %v3525_v62 }
  0xd3   : > { %956 = vperm.xlu1 %3061, %v3382_v25   ;;  %968 = vperm.xlu0 %3062, %v3401_v30  }
  0xd4   : > { %v3529_v63 = vpop.permute.xlu1 %526  ;;  %v3531_v0 = vpop.permute.xlu0 %521 }
  0xd5   : > { %5500 = vst [vmem:[#allocation17_spill] sm:$0xff] %v3531_v0  ;;  %v3550_v0 = vld [vmem:[%s5444_s1] ss:$0 sm:$0xff] }
  0xd6   : > { %v560_v46 = vmul.f32 %v3550_v0, %v3457_v39 }
  0xd7   : > { %964 = vperm.xlu1 %3061, %v3390_v27   ;;  %976 = vperm.xlu0 %3062, %v3409_v32  }
  0xd8   : > { %v3535_v33 = vpop.permute.xlu1 %536  ;;  %v3537_v36 = vpop.permute.xlu0 %531 }
  0xdb   : > { %972 = vperm.xlu1 %3061, %v3398_v29   ;;  %3063 = vset.pattern.permute.xlu0 %v3158_v60 }
  0xdc   : > { %1077 = vperm.xlu0 %3063, %v3289_v2  }
  0xdd   : > { %v3541_v62 = vpop.permute.xlu1 %639  ;;  %v3543_v58 = vpop.permute.xlu0 %635 }
  0xde   : > { %5501 = vst [vmem:[#allocation18_spill] sm:$0xff] %v3541_v62  ;;  %v558_v62 = vmul.f32 %v3550_v0, %v3451_v37 }
  0xdf   : > { %980 = vperm.xlu1 %3061, %v3406_v31  }
  0xe0   : > { %1089 = vperm.xlu0 %3063, %v3294_v3  }
  0xe1   : > { %v3557_v54 = vpop.permute.xlu1 %643  ;;  %v648_v2 = vpop.permute.xlu0 %647 }
  0xe2   : > { %v779_v51 = vmul.f32 %v3555_v56, %v648_v2 }
  0xe3   : > { %3064 = vset.pattern.permute.xlu1 %v3158_v60 }
  0xe4   : > { %v3562_v3 = vadd.f32 %v779_v51, %v558_v62  ;;  %1081 = vperm.xlu1 %3064, %v3297_v4   ;;  %1097 = vperm.xlu0 %3063, %v3302_v5   ;;  %v562_v4 = vmul.f32 %v3550_v0, %v3463_v41 }
  0xe5   : > { %v3566_v50 = vpop.permute.xlu1 %651  ;;  %v656_v48 = vpop.permute.xlu0 %655 }
  0xe6   : > { %v781_v44 = vmul.f32 %v3555_v56, %v656_v48 }
  0xe8   : > { %v3571_v42 = vadd.f32 %v781_v44, %v560_v46  ;;  %1085 = vperm.xlu1 %3064, %v3286_v1   ;;  %1105 = vperm.xlu0 %3063, %v3310_v7   ;;  %v564_v1 = vmul.f32 %v3550_v0, %v3469_v43 }
  0xe9   : > { %v3575_v37 = vpop.permute.xlu1 %659  ;;  %v664_v51 = vpop.permute.xlu0 %663 }
  0xea   : > { %v783_v5 = vmul.f32 %v3555_v56, %v664_v51 }
  0xec   : > { %v3580_v60 = vadd.f32 %v783_v5, %v562_v4  ;;  %1093 = vperm.xlu1 %3064, %v3305_v6   ;;  %1113 = vperm.xlu0 %3063, %v3318_v9   ;;  %v566_v6 = vmul.f32 %v3550_v0, %v3475_v45 }
  0xed   : > { %v3584_v39 = vpop.permute.xlu1 %667  ;;  %v672_v44 = vpop.permute.xlu0 %671 }
  0xee   : > { %v785_v7 = vmul.f32 %v3555_v56, %v672_v44 }
  0xf0   : > { %v3589_v46 = vadd.f32 %v785_v7, %v564_v1  ;;  %1101 = vperm.xlu1 %3064, %v3313_v8   ;;  %1121 = vperm.xlu0 %3063, %v3326_v11   ;;  %v568_v8 = vmul.f32 %v3550_v0, %v3481_v47 }
  0xf1   : > { %v3593_v41 = vpop.permute.xlu1 %675  ;;  %v680_v48 = vpop.permute.xlu0 %679 }
  0xf2   : > { %v787_v9 = vmul.f32 %v3555_v56, %v680_v48 }
  0xf4   : > { %v3598_v62 = vadd.f32 %v787_v9, %v566_v6  ;;  %1109 = vperm.xlu1 %3064, %v3321_v10   ;;  %1141 = vperm.xlu0 %3063, %v3353_v18   ;;  %v570_v10 = vmul.f32 %v3550_v0, %v3487_v49  ;;  %v574_v49 = vmul.f32 %v3550_v0, %v3499_v53 }
  0xf5   : > { %v3602_v43 = vpop.permute.xlu1 %683  ;;  %v688_v2 = vpop.permute.xlu0 %687 }
  0xf6   : > { %v789_v11 = vmul.f32 %v3555_v56, %v688_v2 }
  0xf8   : > { %v3607_v51 = vadd.f32 %v789_v11, %v568_v8  ;;  %1117 = vperm.xlu1 %3064, %v3329_v12   ;;  %1149 = vperm.xlu0 %3063, %v3361_v20  }
  0xf9   : > { %v3611_v45 = vpop.permute.xlu1 %691  ;;  %v696_v4 = vpop.permute.xlu0 %695 }
  0xfa   : > { %v791_v18 = vmul.f32 %v3555_v56, %v696_v4 }
  0xfc   : > { %v3616_v5 = vadd.f32 %v791_v18, %v570_v10  ;;  %1125 = vperm.xlu1 %3064, %v3337_v14   ;;  %1165 = vperm.xlu0 %3063, %v3377_v24  }
  0xfd   : > { %v3620_v47 = vpop.permute.xlu1 %699  ;;  %v3622_v44 = vpop.permute.xlu0 %703 }
 0x100   : > { %1133 = vperm.xlu1 %3064, %v3345_v16   ;;  %1181 = vperm.xlu0 %3063, %v3393_v28   ;;  %v576_v16 = vmul.f32 %v3550_v0, %v3505_v55 }
 0x101   : > { %v3626_v12 = vpop.permute.xlu1 %707  ;;  %v712_v20 = vpop.permute.xlu0 %711 }
 0x102   : > { %v795_v1 = vmul.f32 %v3555_v56, %v712_v20 }
 0x104   : > { %v3631_v7 = vadd.f32 %v795_v1, %v574_v49  ;;  %1157 = vperm.xlu1 %3064, %v3369_v22   ;;  %1145 = vperm.xlu0 %3063, %v3350_v17   ;;  %v578_v17 = vmul.f32 %v3550_v0, %v3511_v57 }
 0x105   : > { %v3635_v14 = vpop.permute.xlu1 %715  ;;  %v720_v24 = vpop.permute.xlu0 %719 }
 0x106   : > { %v797_v28 = vmul.f32 %v3555_v56, %v720_v24 }
 0x108   : > { %v3640_v48 = vadd.f32 %v797_v28, %v576_v16  ;;  %1173 = vperm.xlu1 %3064, %v3385_v26   ;;  %1153 = vperm.xlu0 %3063, %v3358_v19   ;;  %v580_v19 = vmul.f32 %v3550_v0, %v3517_v59 }
 0x109   : > { %v3644_v53 = vpop.permute.xlu1 %723  ;;  %v728_v6 = vpop.permute.xlu0 %727 }
 0x10a   : > { %v799_v22 = vmul.f32 %v3555_v56, %v728_v6 }
 0x10c   : > { %v3649_v9 = vadd.f32 %v799_v22, %v578_v17  ;;  %1189 = vperm.xlu1 %3064, %v3401_v30   ;;  %1197 = vperm.xlu0 %3063, %v3409_v32   ;;  %v582_v30 = vmul.f32 %v3550_v0, %v3523_v61 }
 0x10d   : > { %v3653_v55 = vpop.permute.xlu1 %731  ;;  %v736_v2 = vpop.permute.xlu0 %735 }
 0x10e   : > { %v801_v26 = vmul.f32 %v3555_v56, %v736_v2 }
 0x110   : > { %v3658_v8 = vadd.f32 %v801_v26, %v580_v19  ;;  %1137 = vperm.xlu1 %3064, %v3342_v15   ;;  %1177 = vperm.xlu0 %3063, %v3382_v25   ;;  %v584_v15 = vmul.f32 %v3550_v0, %v3529_v63 }
 0x111   : > { %v3662_v57 = vpop.permute.xlu1 %739  ;;  %v744_v11 = vpop.permute.xlu0 %743 }
 0x112   : > { %v803_v32 = vmul.f32 %v3555_v56, %v744_v11 }
 0x114   : > { %v3667_v4 = vadd.f32 %v803_v32, %v582_v30  ;;  %1161 = vperm.xlu1 %3064, %v3366_v21   ;;  %1129 = vperm.xlu0 %3063, %v3334_v13   ;;  %v586_v21 = vmul.f32 %v3550_v0, %v3535_v33  ;;  %v585_v13 = vmul.f32 %v3550_v0, %v3537_v36  ;;  %v3701_v36 = vld [vmem:[%s5444_s1 + $0x2] ss:$0 sm:$0xff] }
 0x115   : > { %v3671_v59 = vpop.permute.xlu1 %747  ;;  %v752_v10 = vpop.permute.xlu0 %751 }
 0x116   : > { %v805_v25 = vmul.f32 %v3555_v56, %v752_v10 }
 0x118   : > { %v3676_v18 = vadd.f32 %v805_v25, %v584_v15  ;;  %1169 = vperm.xlu1 %3064, %v3374_v23   ;;  %1201 = vperm.xlu0 %3063, %v3406_v31  }
 0x119   : > { %v756_v61 = vpop.permute.xlu1 %755  ;;  %v760_v20 = vpop.permute.xlu0 %759 }
 0x11a   : > { %v806_v49 = vmul.f32 %v3555_v56, %v756_v61  ;;  %v807_v63 = vmul.f32 %v3555_v56, %v760_v20 }
 0x11c   : > { %v3686_v1 = vadd.f32 %v806_v49, %v585_v13  ;;  %v3688_v24 = vadd.f32 %v807_v63, %v586_v21  ;;  %1185 = vperm.xlu1 %3064, %v3390_v27  }
 0x11e   : > { %v857_v23 = vpop.permute.xlu1 %856  ;;  %v3691_v31 = vpop.permute.xlu0 %860 }
 0x120   : > { %1193 = vperm.xlu1 %3064, %v3398_v29  }
 0x122   : > { %v3694_v16 = vpop.permute.xlu1 %864  ;;  %v3696_v33 = vpop.permute.xlu0 %872 }
 0x126   : > { %v869_v28 = vpop.permute.xlu1 %868  ;;  %v3703_v6 = vpop.permute.xlu0 %880 }
 0x127   : > { %v1000_v17 = vmul.f32 %v3701_v36, %v869_v28 }
 0x129   : > { %v3707_v27 = vadd.f32 %v1000_v17, %v3562_v3 }
 0x12a   : > { %v877_v22 = vpop.permute.xlu1 %876  ;;  %v3709_v2 = vpop.permute.xlu0 %888 }
 0x12b   : > { %5502 = vst [vmem:[#allocation19_spill] sm:$0xff] %v3707_v27  ;;  %v1002_v29 = vmul.f32 %v3701_v36, %v877_v22 }
 0x12d   : > { %v3713_v19 = vadd.f32 %v1002_v29, %v3571_v42 }
 0x12e   : > { %v885_v26 = vpop.permute.xlu1 %884  ;;  %v3715_v11 = vpop.permute.xlu0 %896 }
 0x12f   : > { %5503 = vst [vmem:[#allocation20_spill] sm:$0xff] %v3713_v19  ;;  %v1004_v30 = vmul.f32 %v3701_v36, %v885_v26 }
 0x131   : > { %v3719_v32 = vadd.f32 %v1004_v30, %v3580_v60 }
 0x132   : > { %v893_v10 = vpop.permute.xlu1 %892  ;;  %v3721_v15 = vpop.permute.xlu0 %904 }
 0x133   : > { %5504 = vst [vmem:[#allocation21_spill] sm:$0xff] %v3719_v32  ;;  %v1006_v3 = vmul.f32 %v3701_v36, %v893_v10  ;;  %v5526_v32 = vld [vmem:[#allocation8_spill] sm:$0xff] }
 0x135   : > { %v3725_v25 = vadd.f32 %v1006_v3, %v3589_v46 }
 0x136   : > { %v901_v61 = vpop.permute.xlu1 %900  ;;  %v3727_v20 = vpop.permute.xlu0 %912 }
 0x137   : > { %5505 = vst [vmem:[#allocation22_spill] sm:$0xff] %v3725_v25  ;;  %v1008_v42 = vmul.f32 %v3701_v36, %v901_v61 }
 0x139   : > { %v3731_v21 = vadd.f32 %v1008_v42, %v3598_v62 }
 0x13a   : > { %v909_v13 = vpop.permute.xlu1 %908  ;;  %v3733_v49 = vpop.permute.xlu0 %920 }
 0x13b   : > { %5506 = vst [vmem:[#allocation23_spill] sm:$0xff] %v3731_v21  ;;  %v1010_v60 = vmul.f32 %v3701_v36, %v909_v13 }
 0x13d   : > { %v3737_v63 = vadd.f32 %v1010_v60, %v3607_v51 }
 0x13e   : > { %v917_v28 = vpop.permute.xlu1 %916  ;;  %v3739_v17 = vpop.permute.xlu0 %928 }
 0x13f   : > { %5507 = vst [vmem:[#allocation24_spill] sm:$0xff] %v3737_v63  ;;  %v1012_v46 = vmul.f32 %v3701_v36, %v917_v28 }
 0x141   : > { %v3743_v22 = vadd.f32 %v1012_v46, %v3616_v5 }
 0x142   : > { %v3745_v29 = vpop.permute.xlu1 %924  ;;  %v3747_v62 = vpop.permute.xlu0 %936 }
 0x143   : > { %5508 = vst [vmem:[#allocation25_spill] sm:$0xff] %v3743_v22  ;;  %v5533_v22 = vld [vmem:[#allocation15_spill] sm:$0xff] }
 0x144   : > { %v579_v27 = vmul.f32 %v3550_v0, %v5533_v22  ;;  %v788_v22 = vmul.f32 %v3555_v56, %v3602_v43 }
 0x146   : > { %v933_v26 = vpop.permute.xlu1 %932  ;;  %v3749_v30 = vpop.permute.xlu0 %944 }
 0x147   : > { %v1016_v10 = vmul.f32 %v3701_v36, %v933_v26 }
 0x149   : > { %v3753_v51 = vadd.f32 %v1016_v10, %v3631_v7 }
 0x14a   : > { %v941_v3 = vpop.permute.xlu1 %940  ;;  %v3755_v61 = vpop.permute.xlu0 %952 }
 0x14b   : > { %5509 = vst [vmem:[#allocation26_spill] sm:$0xff] %v3753_v51  ;;  %v1018_v42 = vmul.f32 %v3701_v36, %v941_v3 }
 0x14d   : > { %v3759_v5 = vadd.f32 %v1018_v42, %v3640_v48  ;;  %v776_v48 = vmul.f32 %v3555_v56, %v3543_v58  ;;  %v3789_v58 = vld [vmem:[%s5444_s1 + $0x3] ss:$0 sm:$0xff] }
 0x14e   : > { %v949_v13 = vpop.permute.xlu1 %948  ;;  %v3761_v60 = vpop.permute.xlu0 %960 }
 0x14f   : > { %5510 = vst [vmem:[#allocation27_spill] sm:$0xff] %v3759_v5  ;;  %v1020_v28 = vmul.f32 %v3701_v36, %v949_v13  ;;  %v5527_v5 = vld [vmem:[#allocation9_spill] sm:$0xff] }
 0x151   : > { %v3765_v46 = vadd.f32 %v1020_v28, %v3649_v9  ;;  %v555_v9 = vmul.f32 %v3550_v0, %v3447_v35  ;;  %v997_v28 = vmul.f32 %v3701_v36, %v857_v23 }
 0x152   : > { %v957_v26 = vpop.permute.xlu1 %956  ;;  %v3767_v63 = vpop.permute.xlu0 %968 }
 0x153   : > { %5511 = vst [vmem:[#allocation28_spill] sm:$0xff] %v3765_v46  ;;  %v1022_v7 = vmul.f32 %v3701_v36, %v957_v26  ;;  %v812_v26 = vadd.f32 %v776_v48, %v555_v9  ;;  %v3804_v48 = vld [vmem:[%s5446_s3] ss:$0 sm:$0xff] }
 0x155   : > { %v3771_v10 = vadd.f32 %v1022_v7, %v3658_v8 }
 0x156   : > { %v965_v3 = vpop.permute.xlu1 %964  ;;  %v977_v42 = vpop.permute.xlu0 %976 }
 0x157   : > { %5512 = vst [vmem:[#allocation29_spill] sm:$0xff] %v3771_v10  ;;  %v1024_v21 = vmul.f32 %v3701_v36, %v965_v3  ;;  %v1027_v13 = vmul.f32 %v3701_v36, %v977_v42  ;;  %v1033_v10 = vadd.f32 %v997_v28, %v812_v26 }
 0x159   : > { %v3781_v46 = vadd.f32 %v1024_v21, %v3667_v4  ;;  %v3784_v8 = vadd.f32 %v1027_v13, %v3686_v1  ;;  %v3799_v4 = vld [vmem:[%s5445_s2] ss:$0 sm:$0xff] }
 0x15a   : > { %v973_v7 = vpop.permute.xlu1 %972 }
 0x15b   : > { %5513 = vst [vmem:[#allocation30_spill] sm:$0xff] %v3781_v46  ;;  %5514 = vst [vmem:[#allocation31_spill] sm:$0xff] %v3784_v8  ;;  %v1026_v3 = vmul.f32 %v3701_v36, %v973_v7  ;;  %v1078_v42 = vpop.permute.xlu0 %1077  ;;  %v559_v46 = vmul.f32 %v3550_v0, %v3459_v40  ;;  %v567_v40 = vmul.f32 %v3550_v0, %v5527_v5 }
 0x15c   : > { %v1218_v35 = vmul.f32 %v3789_v58, %v1078_v42 }
 0x15d   : > { %v3794_v23 = vadd.f32 %v1026_v3, %v3676_v18 }
 0x15e   : > { %v1254_v1 = vadd.f32 %v1218_v35, %v1033_v10  ;;  %v981_v21 = vpop.permute.xlu1 %980 }
 0x15f   : > { %5515 = vst [vmem:[#allocation32_spill] sm:$0xff] %v3794_v23  ;;  %v1028_v13 = vmul.f32 %v3701_v36, %v981_v21  ;;  %v3807_v9 = vpop.permute.xlu0 %1089 }
 0x160   : > { %5516 = vst [vmem:[#allocation33_spill] sm:$0xff] %v3807_v9  ;;  %v1297_v28 = vmul.f32 %v3799_v4, %v1254_v1  ;;  %v5454_v1 = vmov 0.0   ;;  %v780_v9 = vmul.f32 %v3555_v56, %v3566_v50 }
 0x161   : > { %v3811_v18 = vadd.f32 %v1028_v13, %v3688_v24  ;;  %v778_v13 = vmul.f32 %v3555_v56, %v3557_v54  ;;  %v571_v54 = vmul.f32 %v3550_v0, %v3495_v52  ;;  %v794_v52 = vmul.f32 %v3555_v56, %v3626_v12 }
 0x162   : > { %v3814_v26 = vadd.f32 %v3804_v48, %v1297_v28  ;;  %v792_v28 = vmul.f32 %v3555_v56, %v3620_v47  ;;  %v1013_v47 = vmul.f32 %v3701_v36, %v3733_v49  ;;  %v5528_v49 = vld [vmem:[#allocation10_spill] sm:$0xff]  ;;  %v1015_v12 = vmul.f32 %v3701_v36, %v3739_v17 }
 0x163   : > { %5517 = vst [vmem:[#allocation34_spill] sm:$0xff] %v3811_v18  ;;  %v3816_v7 = vpop.permute.xlu1 %1081  ;;  %v3818_v10 = vpop.permute.xlu0 %1097 }
 0x164   : > { %5518 = vst [vmem:[#allocation35_spill] sm:$0xff] %v3814_v26  ;;  %5519 = vst [vmem:[#allocation36_spill] sm:$0xff] %v3816_v7  ;;  %v5453_v3 = vmax.f32 %v3814_v26, 0.0  ;;  %v557_v26 = vmul.f32 %v3550_v0, %v3445_v34  ;;  %v5524_v34 = vld [vmem:[#allocation6_spill] sm:$0xff]  ;;  %v828_v19 = vadd.f32 %v792_v28, %v571_v54 }
 0x165   : > { %5520 = vst [vmem:[#allocation37_spill] sm:$0xff] %v3818_v10  ;;  %v561_v25 = vmul.f32 %v3550_v0, %v5524_v34  ;;  %v5529_v34 = vld [vmem:[#allocation11_spill] sm:$0xff]  ;;  %v5531_v10 = vld [vmem:[#allocation13_spill] sm:$0xff] }
 0x166   : > { %1594 = vrot.lane.b32.xlu1 %v5453_v3, %s3159_s24  ;;  %v999_v3 = vmul.f32 %v3701_v36, %v3694_v16  ;;  %v5525_v16 = vld [vmem:[#allocation7_spill] sm:$0xff]  ;;  %v3865_v51 = vmul.f32 %v3550_v0, %v5529_v34  ;;  %v575_v5 = vmul.f32 %v3550_v0, %v5531_v10  ;;  %v1049_v28 = vadd.f32 %v1013_v47, %v828_v19 }
 0x167   : > { %v1086_v42 = vpop.permute.xlu1 %1085  ;;  %v3824_v35 = vpop.permute.xlu0 %1105  ;;  %v563_v8 = vmul.f32 %v3550_v0, %v5525_v16  ;;  %v782_v19 = vmul.f32 %v3555_v56, %v3575_v37  ;;  %v784_v47 = vmul.f32 %v3555_v56, %v3584_v39  ;;  %v1001_v37 = vmul.f32 %v3701_v36, %v3696_v33 }
 0x168   : > { %5521 = vst [vmem:[#allocation38_spill] sm:$0xff] %v3824_v35  ;;  %v569_v35 = vmul.f32 %v3550_v0, %v5528_v49  ;;  %v5532_v49 = vld [vmem:[#allocation14_spill] sm:$0xff]  ;;  %v798_v33 = vmul.f32 %v3555_v56, %v3644_v53  ;;  %v1003_v53 = vmul.f32 %v3701_v36, %v3703_v6  ;;  %v800_v6 = vmul.f32 %v3555_v56, %v3653_v55 }
 0x169   : > { %v577_v34 = vmul.f32 %v3550_v0, %v5532_v49 }
 0x16a   : > { %3066 = vrot.lane.b32.xlu1 %v5454_v1, %s3159_s24  ;;  %v556_v1 = vmul.f32 %v3550_v0, %v3453_v38  ;;  %v565_v38 = vmul.f32 %v3550_v0, %v5526_v32 }
 0x16b   : > { %v1094_v24 = vpop.permute.xlu1 %1093  ;;  %v3828_v21 = vpop.permute.xlu0 %1113 }
 0x16c   : > { %5522 = vst [vmem:[#allocation39_spill] sm:$0xff] %v3828_v21  ;;  %v814_v21 = vadd.f32 %v778_v13, %v557_v26  ;;  %v5530_v26 = vld [vmem:[#allocation12_spill] sm:$0xff] }
 0x16e   : > { %v1035_v13 = vadd.f32 %v999_v3, %v814_v21 }
 0x16f   : > { %v3838_v23 = vpop.permute.xlu1 %1101  ;;  %v3840_v18 = vpop.permute.xlu0 %1121 }
 0x170   : > { %5523 = vst [vmem:[#allocation40_spill] sm:$0xff] %v3840_v18  ;;  %v1220_v18 = vmul.f32 %v3789_v58, %v1086_v42  ;;  %v573_v42 = vmul.f32 %v3550_v0, %v5530_v26  ;;  %v5534_v26 = vld [vmem:[#allocation18_spill] sm:$0xff] }
 0x171   : > { %v777_v3 = vmul.f32 %v3555_v56, %v5534_v26  ;;  %v816_v26 = vadd.f32 %v780_v9, %v559_v46  ;;  %v1011_v46 = vmul.f32 %v3701_v36, %v3727_v20  ;;  %v1019_v20 = vmul.f32 %v3701_v36, %v3749_v30 }
 0x172   : > { %v1256_v21 = vadd.f32 %v1220_v18, %v1035_v13  ;;  %v830_v10 = vadd.f32 %v794_v52, %v573_v42  ;;  %v790_v18 = vmul.f32 %v3555_v56, %v3611_v45 }
 0x173   : > { %v3869_v16 = vpop.permute.xlu1 %1109  ;;  %v1142_v32 = vpop.permute.xlu0 %1141  ;;  %v3906_v49 = vadd.f32 %v777_v3, %v556_v1  ;;  %v3919_v1 = vadd.f32 %v788_v22, %v567_v40  ;;  %v834_v40 = vadd.f32 %v798_v33, %v577_v34  ;;  %v1017_v34 = vmul.f32 %v3701_v36, %v3747_v62 }
 0x174   : > { %v1234_v54 = vmul.f32 %v3789_v58, %v1142_v32  ;;  %v786_v32 = vmul.f32 %v3555_v56, %v3593_v41  ;;  %v1051_v52 = vadd.f32 %v1015_v12, %v830_v10  ;;  %v1299_v45 = vmul.f32 %v3799_v4, %v1256_v21 }
 0x175   : > { %v826_v3 = vadd.f32 %v790_v18, %v569_v35  ;;  %v1037_v21 = vadd.f32 %v1001_v37, %v816_v26  ;;  %v796_v35 = vmul.f32 %v3555_v56, %v3635_v14  ;;  %v836_v62 = vadd.f32 %v800_v6, %v579_v27 }
 0x176   : > { %v1270_v17 = vadd.f32 %v1234_v54, %v1049_v28  ;;  %v5535_v28 = vld [vmem:[#allocation16_spill] sm:$0xff]  ;;  %v5536_v54 = vld [vmem:[#allocation17_spill] sm:$0xff]  ;;  %v3914_v7 = vadd.f32 %v786_v32, %v565_v38  ;;  %v3926_v9 = vadd.f32 %v3804_v48, %v1299_v45  ;;  %v3932_v38 = vmul.f32 %v3555_v56, %v3622_v44 }
 0x177   : > { %v3894_v13 = vpop.permute.xlu1 %1117  ;;  %v1150_v50 = vpop.permute.xlu0 %1149  ;;  %v581_v41 = vmul.f32 %v3550_v0, %v5535_v28  ;;  %v3904_v43 = vmul.f32 %v3550_v0, %v5536_v54  ;;  %v1222_v28 = vmul.f32 %v3789_v58, %v1094_v24  ;;  %v1224_v32 = vmul.f32 %v3789_v58, %v3838_v23 }
 0x178   : > { %v1313_v42 = vmul.f32 %v3799_v4, %v1270_v17  ;;  %v1236_v39 = vmul.f32 %v3789_v58, %v1150_v50  ;;  %v818_v17 = vadd.f32 %v782_v19, %v561_v25  ;;  %v820_v50 = vadd.f32 %v784_v47, %v563_v8 }
 0x179   : > { %v802_v19 = vmul.f32 %v3555_v56, %v3662_v57  ;;  %v1258_v47 = vadd.f32 %v1222_v28, %v1037_v21  ;;  %v1047_v14 = vadd.f32 %v1011_v46, %v826_v3  ;;  %v1005_v57 = vmul.f32 %v3701_v36, %v3709_v2 }
 0x17a   : > { %v3912_v12 = vadd.f32 %v3804_v48, %v1313_v42  ;;  %v1272_v10 = vadd.f32 %v1236_v39, %v1051_v52  ;;  %v1039_v22 = vadd.f32 %v1003_v53, %v818_v17  ;;  %v1378_v23 = vmax.f32 %v3926_v9, 0.0 }
 0x17b   : > { %v3917_v0 = vpop.permute.xlu1 %1125  ;;  %v1166_v8 = vpop.permute.xlu0 %1165  ;;  %v832_v37 = vadd.f32 %v796_v35, %v575_v5  ;;  %v1055_v52 = vadd.f32 %v1019_v20, %v834_v40  ;;  %v1021_v42 = vmul.f32 %v3701_v36, %v3755_v61  ;;  %v1301_v54 = vmul.f32 %v3799_v4, %v1258_v47 }
 0x17c   : > { %v1315_v25 = vmul.f32 %v3799_v4, %v1272_v10  ;;  %v1392_v24 = vmax.f32 %v3912_v12, 0.0  ;;  %v1240_v30 = vmul.f32 %v3789_v58, %v1166_v8  ;;  %v1260_v45 = vadd.f32 %v1224_v32, %v1039_v22 }
 0x17d   : > { %v1226_v26 = vmul.f32 %v3789_v58, %v3869_v16  ;;  %v1053_v33 = vadd.f32 %v1017_v34, %v832_v37  ;;  %v838_v61 = vadd.f32 %v802_v19, %v581_v41  ;;  %v804_v27 = vmul.f32 %v3555_v56, %v3671_v59 }
 0x17e   : > { %1626 = vrot.lane.b32.xlu0 %v1392_v24, %s3159_s24  ;;  %v3954_v18 = vadd.f32 %v3804_v48, %v1315_v25  ;;  %v1276_v10 = vadd.f32 %v1240_v30, %v1055_v52  ;;  %v1041_v28 = vadd.f32 %v1005_v57, %v820_v50  ;;  %v1007_v16 = vmul.f32 %v3701_v36, %v3715_v11 }
 0x17f   : > { %v1134_v44 = vpop.permute.xlu1 %1133  ;;  %v1057_v21 = vadd.f32 %v1021_v42, %v836_v62  ;;  %v1182_v53 = vpop.permute.xlu0 %1181  ;;  %v1023_v8 = vmul.f32 %v3701_v36, %v3761_v60  ;;  %v3978_v41 = vadd.f32 %v3804_v48, %v1301_v54  ;;  %v1303_v56 = vmul.f32 %v3799_v4, %v1260_v45 }
 0x180   : > { %v1232_v55 = vmul.f32 %v3789_v58, %v1134_v44  ;;  %v1394_v3 = vmax.f32 %v3954_v18, 0.0  ;;  %v1262_v59 = vadd.f32 %v1226_v26, %v1041_v28  ;;  %v1228_v50 = vmul.f32 %v3789_v58, %v3894_v13  ;;  %v5538_v28 = vld [vmem:[#allocation33_spill] sm:$0xff] }
 0x181   : > { %v1319_v35 = vmul.f32 %v3799_v4, %v1276_v10  ;;  %v840_v20 = vadd.f32 %v804_v27, %v3904_v43  ;;  %v998_v6 = vmul.f32 %v3701_v36, %v3691_v31  ;;  %v1244_v19 = vmul.f32 %v3789_v58, %v1182_v53 }
 0x182   : > { %v1268_v39 = vadd.f32 %v1232_v55, %v1047_v14  ;;  %1598 = vrot.lane.b32.xlu0 %v1378_v23, %s3159_s24  ;;  %v1043_v32 = vadd.f32 %v1007_v16, %v3914_v7  ;;  %v1009_v13 = vmul.f32 %v3701_v36, %v3721_v15  ;;  %v1059_v34 = vadd.f32 %v1023_v8, %v838_v61 }
 0x183   : > { %v1158_v2 = vpop.permute.xlu1 %1157  ;;  %v1025_v43 = vmul.f32 %v3701_v36, %v3767_v63  ;;  %v4003_v30 = vadd.f32 %v3804_v48, %v1303_v56  ;;  %v1380_v7 = vmax.f32 %v3978_v41, 0.0  ;;  %v1305_v15 = vmul.f32 %v3799_v4, %v1262_v59  ;;  %v1146_v37 = vpop.permute.xlu0 %1145 }
 0x184   : > { %v1311_v5 = vmul.f32 %v3799_v4, %v1268_v39  ;;  %v1238_v17 = vmul.f32 %v3789_v58, %v1158_v2  ;;  %v1264_v55 = vadd.f32 %v1228_v50, %v1043_v32  ;;  %v1230_v22 = vmul.f32 %v3789_v58, %v3917_v0  ;;  %v5537_v2 = vld [vmem:[#allocation36_spill] sm:$0xff] }
 0x185   : > { %v4013_v57 = vadd.f32 %v3804_v48, %v1319_v35  ;;  %v1280_v63 = vadd.f32 %v1244_v19, %v1059_v34  ;;  %v829_v62 = vadd.f32 %v3932_v38, %v3865_v51  ;;  %v1045_v54 = vadd.f32 %v1009_v13, %v3919_v1 }
 0x186   : > { %v3973_v46 = vadd.f32 %v3804_v48, %v1311_v5  ;;  %v1274_v25 = vadd.f32 %v1238_v17, %v1053_v33  ;;  %1630 = vrot.lane.b32.xlu0 %v1394_v3, %s3159_s24  ;;  %v1014_v45 = vmul.f32 %v3701_v36, %v3745_v29  ;;  %v1034_v0 = vadd.f32 %v998_v6, %v3906_v49 }
 0x187   : > { %v1174_v11 = vpop.permute.xlu1 %1173  ;;  %v1061_v26 = vadd.f32 %v1025_v43, %v840_v20  ;;  %v1219_v33 = vmul.f32 %v3789_v58, %v5537_v2  ;;  %v5479_v51 = vmax.f32 %v4003_v30, 0.0  ;;  %v4034_v1 = vadd.f32 %v3804_v48, %v1305_v15  ;;  %v5540_v43 = vld [vmem:[#allocation25_spill] sm:$0xff] }
 0x188   : > { %v1317_v40 = vmul.f32 %v3799_v4, %v1274_v25  ;;  %v1242_v60 = vmul.f32 %v3789_v58, %v1174_v11  ;;  %v1390_v47 = vmax.f32 %v3973_v46, 0.0  ;;  %v1307_v36 = vmul.f32 %v3799_v4, %v1264_v55 }
 0x189   : > { %v1266_v29 = vadd.f32 %v1230_v22, %v1045_v54  ;;  %v1235_v49 = vmul.f32 %v3789_v58, %v1146_v37  ;;  %v1323_v38 = vmul.f32 %v3799_v4, %v1280_v63  ;;  %v5478_v17 = vmax.f32 %v4013_v57, 0.0  ;;  %v5541_v37 = vld [vmem:[#allocation37_spill] sm:$0xff] }
 0x18a   : > { %v3998_v44 = vadd.f32 %v3804_v48, %v1317_v40  ;;  %v1278_v14 = vadd.f32 %v1242_v60, %v1057_v21  ;;  %1622 = vrot.lane.b32.xlu1 %v1390_v47, %s3159_s24  ;;  %v1050_v61 = vadd.f32 %v1014_v45, %v829_v62  ;;  %v1221_v16 = vmul.f32 %v3789_v58, %v5538_v28  ;;  %v1154_v40 = vpop.permute.xlu0 %1153  ;;  %v5539_v60 = vld [vmem:[#allocation19_spill] sm:$0xff]  ;;  %v5542_v45 = vld [vmem:[#allocation26_spill] sm:$0xff] }
 0x18b   : > { %v1190_v31 = vpop.permute.xlu1 %1189  ;;  %v1255_v21 = vadd.f32 %v1219_v33, %v1034_v0  ;;  %v4052_v53 = vadd.f32 %v3804_v48, %v1307_v36  ;;  %v1309_v25 = vmul.f32 %v3799_v4, %v1266_v29  ;;  %v5477_v56 = vmax.f32 %v4034_v1, 0.0  ;;  %v5543_v36 = vld [vmem:[#allocation38_spill] sm:$0xff] }
 0x18c   : > { %v1321_v52 = vmul.f32 %v3799_v4, %v1278_v14  ;;  %v1246_v42 = vmul.f32 %v3789_v58, %v1190_v31  ;;  %v5480_v39 = vmax.f32 %v3998_v44, 0.0  ;;  %v1271_v8 = vadd.f32 %v1235_v49, %v1050_v61 }
 0x18d   : > { %v4057_v59 = vadd.f32 %v3804_v48, %v1323_v38  ;;  %v1257_v20 = vadd.f32 %v1221_v16, %v5539_v60  ;;  %v1298_v6 = vmul.f32 %v3799_v4, %v1255_v21  ;;  %v4071_v19 = vadd.f32 %v3804_v48, %v1309_v25  ;;  %v5544_v38 = vld [vmem:[#allocation20_spill] sm:$0xff]  ;;  %v5545_v21 = vld [vmem:[#allocation27_spill] sm:$0xff] }
 0x18e   : > { %1602 = vrot.lane.b32.xlu1 %v1380_v7, %s3159_s24  ;;  %1634 = vrot.lane.b32.xlu0 %v5480_v39, %s3159_s24  ;;  %v4040_v10 = vadd.f32 %v3804_v48, %v1321_v52  ;;  %v1282_v5 = vadd.f32 %v1246_v42, %v1061_v26  ;;  %v1314_v32 = vmul.f32 %v3799_v4, %v1271_v8  ;;  %v5475_v13 = vmax.f32 %v4052_v53, 0.0  ;;  %v1198_v62 = vpop.permute.xlu0 %1197 }
 0x18f   : > { %v1138_v27 = vpop.permute.xlu1 %1137  ;;  %v1237_v14 = vmul.f32 %v3789_v58, %v1154_v40  ;;  %v5474_v15 = vmax.f32 %v4057_v59, 0.0  ;;  %v1300_v22 = vmul.f32 %v3799_v4, %v1257_v20  ;;  %v4089_v63 = vadd.f32 %v3804_v48, %v1298_v6  ;;  %v5546_v40 = vld [vmem:[#allocation21_spill] sm:$0xff]  ;;  %v5547_v20 = vld [vmem:[#allocation39_spill] sm:$0xff] }
 0x190   : > { %v1325_v11 = vmul.f32 %v3799_v4, %v1282_v5  ;;  %v1233_v50 = vmul.f32 %v3789_v58, %v1138_v27  ;;  %v5476_v35 = vmax.f32 %v4040_v10, 0.0  ;;  %v1223_v52 = vmul.f32 %v3789_v58, %v5541_v37 }
 0x191   : > { %v4094_v42 = vadd.f32 %v3804_v48, %v1314_v32  ;;  %v5473_v54 = vmax.f32 %v4071_v19, 0.0  ;;  %v1273_v0 = vadd.f32 %v1237_v14, %v5542_v45  ;;  %v1225_v29 = vmul.f32 %v3789_v58, %v5543_v36  ;;  %v5548_v14 = vld [vmem:[#allocation31_spill] sm:$0xff]  ;;  %v5549_v45 = vld [vmem:[#allocation22_spill] sm:$0xff] }
 0x192   : > { %1606 = vrot.lane.b32.xlu1 %v5479_v51, %s3159_s24  ;;  %1638 = vrot.lane.b32.xlu0 %v5478_v17, %s3159_s24  ;;  %v4077_v34 = vadd.f32 %v3804_v48, %v1325_v11  ;;  %v1269_v31 = vadd.f32 %v1233_v50, %v5540_v43  ;;  %v4110_v49 = vadd.f32 %v3804_v48, %v1300_v22  ;;  %v5471_v27 = vmax.f32 %v4089_v63, 0.0  ;;  %v1178_v11 = vpop.permute.xlu0 %1177 }
 0x193   : > { %v1162_v55 = vpop.permute.xlu1 %1161  ;;  %v1259_v5 = vadd.f32 %v1223_v52, %v5544_v38  ;;  %v1248_v61 = vmul.f32 %v3789_v58, %v1198_v62  ;;  %v1316_v28 = vmul.f32 %v3799_v4, %v1273_v0  ;;  %v5470_v8 = vmax.f32 %v4094_v42, 0.0 }
 0x194   : > { %v1312_v26 = vmul.f32 %v3799_v4, %v1269_v31  ;;  %v1239_v2 = vmul.f32 %v3789_v58, %v1162_v55  ;;  %v5472_v33 = vmax.f32 %v4077_v34, 0.0  ;;  %v1261_v60 = vadd.f32 %v1225_v29, %v5546_v40 }
 0x195   : > { %v1227_v6 = vmul.f32 %v3789_v58, %v5547_v20  ;;  %v1302_v32 = vmul.f32 %v3799_v4, %v1259_v5  ;;  %v1284_v43 = vadd.f32 %v1248_v61, %v5548_v14  ;;  %v5469_v31 = vmax.f32 %v4110_v49, 0.0  ;;  %v5554_v14 = vld [vmem:[#allocation29_spill] sm:$0xff] }
 0x196   : > { %1610 = vrot.lane.b32.xlu1 %v5477_v56, %s3159_s24  ;;  %1642 = vrot.lane.b32.xlu0 %v5476_v35, %s3159_s24  ;;  %v4117_v16 = vadd.f32 %v3804_v48, %v1312_v26  ;;  %v1275_v25 = vadd.f32 %v1239_v2, %v5545_v21  ;;  %v4134_v55 = vadd.f32 %v3804_v48, %v1316_v28  ;;  %v5550_v26 = vld [vmem:[#allocation40_spill] sm:$0xff]  ;;  %v1130_v38 = vpop.permute.xlu0 %1129  ;;  %v5552_v20 = vmov 0.0  }
 0x197   : > { %v1170_v50 = vpop.permute.xlu1 %1169  ;;  %v1304_v62 = vmul.f32 %v3799_v4, %v1261_v60  ;;  %v1263_v0 = vadd.f32 %v1227_v6, %v5549_v45  ;;  %v1229_v2 = vmul.f32 %v3789_v58, %v5550_v26  ;;  %v1327_v36 = vmul.f32 %v3799_v4, %v1284_v43  ;;  %v5551_v21 = vld [vmem:[#allocation28_spill] sm:$0xff] }
 0x198   : > { %v1318_v22 = vmul.f32 %v3799_v4, %v1275_v25  ;;  %v1241_v37 = vmul.f32 %v3789_v58, %v1170_v50  ;;  %v5468_v52 = vmax.f32 %v4117_v16, 0.0  ;;  %v1243_v29 = vmul.f32 %v3789_v58, %v1178_v11  ;;  %v5553_v11 = vld [vmem:[#allocation23_spill] sm:$0xff] }
 0x199   : > { %v4152_v61 = vadd.f32 %v3804_v48, %v1302_v32  ;;  %v5456_v50 = vmax.f32 %v4134_v55, 0.0  ;;  %v4160_v40 = vadd.f32 %v3804_v48, %v1304_v62  ;;  %v1306_v60 = vmul.f32 %v3799_v4, %v1263_v0 }
 0x19a   : > { %1614 = vrot.lane.b32.xlu1 %v5475_v13, %s3159_s24  ;;  %1646 = vrot.lane.b32.xlu0 %v5474_v15, %s3159_s24  ;;  %v4155_v28 = vadd.f32 %v3804_v48, %v1318_v22  ;;  %v1277_v25 = vadd.f32 %v1241_v37, %v5551_v21  ;;  %v1265_v6 = vadd.f32 %v1229_v2, %v5553_v11  ;;  %v1202_v26 = vpop.permute.xlu0 %1201 }
 0x19b   : > { %v1186_v5 = vpop.permute.xlu1 %1185  ;;  %v4170_v32 = vadd.f32 %v3804_v48, %v1327_v36  ;;  %v1279_v43 = vadd.f32 %v1243_v29, %v5554_v14  ;;  %v1231_v22 = vmul.f32 %v3789_v58, %v1130_v38  ;;  %v5467_v0 = vmax.f32 %v4152_v61, 0.0  ;;  %v5555_v38 = vld [vmem:[#allocation24_spill] sm:$0xff]  ;;  %v5556_v14 = vld [vmem:[#allocation30_spill] sm:$0xff] }
 0x19c   : > { %v1320_v37 = vmul.f32 %v3799_v4, %v1277_v25  ;;  %v1245_v62 = vmul.f32 %v3789_v58, %v1186_v5  ;;  %v5455_v45 = vmax.f32 %v4155_v28, 0.0  ;;  %v5464_v2 = vmax.f32 %v4160_v40, 0.0 }
 0x19d   : > { %v1308_v36 = vmul.f32 %v3799_v4, %v1265_v6  ;;  %v1322_v29 = vmul.f32 %v3799_v4, %v1279_v43  ;;  %v1267_v5 = vadd.f32 %v1231_v22, %v5555_v38  ;;  %v5466_v25 = vmax.f32 %v4170_v32, 0.0 }
 0x19e   : > { %1618 = vrot.lane.b32.xlu1 %v5473_v54, %s3159_s24  ;;  %1650 = vrot.lane.b32.xlu0 %v5472_v33, %s3159_s24  ;;  %v1249_v11 = vmul.f32 %v3789_v58, %v1202_v26 }
 0x19f   : > { %v1194_v21 = vpop.permute.xlu1 %1193  ;;  %v4205_v6 = vadd.f32 %v3804_v48, %v1308_v36  ;;  %v4208_v43 = vadd.f32 %v3804_v48, %v1322_v29  ;;  %v1310_v22 = vmul.f32 %v3799_v4, %v1267_v5 }
 0x1a1   : > { %v5459_v36 = vmax.f32 %v4205_v6, 0.0  ;;  %v5460_v29 = vmax.f32 %v4208_v43, 0.0  ;;  %v4225_v5 = vadd.f32 %v3804_v48, %v1310_v22 }
 0x1a2   : > { %1596 = vrot.lane.b32.xlu1 %v5471_v27, %s3159_s24  ;;  %1628 = vrot.lane.b32.xlu0 %v5470_v8, %s3159_s24 }
 0x1a6   : > { %1600 = vrot.lane.b32.xlu1 %v5469_v31, %s3159_s24  ;;  %1624 = vrot.lane.b32.xlu0 %v5468_v52, %s3159_s24 }
 0x1aa   : > { %3071 = vrot.lane.b32.xlu0 %v5552_v20, %s3159_s24  ;;  %1632 = vrot.lane.b32.xlu1 %v5456_v50, %s3159_s24  ;;  %v4179_v20 = vadd.f32 %v3804_v48, %v1306_v60  ;;  %v4193_v60 = vadd.f32 %v3804_v48, %v1320_v37  ;;  %v1247_v50 = vmul.f32 %v3789_v58, %v1194_v21  ;;  %v5558_v21 = vld [vmem:[#allocation32_spill] sm:$0xff] }
 0x1ac   : > { %v5461_v37 = vmax.f32 %v4179_v20, 0.0  ;;  %v1283_v38 = vadd.f32 %v1247_v50, %v5558_v21 }
 0x1ae   : > { %1636 = vrot.lane.b32.xlu0 %v5455_v45, %s3159_s24  ;;  %1604 = vrot.lane.b32.xlu1 %v5467_v0, %s3159_s24  ;;  %v1281_v45 = vadd.f32 %v1245_v62, %v5556_v14  ;;  %v5557_v62 = vld [vmem:[#allocation34_spill] sm:$0xff]  ;;  %v5462_v14 = vmax.f32 %v4193_v60, 0.0 }
 0x1af   : > { %v1285_v58 = vadd.f32 %v1249_v11, %v5557_v62  ;;  %v1326_v11 = vmul.f32 %v3799_v4, %v1283_v38 }
 0x1b0   : > { %v1324_v26 = vmul.f32 %v3799_v4, %v1281_v45 }
 0x1b1   : > { %v1328_v45 = vmul.f32 %v3799_v4, %v1285_v58  ;;  %v4242_v22 = vadd.f32 %v3804_v48, %v1326_v11  ;;  %v5559_v11 = vld [vmem:[#allocation35_spill] sm:$0xff] }
 0x1b2   : > { %1608 = vrot.lane.b32.xlu0 %v5464_v2, %s3159_s24  ;;  %1654 = vrot.lane.b32.xlu1 %v5466_v25, %s3159_s24  ;;  %v4229_v50 = vadd.f32 %v3804_v48, %v1324_v26  ;;  %v5458_v26 = vmax.f32 %v4225_v5, 0.0 }
 0x1b3   : > { %v4239_v62 = vadd.f32 %v3804_v48, %v1328_v45  ;;  %v5463_v4 = vmax.f32 %v4242_v22, 0.0 }
 0x1b4   : > { %v5457_v58 = vmax.f32 %v4229_v50, 0.0 }
 0x1b5   : > { %v5465_v21 = vmax.f32 %v4239_v62, 0.0 }
 0x1b6   : > { %1612 = vrot.lane.b32.xlu0 %v5461_v37, %s3159_s24  ;;  %1640 = vrot.lane.b32.xlu1 %v5462_v14, %s3159_s24 }
 0x1ba   : > { %1616 = vrot.lane.b32.xlu0 %v5459_v36, %s3159_s24  ;;  %1644 = vrot.lane.b32.xlu1 %v5460_v29, %s3159_s24 }
 0x1be   : > { %1648 = vrot.lane.b32.xlu1 %v5457_v58, %s3159_s24  ;;  %1620 = vrot.lane.b32.xlu0 %v5458_v26, %s3159_s24  ;;  %v5560_v58 = vmax.f32 %v5559_v11, 0.0 }
 0x1c2   : > { %1652 = vrot.lane.b32.xlu1 %v5463_v4, %s3159_s24  ;;  %1656 = vrot.lane.b32.xlu0 %v5465_v21, %s3159_s24  ;;  %s3172_s24 = smov 96  }
 0x1d8   : > { %v1595_v48 = vpop.permute.xlu1 %1594 }
 0x1d9   : > { %v1701_v26 = vsel %vm1698_vm0, %v5560_v58, %v1595_v48 }
 0x1da   : > { %v1753_v37 = vrot.slane %v1701_v26, 7  ;;  %v1839_v14 = vrot.slane %v1701_v26, 1  ;;  %v1879_v4 = vrot.slane %v1701_v26, 2  ;;  %v1919_v58 = vrot.slane %v1701_v26, 3 }
 0x1db   : > { %v1959_v48 = vrot.slane %v1701_v26, 4  ;;  %v2039_v27 = vrot.slane %v1701_v26, 6 }
 0x1dc   : > { %v3067_v38 = vpop.permute.xlu1 %3066 }
 0x1dd   : > { %v3068_v45 = vunpack.i.l.bf16 %v3067_v38  ;;  %v3069_v36 = vunpack.i.h.bf16 %v3067_v38  ;;  %v1999_v38 = vrot.slane %v1701_v26, 5 }
 0x1df   : > { %v1699_v29 = vsel %vm1698_vm0, 0.0, %v3068_v45  ;;  %v4265_v2 = vsel %vm1698_vm0, 0.0, %v3069_v36 }
 0x1e0   : > { %v1799_v21 = vrot.slane %v1699_v29, 1  ;;  %v1838_v25 = vrot.slane %v1699_v29, 2  ;;  %v1878_v52 = vrot.slane %v1699_v29, 3  ;;  %v1918_v31 = vrot.slane %v1699_v29, 4 }
 0x1e1   : > { %v1958_v11 = vrot.slane %v1699_v29, 5  ;;  %v1998_v8 = vrot.slane %v1699_v29, 6  ;;  %v2038_v45 = vrot.slane %v1699_v29, 7  ;;  %v1755_v54 = vsel %vm1754_vm1, %v1753_v37, %v1699_v29 }
 0x1e2   : > { %v2174_v36 = vrot.slane %v4265_v2, 2  ;;  %v1800_v15 = vsel %vm1754_vm1, %v1701_v26, %v1799_v21  ;;  %v1840_v13 = vsel %vm1754_vm1, %v1839_v14, %v1838_v25  ;;  %v4275_v56 = vsel %vm2374_vm2, %v4265_v2, 0.0 }
 0x1e3   : > { %v1880_v51 = vsel %vm1754_vm1, %v1879_v4, %v1878_v52  ;;  %v1920_v39 = vsel %vm1754_vm1, %v1919_v58, %v1918_v31  ;;  %v1960_v33 = vsel %vm1754_vm1, %v1959_v48, %v1958_v11  ;;  %v2000_v37 = vsel %vm1754_vm1, %v1999_v38, %v1998_v8 }
 0x1e4   : > { %v2040_v14 = vsel %vm1754_vm1, %v2039_v27, %v2038_v45 }
 0x1f0   : > { %v1627_v0 = vpop.permute.xlu0 %1626 }
 0x1f1   : > { %v4284_v29 = vsel %vm1698_vm0, %v1392_v24, %v1627_v0 }
 0x1f2   : > { %v1774_v0 = vrot.slane %v4284_v29, 7  ;;  %v1853_v9 = vrot.slane %v4284_v29, 1  ;;  %v1893_v58 = vrot.slane %v4284_v29, 2 }
 0x1f4   : > { %v1599_v17 = vpop.permute.xlu0 %1598 }
 0x1f5   : > { %v1703_v25 = vsel %vm1698_vm0, %v1378_v23, %v1599_v17 }
 0x1f6   : > { %v1756_v52 = vrot.slane %v1703_v25, 6  ;;  %v1801_v21 = vrot.slane %v1703_v25, 7  ;;  %v1881_v12 = vrot.slane %v1703_v25, 1  ;;  %v1921_v11 = vrot.slane %v1703_v25, 2 }
 0x1f7   : > { %v1961_v24 = vrot.slane %v1703_v25, 3  ;;  %v2001_v23 = vrot.slane %v1703_v25, 4  ;;  %v2041_v17 = vrot.slane %v1703_v25, 5  ;;  %v1841_v31 = vsel %vm1757_vm3, %v1703_v25, %v1840_v13 }
 0x1f8   : > { %v1631_v27 = vpop.permute.xlu0 %1630  ;;  %v1758_v26 = vsel %vm1757_vm3, %v1756_v52, %v1755_v54  ;;  %v1802_v35 = vsel %vm1757_vm3, %v1801_v21, %v1800_v15  ;;  %v1882_v48 = vsel %vm1757_vm3, %v1881_v12, %v1880_v51  ;;  %v4311_v38 = vsel %vm1757_vm3, %v1921_v11, %v1920_v39 }
 0x1f9   : > { %v4302_v45 = vsel %vm1698_vm0, %v1394_v3, %v1631_v27  ;;  %v4314_v18 = vsel %vm1757_vm3, %v1961_v24, %v1960_v33  ;;  %v4319_v4 = vsel %vm1757_vm3, %v2001_v23, %v2000_v37  ;;  %v4322_v13 = vsel %vm1757_vm3, %v2041_v17, %v2040_v14 }
 0x1fa   : > { %v1776_v3 = vrot.slane %v4302_v45, 6  ;;  %v1815_v27 = vrot.slane %v4302_v45, 7  ;;  %v1895_v15 = vrot.slane %v4302_v45, 1  ;;  %v5561_v33 = vmax.f32 %v3998_v44, 0.0 }
 0x1fc   : > { %v1623_v8 = vpop.permute.xlu1 %1622 }
 0x1fd   : > { %v4330_v54 = vsel %vm1698_vm0, %v1390_v47, %v1623_v8 }
 0x1fe   : > { %v1813_v25 = vrot.slane %v4330_v54, 1  ;;  %v1852_v37 = vrot.slane %v4330_v54, 2  ;;  %v1892_v14 = vrot.slane %v4330_v54, 3  ;;  %v1932_v21 = vrot.slane %v4330_v54, 4 }
 0x1ff   : > { %v1775_v46 = vsel %vm1754_vm1, %v1774_v0, %v4330_v54 }
 0x200   : > { %v1603_v11 = vpop.permute.xlu1 %1602  ;;  %v1635_v24 = vpop.permute.xlu0 %1634  ;;  %v1814_v23 = vsel %vm1754_vm1, %v4284_v29, %v1813_v25  ;;  %v1854_v17 = vsel %vm1754_vm1, %v1853_v9, %v1852_v37  ;;  %v1777_v47 = vsel %vm1757_vm3, %v1776_v3, %v1775_v46  ;;  %v1894_v8 = vsel %vm1754_vm1, %v1893_v58, %v1892_v14 }
 0x201   : > { %v4349_v52 = vsel %vm1698_vm0, %v1380_v7, %v1603_v11  ;;  %v4354_v0 = vsel %vm1698_vm0, %v5561_v33, %v1635_v24  ;;  %v1816_v7 = vsel %vm1757_vm3, %v1815_v27, %v1814_v23  ;;  %v1855_v33 = vsel %vm1757_vm3, %v4302_v45, %v1854_v17 }
 0x202   : > { %v1759_v39 = vrot.slane %v4349_v52, 5  ;;  %v1778_v25 = vrot.slane %v4354_v0, 5  ;;  %v1803_v9 = vrot.slane %v4349_v52, 6  ;;  %v1817_v41 = vrot.slane %v4354_v0, 6 }
 0x203   : > { %v1842_v44 = vrot.slane %v4349_v52, 7  ;;  %v1856_v3 = vrot.slane %v4354_v0, 7  ;;  %v1883_v11 = vsel %vm1760_vm4, %v4349_v52, %v1882_v48  ;;  %v1896_v24 = vsel %vm1757_vm3, %v1895_v15, %v1894_v8 }
 0x204   : > { %v1607_v37 = vpop.permute.xlu1 %1606  ;;  %v1639_v58 = vpop.permute.xlu0 %1638  ;;  %v1761_v14 = vsel %vm1760_vm4, %v1759_v39, %v1758_v26  ;;  %v1779_v46 = vsel %vm1760_vm4, %v1778_v25, %v1777_v47  ;;  %v5562_v27 = vmax.f32 %v4003_v30, 0.0  ;;  %v5563_v17 = vmax.f32 %v4013_v57, 0.0 }
 0x205   : > { %v1804_v51 = vsel %vm1760_vm4, %v1803_v9, %v1802_v35  ;;  %v1818_v26 = vsel %vm1760_vm4, %v1817_v41, %v1816_v7  ;;  %v1843_v47 = vsel %vm1760_vm4, %v1842_v44, %v1841_v31  ;;  %v1857_v8 = vsel %vm1760_vm4, %v1856_v3, %v1855_v33 }
 0x206   : > { %v4375_v23 = vsel %vm1698_vm0, %v5562_v27, %v1607_v37  ;;  %v4380_v12 = vsel %vm1698_vm0, %v5563_v17, %v1639_v58  ;;  %v4397_v58 = vsel %vm1760_vm4, %v4354_v0, %v1896_v24  ;;  %v5564_v31 = vmax.f32 %v4034_v1, 0.0 }
 0x207   : > { %v1762_v39 = vrot.slane %v4375_v23, 4  ;;  %v1780_v48 = vrot.slane %v4380_v12, 4  ;;  %v1805_v15 = vrot.slane %v4375_v23, 5  ;;  %v1819_v30 = vrot.slane %v4380_v12, 5 }
 0x208   : > { %v1844_v57 = vrot.slane %v4375_v23, 6  ;;  %v1858_v25 = vrot.slane %v4380_v12, 6  ;;  %v1611_v35 = vpop.permute.xlu1 %1610  ;;  %v1643_v9 = vpop.permute.xlu0 %1642  ;;  %v1884_v37 = vrot.slane %v4375_v23, 7  ;;  %v5565_v33 = vmax.f32 %v4040_v10, 0.0 }
 0x209   : > { %v1764_v41 = vsel %vm1763_vm5, %v1762_v39, %v1761_v14  ;;  %v1781_v7 = vsel %vm1763_vm5, %v1780_v48, %v1779_v46  ;;  %v4402_v44 = vsel %vm1698_vm0, %v5564_v31, %v1611_v35  ;;  %v1806_v14 = vsel %vm1763_vm5, %v1805_v15, %v1804_v51 }
 0x20a   : > { %v4407_v3 = vsel %vm1698_vm0, %v5565_v33, %v1643_v9  ;;  %v1820_v46 = vsel %vm1763_vm5, %v1819_v30, %v1818_v26  ;;  %v1765_v27 = vrot.slane %v4402_v44, 3  ;;  %v1807_v24 = vrot.slane %v4402_v44, 4 }
 0x20b   : > { %v1782_v17 = vrot.slane %v4407_v3, 3  ;;  %v1821_v1 = vrot.slane %v4407_v3, 4  ;;  %v1845_v39 = vsel %vm1763_vm5, %v1844_v57, %v1843_v47  ;;  %v1846_v10 = vrot.slane %v4402_v44, 5 }
 0x20c   : > { %v1859_v48 = vsel %vm1763_vm5, %v1858_v25, %v1857_v8  ;;  %v1860_v35 = vrot.slane %v4407_v3, 5  ;;  %v1615_v51 = vpop.permute.xlu1 %1614  ;;  %v1647_v15 = vpop.permute.xlu0 %1646  ;;  %v1767_v26 = vsel %vm1766_vm6, %v1765_v27, %v1764_v41  ;;  %v1885_v9 = vsel %vm1763_vm5, %v1884_v37, %v1883_v11 }
 0x20d   : > { %v1783_v30 = vsel %vm1766_vm6, %v1782_v17, %v1781_v7  ;;  %v1886_v31 = vrot.slane %v4402_v44, 6  ;;  %v5566_v33 = vmax.f32 %v4052_v53, 0.0  ;;  %v5567_v57 = vmax.f32 %v4057_v59, 0.0 }
 0x20e   : > { %v1808_v25 = vsel %vm1766_vm6, %v1807_v24, %v1806_v14  ;;  %v1822_v41 = vsel %vm1766_vm6, %v1821_v1, %v1820_v46  ;;  %v1847_v27 = vsel %vm1766_vm6, %v1846_v10, %v1845_v39  ;;  %v1861_v59 = vsel %vm1766_vm6, %v1860_v35, %v1859_v48 }
 0x20f   : > { %v4426_v47 = vsel %vm1698_vm0, %v5566_v33, %v1615_v51  ;;  %v4431_v8 = vsel %vm1698_vm0, %v5567_v57, %v1647_v15  ;;  %v1887_v1 = vsel %vm1766_vm6, %v1886_v31, %v1885_v9  ;;  %v5568_v57 = vmax.f32 %v4071_v19, 0.0 }
 0x210   : > { %v1768_v7 = vrot.slane %v4426_v47, 2  ;;  %v1784_v11 = vrot.slane %v4431_v8, 2  ;;  %v1809_v37 = vrot.slane %v4426_v47, 3  ;;  %v1823_v53 = vrot.slane %v4431_v8, 3  ;;  %v1619_v15 = vpop.permute.xlu1 %1618  ;;  %v1651_v14 = vpop.permute.xlu0 %1650 }
 0x211   : > { %v1848_v17 = vrot.slane %v4426_v47, 4  ;;  %v1862_v51 = vrot.slane %v4431_v8, 4  ;;  %v1888_v33 = vrot.slane %v4426_v47, 5  ;;  %v4450_v39 = vsel %vm1698_vm0, %v5568_v57, %v1619_v15 }
 0x212   : > { %v1770_v46 = vsel %vm1769_vm7, %v1768_v7, %v1767_v26  ;;  %v1785_v24 = vsel %vm1769_vm7, %v1784_v11, %v1783_v30  ;;  %v5569_v10 = vmax.f32 %v4077_v34, 0.0  ;;  %v1810_v35 = vsel %vm1769_vm7, %v1809_v37, %v1808_v25 }
 0x213   : > { %v1824_v26 = vsel %vm1769_vm7, %v1823_v53, %v1822_v41  ;;  %v1771_v30 = vrot.slane %v4450_v39, 1  ;;  %v1811_v31 = vrot.slane %v4450_v39, 2  ;;  %v1849_v7 = vsel %vm1769_vm7, %v1848_v17, %v1847_v27 }
 0x214   : > { %v4455_v48 = vsel %vm1698_vm0, %v5569_v10, %v1651_v14  ;;  %v1850_v11 = vrot.slane %v4450_v39, 3  ;;  %v4466_v34 = vsel %vm1769_vm7, %v1862_v51, %v1861_v59  ;;  %v1597_v25 = vpop.permute.xlu1 %1596  ;;  %v1629_v37 = vpop.permute.xlu0 %1628  ;;  %v4473_v57 = vsel %vm1769_vm7, %v1888_v33, %v1887_v1 }
 0x215   : > { %v1786_v9 = vrot.slane %v4455_v48, 1  ;;  %v1825_v19 = vrot.slane %v4455_v48, 2  ;;  %v1864_v15 = vrot.slane %v4455_v48, 3  ;;  %v1773_v41 = vsel %vm1772_vm8, %v1771_v30, %v1770_v46 }
 0x216   : > { %v1812_v14 = vsel %vm1772_vm8, %v1811_v31, %v1810_v35  ;;  %v5570_v27 = vmax.f32 %v4089_v63, 0.0  ;;  %v5571_v59 = vmax.f32 %v4094_v42, 0.0  ;;  %1790 = vrot.lane.b32.xlu1 %v1773_v41, %s3161_s25  ;;  %v1851_v33 = vsel %vm1772_vm8, %v1850_v11, %v1849_v7 }
 0x217   : > { %v1787_v53 = vsel %vm1772_vm8, %v1786_v9, %v1785_v24  ;;  %v1826_v46 = vsel %vm1772_vm8, %v1825_v19, %v1824_v26  ;;  %v1890_v24 = vrot.slane %v4450_v39, 4  ;;  %v1898_v42 = vrot.slane %v4380_v12, 7 }
 0x218   : > { %v4478_v17 = vsel %vm1698_vm0, %v5570_v27, %v1597_v25  ;;  %v4483_v51 = vsel %vm1698_vm0, %v5571_v59, %v1629_v37  ;;  %1792 = vrot.lane.b32.xlu0 %v1787_v53, %s3161_s25  ;;  %v5572_v10 = vrot.slane %v4265_v2, 1  ;;  %v1601_v25 = vpop.permute.xlu1 %1600  ;;  %v1625_v37 = vpop.permute.xlu0 %1624  ;;  %v5573_v27 = vmax.f32 %v4110_v49, 0.0 }
 0x219   : > { %v5485_v1 = vrot.slane %v4478_v17, 7  ;;  %v2175_v63 = vrot.slane %v4478_v17, 1  ;;  %v2110_v19 = vrot.slane %v4483_v51, 7  ;;  %v2189_v7 = vrot.slane %v4483_v51, 1 }
 0x21a   : > { %v4497_v35 = vsel %vm1754_vm1, %v4478_v17, %v5572_v10  ;;  %v4513_v59 = vsel %vm1698_vm0, %v5573_v27, %v1601_v25  ;;  %v5574_v10 = vmax.f32 %v4117_v16, 0.0  ;;  %1829 = vrot.lane.b32.xlu1 %v1812_v14, %s3162_s26  ;;  %v5575_v14 = vmax.f32 %v4134_v55, 0.0 }
 0x21b   : > { %v2176_v53 = vsel %vm1754_vm1, %v2175_v63, %v2174_v36  ;;  %v5483_v36 = vrot.slane %v4513_v59, 6 }
 0x21c   : > { %v4518_v31 = vsel %vm1698_vm0, %v5574_v10, %v1625_v37  ;;  %1831 = vrot.lane.b32.xlu0 %v1826_v46, %s3162_s26  ;;  %v4528_v63 = vsel %vm1757_vm3, %v4513_v59, %v2176_v53  ;;  %v1633_v53 = vpop.permute.xlu1 %1632  ;;  %v3072_v26 = vpop.permute.xlu0 %3071 }
 0x21d   : > { %v2434_v37 = vsel %vm1754_vm1, %v5483_v36, %v5485_v1  ;;  %v2188_v10 = vrot.slane %v4518_v31, 2  ;;  %v4546_v46 = vsel %vm1698_vm0, %v5575_v14, %v1633_v53  ;;  %v3074_v41 = vunpack.i.h.bf16 %v3072_v26 }
 0x21e   : > { %1869 = vrot.lane.b32.xlu1 %v1851_v33, %s3163_s11  ;;  %v2112_v30 = vrot.slane %v4546_v46, 6  ;;  %v3073_v25 = vunpack.i.l.bf16 %v3072_v26  ;;  %v5576_v26 = vmax.f32 %v4152_v61, 0.0  ;;  %v1899_v61 = vsel %vm1763_vm5, %v1898_v42, %v4397_v58 }
 0x21f   : > { %v2190_v27 = vsel %vm1754_vm1, %v2189_v7, %v2188_v10  ;;  %v1865_v7 = vsel %vm1772_vm8, %v1864_v15, %v4466_v34  ;;  %v4572_v53 = vsel %vm1698_vm0, 0.0, %v3074_v41  ;;  %v5577_v34 = vmax.f32 %v4155_v28, 0.0 }
 0x220   : > { %v4556_v55 = vsel %vm1757_vm3, %v4546_v46, %v2190_v27  ;;  %v1605_v10 = vpop.permute.xlu1 %1604  ;;  %v1637_v16 = vpop.permute.xlu0 %1636  ;;  %v2441_v27 = vsel %vm1754_vm1, %v2112_v30, %v2110_v19  ;;  %1871 = vrot.lane.b32.xlu0 %v1865_v7, %s3163_s11  ;;  %v4586_v33 = vsel %vm1698_vm0, 0.0, %v3073_v25  ;;  %v1891_v41 = vsel %vm1772_vm8, %v1890_v24, %v4473_v57 }
 0x221   : > { %v4578_v11 = vsel %vm1698_vm0, %v5576_v26, %v1605_v10  ;;  %v4583_v15 = vsel %vm1698_vm0, %v5577_v34, %v1637_v16  ;;  %v5578_v25 = vmax.f32 %v4170_v32, 0.0  ;;  %v5579_v57 = vmax.f32 %v4160_v40, 0.0 }
 0x222   : > { %v5482_v14 = vrot.slane %v4578_v11, 5  ;;  %v5486_v10 = vrot.slane %v4583_v15, 5  ;;  %v1788_v42 = vrot.slane %v4586_v33, 7  ;;  %v5586_v36 = vmax.f32 %v4229_v50, 0.0 }
 0x224   : > { %v2435_v34 = vsel %vm1757_vm3, %v5482_v14, %v2434_v37  ;;  %v1655_v24 = vpop.permute.xlu1 %1654  ;;  %v1609_v58 = vpop.permute.xlu0 %1608  ;;  %1909 = vrot.lane.b32.xlu0 %v1891_v41, %s3164_s12  ;;  %v2442_v41 = vsel %vm1757_vm3, %v5486_v10, %v2441_v27  ;;  %v1904_v27 = vrot.slane %v4455_v48, 4 }
 0x225   : > { %v4612_v26 = vsel %vm1698_vm0, %v5578_v25, %v1655_v24  ;;  %v4618_v9 = vsel %vm1698_vm0, %v5579_v57, %v1609_v58  ;;  %v1900_v24 = vrot.slane %v4407_v3, 6  ;;  %v5580_v25 = vmax.f32 %v4193_v60, 0.0 }
 0x226   : > { %v1827_v28 = vrot.slane %v4612_v26, 1  ;;  %v5481_v32 = vrot.slane %v4618_v9, 4  ;;  %v1789_v57 = vsel %vm1754_vm1, %v1788_v42, %v4612_v26  ;;  %v1902_v42 = vrot.slane %v4431_v8, 5 }
 0x227   : > { %1794 = vrot.lane.b32.xlu1 %v1789_v57, %s3161_s25  ;;  %v5581_v57 = vmax.f32 %v4179_v20, 0.0 }
 0x228   : > { %v1641_v58 = vpop.permute.xlu1 %1640  ;;  %v1613_v16 = vpop.permute.xlu0 %1612  ;;  %v1828_v7 = vsel %vm1754_vm1, %v4586_v33, %v1827_v28  ;;  %v4647_v40 = vsel %vm1760_vm4, %v5481_v32, %v2435_v34 }
 0x229   : > { %v4640_v37 = vsel %vm1698_vm0, %v5580_v25, %v1641_v58  ;;  %1833 = vrot.lane.b32.xlu0 %v1828_v7, %s3162_s26  ;;  %v4654_v60 = vsel %vm1698_vm0, %v5581_v57, %v1613_v16  ;;  %v1901_v58 = vsel %vm1766_vm6, %v1900_v24, %v1899_v61  ;;  %v5582_v16 = vrot.slane %v4284_v29, 3 }
 0x22a   : > { %v5484_v28 = vrot.slane %v4640_v37, 4  ;;  %v1903_v49 = vsel %vm1769_vm7, %v1902_v42, %v1901_v58  ;;  %v1937_v7 = vrot.slane %v4354_v0, 1  ;;  %v5583_v24 = vmax.f32 %v4208_v43, 0.0 }
 0x22b   : > { %v1934_v57 = vsel %vm1754_vm1, %v5582_v16, %v1932_v21  ;;  %v1905_v61 = vsel %vm1772_vm8, %v1904_v27, %v1903_v49  ;;  %v5585_v58 = vrot.slane %v4302_v45, 2  ;;  %v1940_v49 = vrot.slane %v4407_v3, 7 }
 0x22c   : > { %v4663_v34 = vsel %vm1760_vm4, %v5484_v28, %v2442_v41  ;;  %v1645_v32 = vpop.permute.xlu1 %1644  ;;  %v1617_v20 = vpop.permute.xlu0 %1616  ;;  %v5584_v41 = vmax.f32 %v4205_v6, 0.0  ;;  %1911 = vrot.lane.b32.xlu1 %v1905_v61, %s3164_s12  ;;  %v1942_v43 = vrot.slane %v4431_v8, 6  ;;  %v1923_v27 = vrot.slane %v4349_v52, 1 }
 0x22d   : > { %v4676_v25 = vsel %vm1698_vm0, %v5583_v24, %v1645_v32  ;;  %v1936_v14 = vsel %vm1757_vm3, %v5585_v58, %v1934_v57  ;;  %v1944_v32 = vrot.slane %v4455_v48, 5  ;;  %v1928_v16 = vrot.slane %v4426_v47, 6 }
 0x22e   : > { %v4681_v42 = vsel %vm1698_vm0, %v5584_v41, %v1617_v20  ;;  %v1938_v21 = vsel %vm1760_vm4, %v1937_v7, %v1936_v14  ;;  %v1926_v20 = vrot.slane %v4402_v44, 7  ;;  %v1930_v61 = vrot.slane %v4450_v39, 5 }
 0x22f   : > { %v1939_v6 = vsel %vm1763_vm5, %v4380_v12, %v1938_v21  ;;  %v1963_v24 = vrot.slane %v4349_v52, 2  ;;  %v1965_v41 = vrot.slane %v4375_v23, 1  ;;  %v1924_v21 = vsel %vm1760_vm4, %v1923_v27, %v4311_v38 }
 0x230   : > { %v1941_v57 = vsel %vm1766_vm6, %v1940_v49, %v1939_v6  ;;  %v1649_v14 = vpop.permute.xlu1 %1648  ;;  %v1621_v7 = vpop.permute.xlu0 %1620  ;;  %v5587_v49 = vmax.f32 %v4225_v5, 0.0  ;;  %v1925_v10 = vsel %vm1763_vm5, %v4375_v23, %v1924_v21  ;;  %v1968_v38 = vrot.slane %v4426_v47, 7 }
 0x231   : > { %v1943_v58 = vsel %vm1769_vm7, %v1942_v43, %v1941_v57  ;;  %v4706_v28 = vsel %vm1698_vm0, %v5586_v36, %v1649_v14  ;;  %v1964_v43 = vsel %vm1760_vm4, %v1963_v24, %v4314_v18  ;;  %v1927_v50 = vsel %vm1766_vm6, %v1926_v20, %v1925_v10 }
 0x232   : > { %v4711_v6 = vsel %vm1698_vm0, %v5587_v49, %v1621_v7  ;;  %v1945_v1 = vsel %vm1772_vm8, %v1944_v32, %v1943_v58  ;;  %v1966_v5 = vsel %vm1763_vm5, %v1965_v41, %v1964_v43  ;;  %v1970_v36 = vrot.slane %v4450_v39, 6 }
 0x233   : > { %1951 = vrot.lane.b32.xlu0 %v1945_v1, %s3165_s14  ;;  %v1866_v27 = vrot.slane %v4612_v26, 2  ;;  %v1929_v32 = vsel %vm1769_vm7, %v1928_v16, %v1927_v50  ;;  %v1967_v57 = vsel %vm1766_vm6, %v4402_v44, %v1966_v5  ;;  %v1867_v18 = vrot.slane %v4586_v33, 1 }
 0x234   : > { %v1653_v14 = vpop.permute.xlu1 %1652  ;;  %v1657_v7 = vpop.permute.xlu0 %1656  ;;  %v1906_v24 = vrot.slane %v4612_v26, 3  ;;  %v1931_v1 = vsel %vm1772_vm8, %v1930_v61, %v1929_v32  ;;  %v1969_v10 = vsel %vm1769_vm7, %v1968_v38, %v1967_v57  ;;  %v5588_v20 = vmax.f32 %v4242_v22, 0.0 }
 0x235   : > { %v5589_v16 = vmax.f32 %v4239_v62, 0.0  ;;  %1949 = vrot.lane.b32.xlu1 %v1931_v1, %s3165_s14  ;;  %v1971_v21 = vsel %vm1772_vm8, %v1970_v36, %v1969_v10  ;;  %v1868_v49 = vsel %vm1754_vm1, %v1867_v18, %v1866_v27  ;;  %v1907_v61 = vrot.slane %v4586_v33, 2 }
 0x236   : > { %v4734_v41 = vsel %vm1698_vm0, %v5588_v20, %v1653_v14  ;;  %v5590_v43 = vrot.slane %v4330_v54, 5  ;;  %v5591_v22 = vrot.slane %v4284_v29, 4  ;;  %v5592_v62 = vrot.slane %v4302_v45, 3 }
 0x237   : > { %v4739_v58 = vsel %vm1698_vm0, %v5589_v16, %v1657_v7  ;;  %1989 = vrot.lane.b32.xlu0 %v1971_v21, %s3166_s16  ;;  %v1977_v5 = vrot.slane %v4354_v0, 2  ;;  %v1979_v36 = vrot.slane %v4380_v12, 1  ;;  %v1982_v27 = vrot.slane %v4431_v8, 7 }
 0x238   : > { %v1974_v38 = vsel %vm1754_vm1, %v5591_v22, %v5590_v43  ;;  %v1908_v32 = vsel %vm1754_vm1, %v1907_v61, %v1906_v24  ;;  %v1984_v57 = vrot.slane %v4455_v48, 6  ;;  %v5593_v18 = vrot.slane %v4330_v54, 6 }
 0x239   : > { %v1976_v50 = vsel %vm1757_vm3, %v5592_v62, %v1974_v38  ;;  %v5594_v14 = vrot.slane %v4284_v29, 5  ;;  %v2017_v1 = vrot.slane %v4354_v0, 3  ;;  %v5595_v20 = vrot.slane %v4302_v45, 4  ;;  %1873 = vrot.lane.b32.xlu1 %v1868_v49, %s3163_s11  ;;  %s3173_s11 = smov 104  }
 0x23a   : > { %v1978_v10 = vsel %vm1760_vm4, %v1977_v5, %v1976_v50  ;;  %v2019_v21 = vrot.slane %v4380_v12, 2  ;;  %v2021_v24 = vrot.slane %v4407_v3, 1  ;;  %v2024_v22 = vrot.slane %v4455_v48, 7 }
 0x23b   : > { %v2014_v7 = vsel %vm1754_vm1, %v5594_v14, %v5593_v18  ;;  %v1980_v61 = vsel %vm1763_vm5, %v1979_v36, %v1978_v10  ;;  %v2003_v38 = vrot.slane %v4349_v52, 3  ;;  %1913 = vrot.lane.b32.xlu0 %v1908_v32, %s3164_s12  ;;  %v2005_v5 = vrot.slane %v4375_v23, 2  ;;  %s3174_s12 = smov 112  }
 0x23c   : > { %v2016_v16 = vsel %vm1757_vm3, %v5595_v20, %v2014_v7  ;;  %v1981_v62 = vsel %vm1766_vm6, %v4407_v3, %v1980_v61  ;;  %v2007_v18 = vrot.slane %v4402_v44, 1  ;;  %v2010_v7 = vrot.slane %v4450_v39, 7 }
 0x23d   : > { %v2018_v43 = vsel %vm1760_vm4, %v2017_v1, %v2016_v16  ;;  %v1983_v49 = vsel %vm1769_vm7, %v1982_v27, %v1981_v62  ;;  %v2004_v14 = vsel %vm1760_vm4, %v2003_v38, %v4319_v4  ;;  %v2043_v20 = vrot.slane %v4349_v52, 4 }
 0x23e   : > { %v2020_v50 = vsel %vm1763_vm5, %v2019_v21, %v2018_v43  ;;  %v1985_v32 = vsel %vm1772_vm8, %v1984_v57, %v1983_v49  ;;  %v2006_v10 = vsel %vm1763_vm5, %v2005_v5, %v2004_v14  ;;  %v2045_v21 = vrot.slane %v4375_v23, 3 }
 0x23f   : > { %v2022_v36 = vsel %vm1766_vm6, %v2021_v24, %v2020_v50  ;;  %1991 = vrot.lane.b32.xlu1 %v1985_v32, %s3166_s16  ;;  %v2008_v16 = vsel %vm1766_vm6, %v2007_v18, %v2006_v10  ;;  %v2047_v4 = vrot.slane %v4402_v44, 2  ;;  %v2044_v24 = vsel %vm1760_vm4, %v2043_v20, %v4322_v13 }
 0x240   : > { %v2023_v1 = vsel %vm1769_vm7, %v4431_v8, %v2022_v36  ;;  %v2009_v57 = vsel %vm1769_vm7, %v4426_v47, %v2008_v16  ;;  %v2049_v52 = vrot.slane %v4426_v47, 1  ;;  %v1946_v61 = vrot.slane %v4612_v26, 4 }
 0x241   : > { %v2025_v27 = vsel %vm1772_vm8, %v2024_v22, %v2023_v1  ;;  %v2011_v43 = vsel %vm1772_vm8, %v2010_v7, %v2009_v57  ;;  %v2046_v22 = vsel %vm1763_vm5, %v2045_v21, %v2044_v24  ;;  %v1947_v23 = vrot.slane %v4586_v33, 3 }
 0x242   : > { %2031 = vrot.lane.b32.xlu0 %v2025_v27, %s3167_s19  ;;  %v1986_v44 = vrot.slane %v4612_v26, 5  ;;  %v2048_v38 = vsel %vm1766_vm6, %v2047_v4, %v2046_v22  ;;  %v1987_v62 = vrot.slane %v4586_v33, 4  ;;  %v5596_v50 = vrot.slane %v4330_v54, 7 }
 0x243   : > { %v5597_v13 = vrot.slane %v4284_v29, 6  ;;  %v2057_v5 = vrot.slane %v4354_v0, 4  ;;  %2029 = vrot.lane.b32.xlu1 %v2011_v43, %s3167_s19  ;;  %v2050_v18 = vsel %vm1769_vm7, %v2049_v52, %v2048_v38  ;;  %v1948_v49 = vsel %vm1754_vm1, %v1947_v23, %v1946_v61 }
 0x244   : > { %v5598_v36 = vrot.slane %v4302_v45, 5  ;;  %v2059_v7 = vrot.slane %v4380_v12, 3  ;;  %v2051_v54 = vsel %vm1772_vm8, %v4450_v39, %v2050_v18  ;;  %v1988_v29 = vsel %vm1754_vm1, %v1987_v62, %v1986_v44 }
 0x245   : > { %v2054_v47 = vsel %vm1754_vm1, %v5597_v13, %v5596_v50  ;;  %v2061_v0 = vrot.slane %v4407_v3, 2  ;;  %v2063_v45 = vrot.slane %v4431_v8, 1  ;;  %v2111_v12 = vsel %vm1754_vm1, %v2110_v19, %v4518_v31 }
 0x246   : > { %v2056_v14 = vsel %vm1757_vm3, %v5598_v36, %v2054_v47  ;;  %2069 = vrot.lane.b32.xlu0 %v2051_v54, %s3168_s20  ;;  %v2118_v39 = vrot.slane %v4676_v25, 3  ;;  %v2113_v3 = vsel %vm1757_vm3, %v2112_v30, %v2111_v12  ;;  %v2120_v20 = vrot.slane %v4706_v28, 2 }
 0x247   : > { %v2058_v32 = vsel %vm1760_vm4, %v2057_v5, %v2056_v14  ;;  %v2122_v27 = vrot.slane %v4734_v41, 1  ;;  %1953 = vrot.lane.b32.xlu1 %v1948_v49, %s3165_s14  ;;  %v5599_v16 = vrot.slane %v4583_v15, 5  ;;  %v5600_v4 = vrot.slane %v4478_v17, 7  ;;  %s3175_s14 = smov 120  }
 0x248   : > { %v2060_v1 = vsel %vm1763_vm5, %v2059_v7, %v2058_v32  ;;  %v2444_v21 = vsel %vm1763_vm5, %v2118_v39, %v4663_v34  ;;  %v5601_v24 = vrot.slane %v4640_v37, 4  ;;  %v5602_v43 = vrot.slane %v4513_v59, 6 }
 0x249   : > { %v2062_v10 = vsel %vm1766_vm6, %v2061_v0, %v2060_v1  ;;  %v2115_v19 = vsel %vm1760_vm4, %v5599_v16, %v2113_v3  ;;  %v2097_v30 = vsel %vm1754_vm1, %v5600_v4, %v4265_v2  ;;  %v2445_v61 = vsel %vm1766_vm6, %v2120_v20, %v2444_v21 }
 0x24a   : > { %v2064_v8 = vsel %vm1769_vm7, %v2063_v45, %v2062_v10  ;;  %v2117_v52 = vsel %vm1763_vm5, %v5601_v24, %v2115_v19  ;;  %v2099_v22 = vsel %vm1757_vm3, %v5602_v43, %v2097_v30  ;;  %1993 = vrot.lane.b32.xlu0 %v1988_v29, %s3166_s16  ;;  %v2446_v23 = vsel %vm1769_vm7, %v2122_v27, %v2445_v61  ;;  %s2979_s16 = sshll.u32 %s3145_s30, 8 }
 0x24b   : > { %v2065_v57 = vsel %vm1772_vm8, %v4455_v48, %v2064_v8  ;;  %v2119_v34 = vsel %vm1766_vm6, %v2118_v39, %v2117_v52  ;;  %v5603_v44 = vrot.slane %v4578_v11, 5  ;;  %v2104_v38 = vrot.slane %v4654_v60, 3 }
 0x24c   : > { %v2121_v62 = vsel %vm1769_vm7, %v2120_v20, %v2119_v34  ;;  %v4872_v50 = vsel %vm1772_vm8, %v4739_v58, %v2446_v23  ;;  %v5604_v13 = vrot.slane %v4618_v9, 4  ;;  %v2106_v5 = vrot.slane %v4681_v42, 2  ;;  %2071 = vrot.lane.b32.xlu1 %v2065_v57, %s3168_s20 }
 0x24d   : > { %v2101_v48 = vsel %vm1760_vm4, %v5603_v44, %v2099_v22  ;;  %v2123_v18 = vsel %vm1772_vm8, %v2122_v27, %v2121_v62  ;;  %v2108_v36 = vrot.slane %v4711_v6, 1  ;;  %v2437_v14 = vsel %vm1763_vm5, %v2104_v38, %v4647_v40 }
 0x24e   : > { %v2103_v47 = vsel %vm1763_vm5, %v5604_v13, %v2101_v48  ;;  %v2438_v54 = vsel %vm1766_vm6, %v2106_v5, %v2437_v14  ;;  %v5605_v29 = vrot.slane %v4513_v59, 7  ;;  %v2143_v0 = vrot.slane %v4654_v60, 4  ;;  %2128 = vrot.lane.b32.xlu0 %v2123_v18, %s3169_s21 }
 0x24f   : > { %v2105_v49 = vsel %vm1766_vm6, %v2104_v38, %v2103_v47  ;;  %v2439_v45 = vsel %vm1769_vm7, %v2108_v36, %v2438_v54  ;;  %v5606_v40 = vrot.slane %v4578_v11, 6  ;;  %v2145_v39 = vrot.slane %v4681_v42, 3 }
 0x250   : > { %v2107_v7 = vsel %vm1769_vm7, %v2106_v5, %v2105_v49  ;;  %v2138_v32 = vsel %vm1757_vm3, %v5605_v29, %v4497_v35  ;;  %v2440_v10 = vsel %vm1772_vm8, %v4518_v31, %v2439_v45  ;;  %v5607_v35 = vrot.slane %v4618_v9, 5 }
 0x251   : > { %v2109_v1 = vsel %vm1772_vm8, %v2108_v36, %v2107_v7  ;;  %v2140_v12 = vsel %vm1760_vm4, %v5606_v40, %v2138_v32  ;;  %v2147_v20 = vrot.slane %v4711_v6, 2  ;;  %v2026_v27 = vrot.slane %v4612_v26, 6 }
 0x252   : > { %v2142_v3 = vsel %vm1763_vm5, %v5607_v35, %v2140_v12  ;;  %2126 = vrot.lane.b32.xlu1 %v2109_v1, %s3169_s21  ;;  %v2027_v16 = vrot.slane %v4586_v33, 5  ;;  %v2066_v19 = vrot.slane %v4612_v26, 7  ;;  %v2067_v21 = vrot.slane %v4586_v33, 6 }
 0x253   : > { %v2144_v8 = vsel %vm1766_vm6, %v2143_v0, %v2142_v3  ;;  %v5608_v30 = vrot.slane %v4518_v31, 1  ;;  %v2157_v24 = vrot.slane %v4676_v25, 4  ;;  %v2159_v52 = vrot.slane %v4706_v28, 3 }
 0x254   : > { %v2146_v4 = vsel %vm1769_vm7, %v2145_v39, %v2144_v8  ;;  %v2028_v43 = vsel %vm1754_vm1, %v2027_v16, %v2026_v27  ;;  %v2068_v22 = vsel %vm1754_vm1, %v2067_v21, %v2066_v19  ;;  %v5609_v26 = vrot.slane %v4546_v46, 7 }
 0x255   : > { %v2150_v57 = vsel %vm1754_vm1, %v4483_v51, %v5608_v30  ;;  %v2148_v61 = vsel %vm1772_vm8, %v2147_v20, %v2146_v4  ;;  %v5610_v34 = vrot.slane %v4583_v15, 6  ;;  %v2161_v44 = vrot.slane %v4734_v41, 2 }
 0x256   : > { %v2152_v33 = vsel %vm1757_vm3, %v5609_v26, %v2150_v57  ;;  %2165 = vrot.lane.b32.xlu0 %v2148_v61, %s3170_s22  ;;  %v5611_v48 = vrot.slane %v4583_v15, 7  ;;  %v2196_v62 = vrot.slane %v4676_v25, 5  ;;  %2033 = vrot.lane.b32.xlu1 %v2028_v43, %s3167_s19  ;;  %v5612_v13 = vrot.slane %v4640_v37, 5 }
 0x257   : > { %v2154_v23 = vsel %vm1760_vm4, %v5610_v34, %v2152_v33  ;;  %v5613_v5 = vrot.slane %v4640_v37, 6  ;;  %v2198_v49 = vrot.slane %v4706_v28, 4  ;;  %v2200_v36 = vrot.slane %v4734_v41, 3 }
 0x258   : > { %v2193_v38 = vsel %vm1760_vm4, %v5611_v48, %v4556_v55  ;;  %v2156_v47 = vsel %vm1763_vm5, %v5612_v13, %v2154_v23  ;;  %v5614_v7 = vrot.slane %v4578_v11, 7  ;;  %v2182_v29 = vrot.slane %v4654_v60, 5 }
 0x259   : > { %v2195_v18 = vsel %vm1763_vm5, %v5613_v5, %v2193_v38  ;;  %v2158_v55 = vsel %vm1766_vm6, %v2157_v24, %v2156_v47  ;;  %v5615_v1 = vrot.slane %v4618_v9, 6  ;;  %v2184_v40 = vrot.slane %v4681_v42, 4 }
 0x25a   : > { %v2197_v14 = vsel %vm1766_vm6, %v2196_v62, %v2195_v18  ;;  %v2179_v54 = vsel %vm1760_vm4, %v5614_v7, %v4528_v63  ;;  %v2160_v32 = vsel %vm1769_vm7, %v2159_v52, %v2158_v55  ;;  %2073 = vrot.lane.b32.xlu0 %v2068_v22, %s3168_s20  ;;  %v2186_v35 = vrot.slane %v4711_v6, 3 }
 0x25b   : > { %v2199_v0 = vsel %vm1769_vm7, %v2198_v49, %v2197_v14  ;;  %v2181_v45 = vsel %vm1763_vm5, %v5615_v1, %v2179_v54  ;;  %v2162_v12 = vsel %vm1772_vm8, %v2161_v44, %v2160_v32  ;;  %v5616_v20 = vrot.slane %v4265_v2, 3 }
 0x25c   : > { %v2201_v39 = vsel %vm1772_vm8, %v2200_v36, %v2199_v0  ;;  %v2183_v63 = vsel %vm1766_vm6, %v2182_v29, %v2181_v45  ;;  %2167 = vrot.lane.b32.xlu1 %v2162_v12, %s3170_s22  ;;  %v5617_v27 = vrot.slane %v4478_v17, 2  ;;  %v2222_v16 = vrot.slane %v4654_v60, 6 }
 0x25d   : > { %v2185_v3 = vsel %vm1769_vm7, %v2184_v40, %v2183_v63  ;;  %v2224_v19 = vrot.slane %v4681_v42, 5  ;;  %v5618_v4 = vrot.slane %v4513_v59, 1  ;;  %v2226_v57 = vrot.slane %v4711_v6, 4 }
 0x25e   : > { %v2216_v8 = vsel %vm1754_vm1, %v5617_v27, %v5616_v20  ;;  %v2187_v21 = vsel %vm1772_vm8, %v2186_v35, %v2185_v3  ;;  %v2124_v24 = vrot.slane %v4572_v53, 7  ;;  %v2453_v61 = vsel %vm2374_vm2, %v2440_v10, 0.0  ;;  %2207 = vrot.lane.b32.xlu0 %v2201_v39, %s3171_s23 }
 0x25f   : > { %v2218_v30 = vsel %vm1757_vm3, %v5618_v4, %v2216_v8  ;;  %v2454_v43 = vsel %vm2374_vm2, %v4872_v50, 0.0  ;;  %v2163_v22 = vrot.slane %v4739_v58, 1  ;;  %v5619_v26 = vrot.slane %v4618_v9, 7 }
 0x260   : > { %v2219_v52 = vsel %vm1760_vm4, %v4578_v11, %v2218_v30  ;;  %v2125_v34 = vsel %vm1754_vm1, %v2124_v24, %v4739_v58  ;;  %v2455_v23 = vsel %vm2374_vm2, %v2124_v24, 0.0  ;;  %v2462_v44 = vrot.slane %v2453_v61, 7  ;;  %2205 = vrot.lane.b32.xlu1 %v2187_v21, %s3171_s23 }
 0x261   : > { %v2221_v33 = vsel %vm1763_vm5, %v5619_v26, %v2219_v52  ;;  %v2464_v50 = vrot.slane %v2454_v43, 7  ;;  %v2466_v48 = vrot.slane %v2455_v23, 7  ;;  %v2164_v38 = vsel %vm1754_vm1, %v4572_v53, %v2163_v22 }
 0x262   : > { %v2223_v10 = vsel %vm1766_vm6, %v2222_v16, %v2221_v33  ;;  %v5620_v13 = vrot.slane %v4275_v56, 7  ;;  %v5621_v5 = vrot.slane %v4518_v31, 3  ;;  %v5622_v18 = vrot.slane %v4483_v51, 2 }
 0x263   : > { %v2225_v62 = vsel %vm1769_vm7, %v2224_v19, %v2223_v10  ;;  %v2236_v36 = vrot.slane %v4676_v25, 6  ;;  %v2465_v14 = vsel %vm2460_vm9, %v2462_v44, %v2464_v50  ;;  %v2467_v7 = vsel %vm2460_vm9, %v2464_v50, %v2466_v48 }
 0x264   : > { %v2463_v47 = vsel %vm2460_vm9, %v5620_v13, %v2462_v44  ;;  %v2230_v49 = vsel %vm1754_vm1, %v5622_v18, %v5621_v5  ;;  %v2227_v55 = vsel %vm1772_vm8, %v2226_v57, %v2225_v62  ;;  %v5623_v56 = vrot.slane %v4546_v46, 1  ;;  %2474 = vst.msk [vmem:[#allocation2 + $0x18] sm:$0xff] %vm2378_vm10, %v2465_v14  ;;  %2130 = vrot.lane.b32.xlu1 %v2125_v34, %s3169_s21  ;;  %s3176_s21 = smov [#allocation3]  }
 0x265   : > { %2472 = vst.msk [vmem:[#allocation2 + $0x8] sm:$0xff] %vm2378_vm10, %v2463_v47  ;;  %2245 = vrot.lane.b32.xlu0 %v2227_v55, %s3172_s24  ;;  %v2238_v32 = vrot.slane %v4706_v28, 5  ;;  %v2240_v0 = vrot.slane %v4734_v41, 4  ;;  %v5624_v1 = vrot.slane %v4518_v31, 4  ;;  %v5625_v45 = vrot.slane %v4483_v51, 3 }
 0x266   : > { %v2232_v54 = vsel %vm1757_vm3, %v5623_v56, %v2230_v49  ;;  %2477 = vst.msk [vmem:[#allocation2 + $0x28] sm:$0x3] %vm2476_vm11, %v2467_v7  ;;  %v5626_v12 = vrot.slane %v4640_v37, 7  ;;  %v5627_v63 = vrot.slane %v4546_v46, 2  ;;  %v2276_v3 = vrot.slane %v4676_v25, 7 }
 0x267   : > { %v2233_v29 = vsel %vm1760_vm4, %v4583_v15, %v2232_v54  ;;  %v2270_v40 = vsel %vm1754_vm1, %v5625_v45, %v5624_v1  ;;  %v2278_v20 = vrot.slane %v4706_v28, 6  ;;  %v5628_v8 = vrot.slane %v4583_v15, 1 }
 0x268   : > { %v2235_v39 = vsel %vm1763_vm5, %v5626_v12, %v2233_v29  ;;  %v2272_v35 = vsel %vm1757_vm3, %v5627_v63, %v2270_v40  ;;  %v2280_v19 = vrot.slane %v4734_v41, 5  ;;  %v5629_v21 = vrot.slane %v4265_v2, 4 }
 0x269   : > { %v2237_v27 = vsel %vm1766_vm6, %v2236_v36, %v2235_v39  ;;  %v2274_v16 = vsel %vm1760_vm4, %v5628_v8, %v2272_v35  ;;  %v5630_v4 = vrot.slane %v4478_v17, 3  ;;  %v5631_v52 = vrot.slane %v4513_v59, 2  ;;  %2169 = vrot.lane.b32.xlu0 %v2164_v38, %s3170_s22  ;;  %s3079_s22 = sshll.u32 %s3176_s21, 4  ;;  %s3080_s22 = int_to_ptr.vmem [resolvable:$false] %s3079_s22 }
 0x26a   : > { %v2239_v57 = vsel %vm1769_vm7, %v2238_v32, %v2237_v27  ;;  %v2275_v24 = vsel %vm1763_vm5, %v4640_v37, %v2274_v16  ;;  %v2262_v43 = vrot.slane %v4654_v60, 7  ;;  %v5632_v33 = vrot.slane %v4578_v11, 1 }
 0x26b   : > { %v2256_v30 = vsel %vm1754_vm1, %v5630_v4, %v5629_v21  ;;  %v2241_v22 = vsel %vm1772_vm8, %v2240_v0, %v2239_v57  ;;  %v2277_v26 = vsel %vm1766_vm6, %v2276_v3, %v2275_v24  ;;  %v2264_v23 = vrot.slane %v4681_v42, 6 }
 0x26c   : > { %v2258_v61 = vsel %vm1757_vm3, %v5631_v52, %v2256_v30  ;;  %2247 = vrot.lane.b32.xlu1 %v2241_v22, %s3172_s24  ;;  %v2279_v44 = vsel %vm1769_vm7, %v2278_v20, %v2277_v26  ;;  %v2266_v50 = vrot.slane %v4711_v6, 5  ;;  %v5633_v48 = vrot.slane %v4265_v2, 5 }
 0x26d   : > { %v2260_v34 = vsel %vm1760_vm4, %v5632_v33, %v2258_v61  ;;  %v5634_v38 = vrot.slane %v4478_v17, 4  ;;  %v2281_v13 = vsel %vm1772_vm8, %v2280_v19, %v2279_v44  ;;  %v5635_v5 = vrot.slane %v4513_v59, 3 }
 0x26e   : > { %v2261_v10 = vsel %vm1763_vm5, %v4618_v9, %v2260_v34  ;;  %v2304_v49 = vrot.slane %v4681_v42, 7  ;;  %v5636_v55 = vrot.slane %v4578_v11, 2  ;;  %v2306_v7 = vrot.slane %v4711_v6, 6  ;;  %2287 = vrot.lane.b32.xlu0 %v2281_v13, %s3173_s11 }
 0x26f   : > { %v2296_v62 = vsel %vm1754_vm1, %v5634_v38, %v5633_v48  ;;  %v2263_v47 = vsel %vm1766_vm6, %v2262_v43, %v2261_v10  ;;  %v2202_v56 = vrot.slane %v4739_v58, 2  ;;  %v2315_v54 = vrot.slane %v4640_v37, 1 }
 0x270   : > { %v2298_v18 = vsel %vm1757_vm3, %v5635_v5, %v2296_v62  ;;  %v2265_v36 = vsel %vm1769_vm7, %v2264_v23, %v2263_v47  ;;  %v2355_v29 = vrot.slane %v4640_v37, 2  ;;  %v5637_v0 = vrot.slane %v4618_v9, 1 }
 0x271   : > { %v2300_v14 = vsel %vm1760_vm4, %v5636_v55, %v2298_v18  ;;  %v2267_v32 = vsel %vm1772_vm8, %v2266_v50, %v2265_v36  ;;  %v2203_v40 = vrot.slane %v4572_v53, 1  ;;  %v2242_v12 = vrot.slane %v4739_v58, 3 }
 0x272   : > { %v2302_v1 = vsel %vm1763_vm5, %v5637_v0, %v2300_v14  ;;  %2285 = vrot.lane.b32.xlu1 %v2267_v32, %s3173_s11  ;;  %v5638_v37 = vrot.slane %v4518_v31, 5  ;;  %v5639_v39 = vrot.slane %v4483_v51, 4  ;;  %v2243_v3 = vrot.slane %v4572_v53, 2  ;;  %v2966_v32 = vld [vmem:[%s5447_s4 + $0x5] ss:$0 sm:$0xff] }
 0x273   : > { %v2303_v45 = vsel %vm1766_vm6, %v4654_v60, %v2302_v1  ;;  %v5640_v20 = vrot.slane %v4546_v46, 3  ;;  %v2318_v8 = vrot.slane %v4706_v28, 7  ;;  %v2204_v19 = vsel %vm1754_vm1, %v2203_v40, %v2202_v56  ;;  %v2972_v0 = vld [vmem:[%s5450_s7] ss:$0 sm:$0xff]  ;;  %v2969_v1 = vld [vmem:[%s5447_s4 + $0x8] ss:$0 sm:$0xff] }
 0x274   : > { %v2310_v63 = vsel %vm1754_vm1, %v5639_v39, %v5638_v37  ;;  %v2305_v35 = vsel %vm1769_vm7, %v2304_v49, %v2303_v45  ;;  %v5641_v21 = vrot.slane %v4583_v15, 2  ;;  %v5642_v30 = vrot.slane %v4518_v31, 6 }
 0x275   : > { %v2312_v27 = vsel %vm1757_vm3, %v5640_v20, %v2310_v63  ;;  %v2307_v16 = vsel %vm1772_vm8, %v2306_v7, %v2305_v35  ;;  %v5643_v57 = vrot.slane %v4483_v51, 5  ;;  %v2320_v61 = vrot.slane %v4734_v41, 6  ;;  %v2962_v7 = vld [vmem:[%s5447_s4 + $0x1] ss:$0 sm:$0xff] }
 0x276   : > { %v2314_v4 = vsel %vm1760_vm4, %v5641_v21, %v2312_v27  ;;  %2325 = vrot.lane.b32.xlu0 %v2307_v16, %s3174_s12  ;;  %v5644_v43 = vrot.slane %v4546_v46, 4  ;;  %v2357_v26 = vrot.slane %v4676_v25, 1  ;;  %2209 = vrot.lane.b32.xlu1 %v2204_v19, %s3171_s23  ;;  %v5645_v31 = vrot.slane %v4583_v15, 3  ;;  %s310_s23 = sand.u32 1, %s3137_s28  }
 0x277   : > { %v2350_v24 = vsel %vm1754_vm1, %v5643_v57, %v5642_v30  ;;  %v2316_v52 = vsel %vm1763_vm5, %v2315_v54, %v2314_v4  ;;  %v5646_v33 = vrot.slane %v4265_v2, 6  ;;  %v5647_v34 = vrot.slane %v4478_v17, 5  ;;  %s5396_s20 = scalar_lea.sflag [#allocation4], %s310_s23 }
 0x278   : > { %v2352_v22 = vsel %vm1757_vm3, %v5644_v43, %v2350_v24  ;;  %v2343_v44 = vrot.slane %v4654_v60, 1  ;;  %v2244_v46 = vsel %vm1754_vm1, %v2243_v3, %v2242_v12  ;;  %v2317_v10 = vsel %vm1766_vm6, %v4676_v25, %v2316_v52 }
 0x279   : > { %v2354_v51 = vsel %vm1760_vm4, %v5645_v31, %v2352_v22  ;;  %v2336_v23 = vsel %vm1754_vm1, %v5647_v34, %v5646_v33  ;;  %v5648_v48 = vrot.slane %v4513_v59, 4  ;;  %v2319_v38 = vsel %vm1769_vm7, %v2318_v8, %v2317_v10 }
 0x27a   : > { %v2356_v50 = vsel %vm1763_vm5, %v2355_v29, %v2354_v51  ;;  %v2360_v17 = vrot.slane %v4734_v41, 7  ;;  %v5649_v62 = vrot.slane %v4578_v11, 3  ;;  %2249 = vrot.lane.b32.xlu0 %v2244_v46, %s3172_s24  ;;  %v2321_v25 = vsel %vm1772_vm8, %v2320_v61, %v2319_v38  ;;  %v2965_v29 = vld [vmem:[%s5447_s4 + $0x4] ss:$0 sm:$0xff] }
 0x27b   : > { %v2338_v15 = vsel %vm1757_vm3, %v5648_v48, %v2336_v23  ;;  %v2358_v2 = vsel %vm1766_vm6, %v2357_v26, %v2356_v50  ;;  %v5650_v13 = vrot.slane %v4618_v9, 2  ;;  %v2346_v47 = vrot.slane %v4711_v6, 7  ;;  %2327 = vrot.lane.b32.xlu1 %v2321_v25, %s3174_s12 }
 0x27c   : > { %v2340_v60 = vsel %vm1760_vm4, %v5649_v62, %v2338_v15  ;;  %v2359_v41 = vsel %vm1769_vm7, %v4706_v28, %v2358_v2  ;;  %v2322_v49 = vrot.slane %v4739_v58, 5  ;;  %v2282_v6 = vrot.slane %v4739_v58, 4 }
 0x27d   : > { %v2342_v59 = vsel %vm1763_vm5, %v5650_v13, %v2340_v60  ;;  %v2361_v11 = vsel %vm1772_vm8, %v2360_v17, %v2359_v41  ;;  %v2323_v36 = vrot.slane %v4572_v53, 4  ;;  %v2283_v28 = vrot.slane %v4572_v53, 3 }
 0x27e   : > { %v2344_v5 = vsel %vm1766_vm6, %v2343_v44, %v2342_v59  ;;  %2367 = vrot.lane.b32.xlu0 %v2361_v11, %s3175_s14  ;;  %v2362_v14 = vrot.slane %v4739_v58, 6  ;;  %v2363_v56 = vrot.slane %v4572_v53, 5  ;;  %v2963_v58 = vld [vmem:[%s5447_s4 + $0x2] ss:$0 sm:$0xff]  ;;  %v2968_v53 = vld [vmem:[%s5447_s4 + $0x7] ss:$0 sm:$0xff] }
 0x27f   : > { %v2345_v18 = vsel %vm1769_vm7, %v4681_v42, %v2344_v5  ;;  %v2324_v55 = vsel %vm1754_vm1, %v2323_v36, %v2322_v49  ;;  %v2284_v42 = vsel %vm1754_vm1, %v2283_v28, %v2282_v6  ;;  %vm2398_vm0 = vcmask 457728  }
 0x280   : > { %v2347_v9 = vsel %vm1772_vm8, %v2346_v47, %v2345_v18  ;;  %v2364_v54 = vsel %vm1754_vm1, %v2363_v56, %v2362_v14  ;;  %vm2402_vm1 = vcmask 523264   ;;  %vm2410_vm3 = vcmask 654336  }
 0x281   : > { %2365 = vrot.lane.b32.xlu1 %v2347_v9, %s3175_s14  ;;  %vm2414_vm4 = vcmask 719872   ;;  %vm2418_vm5 = vcmask 785408   ;;  %vm2422_vm6 = vcmask 850944   ;;  %vm2426_vm7 = vcmask 916480  }
 0x282   : > { %2329 = vrot.lane.b32.xlu0 %v2324_v55, %s3174_s12  ;;  %vm2430_vm8 = vcmask 982016   ;;  %vm2566_vm9 = vcmask 1046528  }
 0x285   : > { %2289 = vrot.lane.b32.xlu1 %v2284_v42, %s3173_s11 }
 0x286   : > { %2497 = vrot.lane.b32.xlu0 %v2962_v7, %s3161_s25 }
 0x288   : > { %v1791_v40 = vpop.permute.xlu1 %1790 }
 0x289   : > { %2369 = vrot.lane.b32.xlu1 %v2364_v54, %s3175_s14  ;;  %v2375_v15 = vsel %vm2374_vm2, 0.0, %v1791_v40 }
 0x28a   : > { %2584 = vrot.lane.b32.xlu0 %v2965_v29, %s3161_s25  ;;  %v1793_v45 = vpop.permute.xlu0 %1792 }
 0x28b   : > { %v2376_v44 = vsel %vm2374_vm2, 0.0, %v1793_v45 }
 0x28c   : > { %v1830_v37 = vpop.permute.xlu1 %1829 }
 0x28d   : > { %2528 = vrot.lane.b32.xlu1 %v2963_v58, %s3162_s26  ;;  %v2379_v2 = vsel %vm2378_vm10, %v2375_v15, %v1830_v37 }
 0x28e   : > { %2699 = vrot.lane.b32.xlu0 %v2968_v53, %s3161_s25  ;;  %v1832_v12 = vpop.permute.xlu0 %1831 }
 0x28f   : > { %v2380_v46 = vsel %vm2378_vm10, %v2376_v44, %v1832_v12 }
 0x290   : > { %v1870_v63 = vpop.permute.xlu1 %1869 }
 0x291   : > { %2629 = vrot.lane.b32.xlu1 %v2966_v32, %s3162_s26  ;;  %v2383_v17 = vsel %vm2382_vm12, %v2379_v2, %v1870_v63 }
 0x292   : > { %2809 = vrot.lane.b32.xlu0 %v2972_v0, %s3161_s25  ;;  %v1872_v39 = vpop.permute.xlu0 %1871 }
 0x293   : > { %v2384_v50 = vsel %vm2382_vm12, %v2380_v46, %v1872_v39 }
 0x295   : > { %2744 = vrot.lane.b32.xlu1 %v2969_v1, %s3162_s26  ;;  %s2950_s26 = sshll.u32 %s310_s23, 4 }
 0x296   : > { %v1910_v35 = vpop.permute.xlu0 %1909  ;;  %s312_s24 = scalar_lea.vmem [#allocation3], %s2950_s26  ;;  %s3081_s26 = scalar_lea.vmem %s3080_s22, 512 }
 0x297   : > { %v2387_v60 = vsel %vm2386_vm13, %v2383_v17, %v1910_v35  ;;  %v5256_v17 = vld [vmem:[#allocation2 + $0x8] sm:$0xfe]  ;;  %s2866_s11 = sshll.u32 %s312_s24, 4  ;;  %s5388_s11 = int_to_ptr.vmem [resolvable:$true] %s2866_s11 }
 0x298   : > { %s3075_s30 = scalar_lea.vmem %s5388_s11, 256  ;;  %p3082_p1 = scmp.lt.s32.totalorder %s5388_s11, %s3080_s22 }
 0x299   : > { %v1795_v3 = vpop.permute.xlu1 %1794  ;;  %p3076_p12 = scmp.ne.s32.totalorder %s5388_s11, %s3075_s30  ;;  %p3083_p2 = scmp.lt.s32.totalorder %s3081_s26, %s3075_s30 }
 0x29a   : > { %v2377_v59 = vsel %vm2374_vm2, 0.0, %v1795_v3  ;;  %vm2406_vm2 = vcmask 588800  }
 0x29b   : > { %v1834_v20 = vpop.permute.xlu0 %1833  ;;  %p3077_p13 = pnand %p3076_p12, %p3263_p4  ;;  %p3084_p3 = por %p3083_p2, %p3082_p1 }
 0x29c   : > { %v2381_v11 = vsel %vm2378_vm10, %v2377_v59, %v1834_v20  ;;  %vm2681_vm10 = vcmask 1045504  }
 0x29d   : > { %p3078_p0 = pneg %p3077_p13 }
 0x29e   : > { %v1912_v27 = vpop.permute.xlu1 %1911 }
 0x29f   : > { %v2388_v38 = vsel %vm2386_vm13, %v2384_v50, %v1912_v27  ;;  %p3085_p5 = pnand %p3084_p3, %p3078_p0 }
 0x2a5   : > { %v1952_v8 = vpop.permute.xlu0 %1951 }
 0x2a6   : > { %v2392_v25 = vsel %vm2390_vm14, %v2388_v38, %v1952_v8 }
 0x2a7   : > { %v1950_v16 = vpop.permute.xlu1 %1949 }
 0x2a8   : > { %v2391_v47 = vsel %vm2390_vm14, %v2387_v60, %v1950_v16 }
 0x2a9   : > { %v1990_v19 = vpop.permute.xlu0 %1989 }
 0x2aa   : > { %v2395_v18 = vsel %vm2394_vm15, %v2391_v47, %v1990_v19 }
 0x2ab   : > { %v1874_v21 = vpop.permute.xlu1 %1873 }
 0x2ac   : > { %v2385_v6 = vsel %vm2382_vm12, %v2381_v11, %v1874_v21  ;;  %v5268_v11 = vld [vmem:[#allocation2 + $0x28] sm:$0x1] }
 0x2ad   : > { %v1914_v4 = vpop.permute.xlu0 %1913 }
 0x2ae   : > { %v2389_v42 = vsel %vm2386_vm13, %v2385_v6, %v1914_v4 }
 0x2b1   : > { %v1992_v30 = vpop.permute.xlu1 %1991 }
 0x2b2   : > { %v2396_v5 = vsel %vm2394_vm15, %v2392_v25, %v1992_v30 }
 0x2b4   : > { %v2032_v57 = vpop.permute.xlu0 %2031 }
 0x2b5   : > { %v2030_v24 = vpop.permute.xlu1 %2029  ;;  %v2400_v49 = vsel %vm2398_vm0, %v2396_v5, %v2032_v57 }
 0x2b6   : > { %v2399_v36 = vsel %vm2398_vm0, %v2395_v18, %v2030_v24 }
 0x2b8   : > { %v2070_v52 = vpop.permute.xlu0 %2069 }
 0x2b9   : > { %v1954_v61 = vpop.permute.xlu1 %1953  ;;  %v2403_v14 = vsel %vm2402_vm1, %v2399_v36, %v2070_v52 }
 0x2ba   : > { %v2393_v54 = vsel %vm2390_vm14, %v2389_v42, %v1954_v61 }
 0x2bc   : > { %v1994_v43 = vpop.permute.xlu0 %1993 }
 0x2bd   : > { %v2397_v32 = vsel %vm2394_vm15, %v2393_v54, %v1994_v43  ;;  %v2964_v54 = vld [vmem:[%s5447_s4 + $0x3] ss:$0 sm:$0xff] }
 0x2be   : > { %v2072_v22 = vpop.permute.xlu1 %2071 }
 0x2bf   : > { %v2404_v28 = vsel %vm2402_vm1, %v2400_v49, %v2072_v22 }
 0x2c0   : > { %v2129_v26 = vpop.permute.xlu0 %2128 }
 0x2c1   : > { %v2408_v7 = vsel %vm2406_vm2, %v2404_v28, %v2129_v26 }
 0x2c4   : > { %v2127_v31 = vpop.permute.xlu1 %2126 }
 0x2c5   : > { %v2407_v29 = vsel %vm2406_vm2, %v2403_v14, %v2127_v31  ;;  %v2489_v31 = vld [vmem:[#allocation2 + $0x8] sm:$0xff] }
 0x2c8   : > { %v2166_v51 = vpop.permute.xlu0 %2165  ;;  %v2034_v33 = vpop.permute.xlu1 %2033 }
 0x2c9   : > { %v2411_v0 = vsel %vm2410_vm3, %v2407_v29, %v2166_v51  ;;  %v2401_v40 = vsel %vm2398_vm0, %v2397_v32, %v2034_v33  ;;  %v2967_v29 = vld [vmem:[%s5447_s4 + $0x6] ss:$0 sm:$0xff] }
 0x2cc   : > { %v2074_v34 = vpop.permute.xlu0 %2073 }
 0x2cd   : > { %v2405_v63 = vsel %vm2402_vm1, %v2401_v40, %v2074_v34 }
 0x2ce   : > { %v2168_v23 = vpop.permute.xlu1 %2167 }
 0x2cf   : > { %v2412_v58 = vsel %vm2410_vm3, %v2408_v7, %v2168_v23 }
 0x2d0   : > { %v2208_v10 = vpop.permute.xlu0 %2207 }
 0x2d1   : > { %v2416_v1 = vsel %vm2414_vm4, %v2412_v58, %v2208_v10  ;;  %v5248_v10 = vld [vmem:[#allocation2 + $0x18] sm:$0xff] }
 0x2d2   : > { %v2206_v48 = vpop.permute.xlu1 %2205 }
 0x2d3   : > { %v2415_v12 = vsel %vm2414_vm4, %v2411_v0, %v2206_v48 }
 0x2d6   : > { %v2131_v13 = vpop.permute.xlu1 %2130 }
 0x2d7   : > { %v2246_v62 = vpop.permute.xlu0 %2245  ;;  %v2409_v27 = vsel %vm2406_vm2, %v2405_v63, %v2131_v13 }
 0x2d8   : > { %v2419_v35 = vsel %vm2418_vm5, %v2415_v12, %v2246_v62 }
 0x2db   : > { %v2170_v41 = vpop.permute.xlu0 %2169 }
 0x2dc   : > { %v2413_v21 = vsel %vm2410_vm3, %v2409_v27, %v2170_v41 }
 0x2de   : > { %v2248_v9 = vpop.permute.xlu1 %2247 }
 0x2df   : > { %v2420_v37 = vsel %vm2418_vm5, %v2416_v1, %v2248_v9 }
 0x2e0   : > { %v2288_v55 = vpop.permute.xlu0 %2287 }
 0x2e1   : > { %v2424_v3 = vsel %vm2422_vm6, %v2420_v37, %v2288_v55 }
 0x2e4   : > { %v2286_v56 = vpop.permute.xlu1 %2285 }
 0x2e5   : > { %v2423_v8 = vsel %vm2422_vm6, %v2419_v35, %v2286_v56 }
 0x2e8   : > { %v2326_v53 = vpop.permute.xlu0 %2325  ;;  %v2210_v45 = vpop.permute.xlu1 %2209 }
 0x2e9   : > { %v2427_v4 = vsel %vm2426_vm7, %v2423_v8, %v2326_v53  ;;  %v2417_v24 = vsel %vm2414_vm4, %v2413_v21, %v2210_v45 }
 0x2ec   : > { %v2250_v39 = vpop.permute.xlu0 %2249 }
 0x2ed   : > { %v2328_v20 = vpop.permute.xlu1 %2327  ;;  %v2421_v43 = vsel %vm2418_vm5, %v2417_v24, %v2250_v39  ;;  %v2691_v24 = vld [vmem:[#allocation2 + $0x8] sm:$0xfc] }
 0x2ee   : > { %v2428_v16 = vsel %vm2426_vm7, %v2424_v3, %v2328_v20 }
 0x2f0   : > { %v2368_v19 = vpop.permute.xlu0 %2367 }
 0x2f1   : > { %v5234_v30 = vsel %vm2430_vm8, %v2428_v16, %v2368_v19 }
 0x2f2   : > { %v2561_v37 = vmul.f32 %v2964_v54, %v5234_v30  ;;  %v2676_v39 = vmul.f32 %v2967_v29, %v5234_v30 }
 0x2f3   : > { %v2366_v57 = vpop.permute.xlu1 %2365 }
 0x2f4   : > { %v5238_v52 = vsel %vm2430_vm8, %v2427_v4, %v2366_v57  ;;  %v2330_v61 = vpop.permute.xlu0 %2329 }
 0x2f5   : > { %2471 = vst [vmem:[#allocation2] sm:$0xff] %v5238_v52 }
 0x2f7   : > { %v2290_v22 = vpop.permute.xlu1 %2289 }
 0x2f8   : > { %v2425_v26 = vsel %vm2422_vm6, %v2421_v43, %v2290_v22  ;;  %v2498_v51 = vpop.permute.xlu0 %2497  ;;  %v2568_v43 = vrot.slane %v2561_v37, 1  ;;  %v2683_v22 = vrot.slane %v2676_v39, 2 }
 0x2f9   : > { %v2500_v33 = vmul.f32 %v2498_v51, %v5238_v52  ;;  %v2501_v34 = vmul.f32 %v2498_v51, %v2489_v31  ;;  %v2429_v23 = vsel %vm2426_vm7, %v2425_v26, %v2330_v61  ;;  %v2502_v50 = vmul.f32 %v2498_v51, %v5234_v30 }
 0x2fa   : > { %v2503_v48 = vmul.f32 %v2498_v51, %v5248_v10 }
 0x2fb   : > { %v2370_v44 = vpop.permute.xlu1 %2369  ;;  %2510 = vrot.lane.b32.xlu0 %v2501_v34, %s3175_s14  ;;  %2508 = vrot.lane.b32.xlu1 %v2500_v33, %s3175_s14 }
 0x2fc   : > { %v2433_v46 = vsel %vm2430_vm8, %v2429_v23, %v2370_v44  ;;  %v2585_v15 = vpop.permute.xlu0 %2584  ;;  %v5254_v2 = vld [vmem:[#allocation2] sm:$0xfe] }
 0x2fd   : > { %2475 = vst [vmem:[#allocation2 + $0x20] sm:$0x3] %v2433_v46  ;;  %v2588_v25 = vmul.f32 %v2585_v15, %v5256_v17  ;;  %v2590_v13 = vmul.f32 %v2585_v15, %v5248_v10  ;;  %v2587_v59 = vmul.f32 %v2585_v15, %v5254_v2  ;;  %v2589_v47 = vmul.f32 %v2585_v15, %v5234_v30  ;;  %v5273_v14 = vld [vmem:[#allocation2] sm:$0xfc] }
 0x2fe   : > { %v2592_v36 = vmul.f32 %v2585_v15, %v5268_v11  ;;  %v2560_v32 = vmul.f32 %v2964_v54, %v5254_v2  ;;  %v2675_v0 = vmul.f32 %v2967_v29, %v5273_v14 }
 0x2ff   : > { %v2529_v38 = vpop.permute.xlu1 %2528  ;;  %2514 = vrot.lane.b32.xlu0 %v2503_v48, %s3175_s14  ;;  %2512 = vrot.lane.b32.xlu1 %v2502_v50, %s3175_s14  ;;  %v2602_v9 = vrot.slane %v2588_v25, 1  ;;  %v2603_v6 = vrot.slane %v2590_v13, 1  ;;  %v2599_v28 = vrot.slane %v2587_v59, 1  ;;  %v2600_v55 = vrot.slane %v2589_v47, 1 }
 0x300   : > { %v2531_v62 = vmul.f32 %v2529_v38, %v5238_v52  ;;  %v2532_v60 = vmul.f32 %v2529_v38, %v2489_v31  ;;  %v2533_v41 = vmul.f32 %v2529_v38, %v5234_v30  ;;  %v2534_v18 = vmul.f32 %v2529_v38, %v5248_v10  ;;  %v2700_v20 = vpop.permute.xlu0 %2699 }
 0x301   : > { %v2604_v58 = vsel %vm2566_vm9, %v2602_v9, %v2603_v6  ;;  %v2607_v53 = vrot.slane %v2592_v36, 1  ;;  %v2601_v1 = vsel %vm2566_vm9, %v2599_v28, %v2600_v55  ;;  %v2567_v8 = vrot.slane %v2560_v32, 1 }
 0x302   : > { %v2682_v16 = vrot.slane %v2675_v0, 2  ;;  %v2703_v51 = vmul.f32 %v2700_v20, %v2691_v24  ;;  %v2705_v33 = vmul.f32 %v2700_v20, %v5248_v10  ;;  %v2702_v34 = vmul.f32 %v2700_v20, %v5273_v14 }
 0x303   : > { %2541 = vrot.lane.b32.xlu0 %v2532_v60, %s3174_s12  ;;  %2539 = vrot.lane.b32.xlu1 %v2531_v62, %s3174_s12  ;;  %v2630_v49 = vpop.permute.xlu1 %2629  ;;  %v2608_v27 = vsel %vm2566_vm9, %v2603_v6, %v2607_v53  ;;  %v2704_v23 = vmul.f32 %v2700_v20, %v5234_v30  ;;  %v5306_v44 = vsel %vm2566_vm9, %v2567_v8, %v2568_v43 }
 0x304   : > { %v5265_v5 = vld [vmem:[#allocation2 + $0x20] sm:$0x1]  ;;  %v2633_v7 = vmul.f32 %v2630_v49, %v5256_v17  ;;  %v2635_v56 = vmul.f32 %v2630_v49, %v5248_v10  ;;  %v2632_v40 = vmul.f32 %v2630_v49, %v5254_v2  ;;  %v2634_v12 = vmul.f32 %v2630_v49, %v5234_v30 }
 0x305   : > { %v2591_v42 = vmul.f32 %v2585_v15, %v5265_v5  ;;  %v2637_v3 = vmul.f32 %v2630_v49, %v5268_v11  ;;  %v2636_v57 = vmul.f32 %v2630_v49, %v5265_v5  ;;  %v2669_v61 = vld [vmem:[#allocation2 + $0x20] sm:$0x3]  ;;  %v2562_v46 = vmul.f32 %v2964_v54, %v5265_v5 }
 0x306   : > { %v2647_v63 = vrot.slane %v2633_v7, 1  ;;  %v2648_v35 = vrot.slane %v2635_v56, 1  ;;  %v2644_v21 = vrot.slane %v2632_v40, 1  ;;  %v2645_v4 = vrot.slane %v2634_v12, 1  ;;  %v2810_v12 = vpop.permute.xlu0 %2809 }
 0x307   : > { %2545 = vrot.lane.b32.xlu0 %v2534_v18, %s3174_s12  ;;  %2543 = vrot.lane.b32.xlu1 %v2533_v41, %s3174_s12  ;;  %v2605_v45 = vrot.slane %v2591_v42, 1  ;;  %v2652_v31 = vrot.slane %v2637_v3, 1  ;;  %v2650_v48 = vrot.slane %v2636_v57, 1  ;;  %v5311_v15 = vsel %vm2681_vm10, %v2682_v16, %v2683_v22  ;;  %v2692_v18 = vld [vmem:[#allocation2 + $0x28] sm:$0x3]  ;;  %v2745_v9 = vpop.permute.xlu1 %2744 }
 0x308   : > { %v2649_v26 = vsel %vm2566_vm9, %v2647_v63, %v2648_v35  ;;  %v2646_v50 = vsel %vm2566_vm9, %v2644_v21, %v2645_v4  ;;  %v2677_v38 = vmul.f32 %v2967_v29, %v2669_v61  ;;  %v2570_v62 = vrot.slane %v2562_v46, 1 }
 0x309   : > { %v2606_v19 = vsel %vm2566_vm9, %v2600_v55, %v2605_v45  ;;  %v2717_v60 = vrot.slane %v2703_v51, 2  ;;  %v2718_v25 = vrot.slane %v2705_v33, 2  ;;  %v2653_v59 = vsel %vm2566_vm9, %v2648_v35, %v2652_v31 }
 0x30a   : > { %v2685_v13 = vrot.slane %v2677_v38, 2  ;;  %v2714_v47 = vrot.slane %v2702_v34, 2  ;;  %v2715_v41 = vrot.slane %v2704_v23, 2  ;;  %v5317_v49 = vsel %vm2566_vm9, %v2568_v43, %v2570_v62 }
 0x30b   : > { %2611 = vrot.lane.b32.xlu0 %v2604_v58, %s3175_s14  ;;  %2609 = vrot.lane.b32.xlu1 %v2601_v1, %s3175_s14  ;;  %v2651_v6 = vsel %vm2566_vm9, %v2645_v4, %v2650_v48  ;;  %v2707_v36 = vmul.f32 %v2700_v20, %v2692_v18  ;;  %v2706_v28 = vmul.f32 %v2700_v20, %v2669_v61 }
 0x30c   : > { %v5321_v55 = vsel %vm2681_vm10, %v2683_v22, %v2685_v13  ;;  %v2719_v42 = vsel %vm2681_vm10, %v2717_v60, %v2718_v25  ;;  %v2716_v7 = vsel %vm2681_vm10, %v2714_v47, %v2715_v41  ;;  %v2748_v56 = vmul.f32 %v2745_v9, %v2691_v24 }
 0x30d   : > { %v2750_v54 = vmul.f32 %v2745_v9, %v5248_v10  ;;  %v2722_v29 = vrot.slane %v2707_v36, 2  ;;  %v2720_v58 = vrot.slane %v2706_v28, 2  ;;  %v2747_v53 = vmul.f32 %v2745_v9, %v5273_v14 }
 0x30e   : > { %v2749_v32 = vmul.f32 %v2745_v9, %v5234_v30  ;;  %v2762_v0 = vrot.slane %v2748_v56, 2  ;;  %v2752_v45 = vmul.f32 %v2745_v9, %v2692_v18  ;;  %v2751_v40 = vmul.f32 %v2745_v9, %v2669_v61 }
 0x30f   : > { %2615 = vrot.lane.b32.xlu0 %v2608_v27, %s3175_s14  ;;  %2613 = vrot.lane.b32.xlu1 %v2606_v19, %s3175_s14  ;;  %v2763_v1 = vrot.slane %v2750_v54, 2  ;;  %v2723_v37 = vsel %vm2681_vm10, %v2718_v25, %v2722_v29  ;;  %v2721_v39 = vsel %vm2681_vm10, %v2715_v41, %v2720_v58  ;;  %v2759_v63 = vrot.slane %v2747_v53, 2 }
 0x310   : > { %v2760_v35 = vrot.slane %v2749_v32, 2  ;;  %v2767_v3 = vrot.slane %v2752_v45, 2  ;;  %v2765_v20 = vrot.slane %v2751_v40, 2  ;;  %v2813_v27 = vmul.f32 %v2810_v12, %v5256_v17 }
 0x311   : > { %v2764_v14 = vsel %vm2681_vm10, %v2762_v0, %v2763_v1  ;;  %v2815_v16 = vmul.f32 %v2810_v12, %v5248_v10  ;;  %v2812_v19 = vmul.f32 %v2810_v12, %v5254_v2  ;;  %v2814_v21 = vmul.f32 %v2810_v12, %v5234_v30 }
 0x312   : > { %v2761_v8 = vsel %vm2681_vm10, %v2759_v63, %v2760_v35  ;;  %v2768_v4 = vsel %vm2681_vm10, %v2763_v1, %v2767_v3  ;;  %v2766_v57 = vsel %vm2681_vm10, %v2760_v35, %v2765_v20  ;;  %v2827_v24 = vrot.slane %v2813_v27, 1 }
 0x313   : > { %2656 = vrot.lane.b32.xlu0 %v2649_v26, %s3174_s12  ;;  %2654 = vrot.lane.b32.xlu1 %v2646_v50, %s3174_s12  ;;  %v2817_v61 = vmul.f32 %v2810_v12, %v5268_v11  ;;  %v2828_v17 = vrot.slane %v2815_v16, 1  ;;  %v2824_v43 = vrot.slane %v2812_v19, 1  ;;  %v2825_v22 = vrot.slane %v2814_v21, 1  ;;  %v2961_v50 = vld [vmem:[%s5447_s4] ss:$0 sm:$0xff] }
 0x314   : > { %v2816_v10 = vmul.f32 %v2810_v12, %v5265_v5  ;;  %v2485_v38 = vmul.f32 %v2961_v50, %v5238_v52  ;;  %v2486_v47 = vmul.f32 %v2961_v50, %v5234_v30 }
 0x315   : > { %v2829_v2 = vsel %vm2566_vm9, %v2827_v24, %v2828_v17  ;;  %v2826_v26 = vsel %vm2566_vm9, %v2824_v43, %v2825_v22  ;;  %v2832_v31 = vrot.slane %v2817_v61, 1 }
 0x316   : > { %v2830_v51 = vrot.slane %v2816_v10, 1 }
 0x317   : > { %2660 = vrot.lane.b32.xlu0 %v2653_v59, %s3174_s12  ;;  %2658 = vrot.lane.b32.xlu1 %v2651_v6, %s3174_s12  ;;  %v2833_v11 = vsel %vm2566_vm9, %v2828_v17, %v2832_v31 }
 0x318   : > { %v2831_v33 = vsel %vm2566_vm9, %v2825_v22, %v2830_v51 }
 0x31b   : > { %2726 = vrot.lane.b32.xlu0 %v2719_v42, %s3175_s14  ;;  %2724 = vrot.lane.b32.xlu1 %v2716_v7, %s3175_s14 }
 0x31f   : > { %2730 = vrot.lane.b32.xlu0 %v2723_v37, %s3175_s14  ;;  %2728 = vrot.lane.b32.xlu1 %v2721_v39, %s3175_s14 }
 0x323   : > { %2771 = vrot.lane.b32.xlu0 %v2764_v14, %s3174_s12  ;;  %2769 = vrot.lane.b32.xlu1 %v2761_v8, %s3174_s12 }
 0x327   : > { %2775 = vrot.lane.b32.xlu0 %v2768_v4, %s3174_s12  ;;  %2773 = vrot.lane.b32.xlu1 %v2766_v57, %s3174_s12 }
 0x32b   : > { %2836 = vrot.lane.b32.xlu0 %v2829_v2, %s3175_s14  ;;  %2834 = vrot.lane.b32.xlu1 %v2826_v26, %s3175_s14 }
 0x32f   : > { %2840 = vrot.lane.b32.xlu0 %v2833_v11, %s3175_s14  ;;  %2838 = vrot.lane.b32.xlu1 %v2831_v33, %s3175_s14  ;;  %s5394_s14 = scalar_lea.hbm %s5451_s8, %s2979_s16 }
 0x36d   : > { %v2511_v5 = vpop.permute.xlu0 %2510  ;;  %v2509_v34 = vpop.permute.xlu1 %2508 }
 0x36e   : > { %v2516_v48 = vsel %vm2430_vm8, %v2509_v34, %v2511_v5 }
 0x36f   : > { %v2520_v62 = vadd.f32 %v2516_v48, %v2485_v38 }
 0x371   : > { %v2515_v23 = vpop.permute.xlu0 %2514  ;;  %v2513_v46 = vpop.permute.xlu1 %2512 }
 0x372   : > { %v2517_v13 = vsel %vm2430_vm8, %v2513_v46, %v2515_v23 }
 0x373   : > { %v2521_v18 = vadd.f32 %v2517_v13, %v2486_v47 }
 0x375   : > { %v2542_v60 = vpop.permute.xlu0 %2541  ;;  %v2540_v25 = vpop.permute.xlu1 %2539 }
 0x376   : > { %v2547_v59 = vsel %vm2426_vm7, %v2540_v25, %v2542_v60 }
 0x377   : > { %v2551_v41 = vadd.f32 %v2547_v59, %v2520_v62 }
 0x379   : > { %v2546_v9 = vpop.permute.xlu0 %2545  ;;  %v2544_v6 = vpop.permute.xlu1 %2543  ;;  %v2574_v36 = vadd.f32 %v5306_v44, %v2551_v41 }
 0x37a   : > { %v2548_v28 = vsel %vm2426_vm7, %v2544_v6, %v2546_v9 }
 0x37b   : > { %v2552_v42 = vadd.f32 %v2548_v28, %v2521_v18 }
 0x37d   : > { %v2612_v7 = vpop.permute.xlu0 %2611  ;;  %v2610_v52 = vpop.permute.xlu1 %2609  ;;  %v2575_v56 = vadd.f32 %v5317_v49, %v2552_v42 }
 0x37e   : > { %v2617_v58 = vsel %vm2430_vm8, %v2610_v52, %v2612_v7 }
 0x37f   : > { %v2621_v53 = vadd.f32 %v2617_v58, %v2574_v36 }
 0x381   : > { %v2616_v54 = vpop.permute.xlu0 %2615  ;;  %v2614_v29 = vpop.permute.xlu1 %2613 }
 0x382   : > { %v2618_v0 = vsel %vm2430_vm8, %v2614_v29, %v2616_v54 }
 0x383   : > { %v2622_v44 = vadd.f32 %v2618_v0, %v2575_v56 }
 0x385   : > { %v2657_v32 = vpop.permute.xlu0 %2656  ;;  %v2655_v30 = vpop.permute.xlu1 %2654 }
 0x386   : > { %v2662_v1 = vsel %vm2426_vm7, %v2655_v30, %v2657_v32 }
 0x387   : > { %v2666_v45 = vadd.f32 %v2662_v1, %v2621_v53 }
 0x389   : > { %v2661_v40 = vpop.permute.xlu0 %2660  ;;  %v2659_v12 = vpop.permute.xlu1 %2658  ;;  %v2689_v37 = vadd.f32 %v5311_v15, %v2666_v45  ;;  %v2970_v15 = vld [vmem:[%s5448_s5] ss:$0 sm:$0xff] }
 0x38a   : > { %v2663_v39 = vsel %vm2426_vm7, %v2659_v12, %v2661_v40 }
 0x38b   : > { %v2667_v49 = vadd.f32 %v2663_v39, %v2622_v44 }
 0x38d   : > { %v2727_v63 = vpop.permute.xlu0 %2726  ;;  %v2725_v35 = vpop.permute.xlu1 %2724  ;;  %v2690_v14 = vadd.f32 %v5321_v55, %v2667_v49  ;;  %v2971_v55 = vld [vmem:[%s5449_s6] ss:$0 sm:$0xff] }
 0x38e   : > { %v2732_v27 = vsel %vm2430_vm8, %v2725_v35, %v2727_v63 }
 0x38f   : > { %v2736_v8 = vadd.f32 %v2732_v27, %v2689_v37 }
 0x391   : > { %v2731_v3 = vpop.permute.xlu0 %2730  ;;  %v2729_v20 = vpop.permute.xlu1 %2728 }
 0x392   : > { %v2733_v21 = vsel %vm2430_vm8, %v2729_v20, %v2731_v3 }
 0x393   : > { %v2737_v24 = vadd.f32 %v2733_v21, %v2690_v14 }
 0x395   : > { %v2772_v16 = vpop.permute.xlu0 %2771  ;;  %v2770_v19 = vpop.permute.xlu1 %2769 }
 0x396   : > { %v2777_v4 = vsel %vm2426_vm7, %v2770_v19, %v2772_v16 }
 0x397   : > { %v2781_v57 = vadd.f32 %v2777_v4, %v2736_v8 }
 0x399   : > { %v2790_v61 = vmul.f32 %v2970_v15, %v2781_v57  ;;  %v2776_v17 = vpop.permute.xlu0 %2775  ;;  %v2774_v43 = vpop.permute.xlu1 %2773 }
 0x39a   : > { %v2778_v22 = vsel %vm2426_vm7, %v2774_v43, %v2776_v17 }
 0x39b   : > { %v2782_v10 = vadd.f32 %v2778_v22, %v2737_v24  ;;  %v2799_v2 = vadd.f32 %v2971_v55, %v2790_v61 }
 0x39d   : > { %v2791_v26 = vmul.f32 %v2970_v15, %v2782_v10  ;;  %v2837_v31 = vpop.permute.xlu0 %2836  ;;  %v2801_v51 = vmax.f32 %v2799_v2, 0.0  ;;  %v2835_v11 = vpop.permute.xlu1 %2834 }
 0x39e   : > { %v2842_v33 = vsel %vm2430_vm8, %v2835_v11, %v2837_v31 }
 0x39f   : > { %v2846_v5 = vadd.f32 %v2842_v33, %v2801_v51  ;;  %v2800_v34 = vadd.f32 %v2971_v55, %v2791_v26 }
 0x3a1   : > { %2848 = vst [vmem:[%s312_s24] sm:$0xff] %v2846_v5  ;;  %v2841_v23 = vpop.permute.xlu0 %2840  ;;  %v2802_v46 = vmax.f32 %v2800_v34, 0.0  ;;  %v2839_v50 = vpop.permute.xlu1 %2838 }
 0x3a2   : > { %v2843_v48 = vsel %vm2430_vm8, %v2839_v50, %v2841_v23 }
 0x3a3   : > { %v2847_v38 = vadd.f32 %v2843_v48, %v2802_v46 }
 0x3a5   : > { %2849 = vst [vmem:[%s312_s24 + $0x8] sm:$0xff] %v2847_v38 }
 0x3a6   : > { %3088 = shalt.err (!%p3085_p5)
}
 0x3a7   : > { %s3089_s23 = scalar_lea.hbm %s5394_s14, 256  ;;  %s3093_s12 = scalar_lea.hbm %s5451_s8, 512 }
 0x3a8   : > { %p3090_p6 = scmp.ne.s32.totalorder %s5394_s14, %s3089_s23  ;;  %p3094_p10 = scmp.lt.u32.totalorder %s5394_s14, %s5451_s8 }
 0x3a9   : > { %p3095_p11 = scmp.lt.u32.totalorder %s3093_s12, %s3089_s23  ;;  %p3097_p13 = scmp.lt.u32.totalorder %s3089_s23, %s5394_s14 }
 0x3aa   : > { %p3091_p7 = pnand %p3090_p6, %p3263_p4 }
 0x3ab   : > { %p3096_p12 = por %p3095_p11, %p3094_p10 }
 0x3ac   : > { %p3092_p9 = pneg %p3091_p7 }
 0x3ad   : > { %p3098_p0 = por %p3097_p13, %p3096_p12 }
 0x3af   : > { %p3099_p1 = pnand %p3098_p0, %p3092_p9 }
 0x3b1   : > { %3102 = shalt.err (!%p3099_p1)
}
 0x3b2   : > { %s3177_s30 = smov 128  }
 0x3b3   : > { %2980 = dma.vmem_to_hbm [thread:$0]  (%p3263_p4), %s5388_s11, 256, %s5394_s14, %s5396_s20, %s3177_s30, %s3177_s30, %s3161_s25  }
 0x3b4 PF: > { %p2986_p2 = scmp.ge.s32.totalorder %s3153_s10, 2  ;;  %s2881_s22 = sand.u32 1, %s3133_s27  }
 0x3b5   : > { %s2882_s26 = scalar_lea.sflag [#allocation4], %s2881_s22 }
 0x3b6   : > { %p2983_p3 = pnand %p2986_p2, %p3270_p8 }
 0x3b8   : > { %3128 = dma.done.wait (!%p2983_p3), %s2882_s26, 256  }
 0x3b9   : > { %3130 = vsyncadd (!%p2983_p3), %s2882_s26, 4294967040  ;;  %s21_s10 = sadd.s32 1, %s3153_s10   ;;  %s5651_s27 = smov %s3137_s28 }
 0x3ba   : > { %p18_p5 = scmp.ge.s32.totalorder %s21_s10, 4   ;;  %s5652_s28 = smov %s3141_s29 }
 0x3bb   : > { %s5653_s29 = smov %s3276_s18  ;;  %s5654_s30 = smov %s3149_s9 }
 0x3bc   : > { %s5655_s9 = smov %s5657_s13  ;;  %20 = sbr.rel (!%p18_p5) target bundleno = 4 (0x4), region = 90 }
 0x3c3   :  { %2887 = vsyncpa [#allocation4], 1 }
 0x3c4   :  { %2889 = vsyncpa [#allocation4 + $0x1], 1 }

</bundles_post_ra>
